<compile_context>
chip_gen: v5e
topology: v5e:2x2
jax: 0.10.0
libtpu: 0.0.40
codegen_flags: <defaults>
</compile_context>

<pallas_src>
import functools

import jax
import jax.numpy as jnp
from jax.experimental import pallas as pl
from jax.experimental.pallas import tpu as pltpu


def _inception_conv_kernel(x_ref, w_ref, b_ref, o_ref,
                           xp_ref, xrow_ref, patch_ref,
                           *, K, H, W, Wp, pad, C_in, M, Mr):
    """Fused KxK conv for one (C_out-tile, batch) grid cell via in-kernel im2col.

    x_ref:     (C_in, H*W)        unpadded input image, flattened row-major
    w_ref:     (tCo, K*K*C_in)    packed fused weights, row index = (kx, ky, ci)
    b_ref:     (tCo, 1)           fused (averaged) bias, f32
    o_ref:     (tCo, H*W)         dense valid output
    xp_ref:    (C_in, Lp)         scratch: zero-padded input, flat over (Hp+1, Wp)
    xrow_ref:  (K*C_in, Mr)       scratch: row-shifted copies (one per ky)
    patch_ref: (K*K*C_in, M)      scratch: full im2col patch (col-shifted per kx)
    """
    KC = K * C_in

    # Stage 0: zero the padded buffer, then scatter the valid rows of x into it.
    # (Zeroed every grid step: scratch is per-core, so a one-shot
    #  pl.when(program_id == 0) guard would be unsafe under megacore splitting.)
    xp_ref[...] = jnp.zeros_like(xp_ref)
    for h in range(H):
        off = (pad + h) * Wp + pad
        xp_ref[:, off:off + W] = x_ref[:, h * W:(h + 1) * W]

    # Stage 1: row shifts - one copy per ky (K copies instead of K*K).
    for ky in range(K):
        xrow_ref[ky * C_in:(ky + 1) * C_in, :] = xp_ref[:, ky * Wp:ky * Wp + Mr]

    # Stage 2: column shifts - one copy per kx completes the im2col patch.
    for kx in range(K):
        patch_ref[kx * KC:(kx + 1) * KC, :] = xrow_ref[:, kx:kx + M]

    # Single MXU matmul over the full K*K*C_in contraction, f32 accumulation
    # (MXU/MRB accumulates internally; no per-offset VMEM read-modify-write).
    acc = jnp.dot(w_ref[...], patch_ref[...], preferred_element_type=jnp.float32)
    acc = acc + b_ref[...]

    # Strip the padded columns while storing: o[:, h*W + w] = acc[:, h*Wp + w].
    for h in range(H):
        o_ref[:, h * W:(h + 1) * W] = acc[:, h * Wp:h * Wp + W].astype(o_ref.dtype)


def inception_block_v1(x, weights, biases=None):
    """Equivalent of Inception_Block_V1.forward(x).

    x:       (B, C_in, H, W)
    weights: list of (C_out, C_in, 2i+1, 2i+1) conv kernels, i = 0..num_kernels-1
    biases:  list of (C_out,) or None
    returns: (B, C_out, H, W)
    """
    num_kernels = len(weights)
    K = 2 * num_kernels - 1
    pad = num_kernels - 1
    B, C_in, H, W = x.shape
    C_out = weights[0].shape[0]
    dtype = x.dtype
    itemsize = jnp.dtype(dtype).itemsize

    # ---- Fuse the num_kernels parallel convs into ONE KxK conv (exact). ----
    w_comb = jnp.zeros((C_out, C_in, K, K), jnp.float32)
    for wi in weights:
        k = wi.shape[-1]
        off = (K - k) // 2
        w_comb = w_comb.at[:, :, off:off + k, off:off + k].add(wi.astype(jnp.float32))
    w_comb = w_comb / num_kernels
    if biases is None:
        b_comb = jnp.zeros((C_out,), jnp.float32)
    else:
        b_comb = jnp.mean(jnp.stack([b.astype(jnp.float32) for b in biases]), axis=0)

    # im2col weight packing: row index = kx*(K*C_in) + ky*C_in + ci.
    w_kern = jnp.transpose(w_comb, (0, 3, 2, 1)).reshape(C_out, K * K * C_in).astype(dtype)
    b_kern = b_comb.reshape(C_out, 1)

    # Geometry of the in-kernel padded / shifted buffers.
    Hp, Wp = H + 2 * pad, W + 2 * pad
    HW = H * W
    M = H * Wp                 # patch columns (padded width; valid cols extracted in-kernel)
    Mr = M + K - 1             # row-shift buffer width (covers all kx shifts)
    Lp = (Hp + 1) * Wp         # padded flat input (+1 zero row keeps all slices in bounds)
    KKC = K * K * C_in

    # C_out tiling: 256-wide output tiles match the v6e/v7x 2x256x256 MXU;
    # a small C_out stays as a single tile.
    # TODO(synk): prefer tCo=128 on v5e (4x128x128 MXU) via pltpu.get_tpu_info().
    if C_out % 256 == 0:
        tCo = 256
    elif C_out % 128 == 0:
        tCo = 128
    else:
        tCo = C_out

    # VMEM budget: double-buffered blocks + single-buffered scratch + f32 acc.
    def vmem_need(tco):
        blocks = 2 * (C_in * HW * itemsize      # x block
                      + tco * KKC * itemsize    # packed weight block
                      + tco * 4                 # bias block (f32)
                      + tco * HW * itemsize)    # output block
        scratch = (C_in * Lp + K * C_in * Mr + KKC * M) * itemsize
        acc = tco * M * 4
        return blocks + scratch + 2 * acc       # 2x acc as slack for temporaries

    VMEM_CAP = 48 * 2 ** 20   # safe on v7x (64 MiB physical); v5e/v6e have 128 MiB.
    while vmem_need(tCo) > VMEM_CAP and tCo % 2 == 0 and tCo > 8:
        tCo //= 2
    n_co = C_out // tCo
    vmem_limit = int(min(max(int(1.25 * vmem_need(tCo)) + (2 << 20), 16 << 20), VMEM_CAP))
    # TODO(synk): for very large H*W (or if the im2col patch still exceeds the
    # budget) add a spatial grid axis over output-row groups (halo via
    # pl.Element offsets) and/or fall back to K per-ky dots of (K*C_in, M).

    x_flat = x.reshape(B, C_in, HW)   # free reshape (merges contiguous minor dims)

    kern = functools.partial(_inception_conv_kernel, K=K, H=H, W=W, Wp=Wp,
                             pad=pad, C_in=C_in, M=M, Mr=Mr)

    out_flat = pl.pallas_call(
        kern,
        out_shape=jax.ShapeDtypeStruct((B, C_out, HW), dtype),
        grid_spec=pltpu.PrefetchScalarGridSpec(
            num_scalar_prefetch=0,
            # C_out-tile axis outermost: the (large) weight block index is
            # constant across the inner batch loop, so it is not re-DMA'd.
            grid=(n_co, B),
            in_specs=[
                pl.BlockSpec((None, C_in, HW), lambda j, b: (b, 0, 0)),
                pl.BlockSpec((tCo, KKC), lambda j, b: (j, 0)),
                pl.BlockSpec((tCo, 1), lambda j, b: (j, 0)),
            ],
            out_specs=pl.BlockSpec((None, tCo, HW), lambda j, b: (b, j, 0)),
            scratch_shapes=[
                pltpu.VMEM((C_in, Lp), dtype),        # zero-padded flat input
                pltpu.VMEM((K * C_in, Mr), dtype),    # row-shifted copies
                pltpu.VMEM((KKC, M), dtype),          # im2col patch
            ],
        ),
        compiler_params=pltpu.CompilerParams(
            dimension_semantics=("parallel", "parallel"),
            vmem_limit_bytes=vmem_limit,
        ),
    )(x_flat, w_kern, b_kern)

    # Free reshape back to NCHW (minor dim is already the dense H*W).
    return out_flat.reshape(B, C_out, H, W)


if __name__ == "__main__":
    key = jax.random.PRNGKey(0)
    B, C_in, C_out, H, W = 2, 4, 8, 16, 16
    num_kernels = 6  # module default

    keys = jax.random.split(key, num_kernels + 1)
    x = jax.random.normal(keys[0], (B, C_in, H, W), dtype=jnp.float32)

    # Deterministic weights mimicking kaiming_normal_(mode='fan_out', relu); biases = 0.
    weights, biases = [], []
    for i in range(num_kernels):
        k = 2 * i + 1
        std = (2.0 / (C_out * k * k)) ** 0.5
        weights.append(std * jax.random.normal(keys[i + 1], (C_out, C_in, k, k),
                                               dtype=jnp.float32))
        biases.append(jnp.zeros((C_out,), jnp.float32))

    y = jax.block_until_ready(inception_block_v1(x, weights, biases))

    # Reference: literal Inception_Block_V1 forward (num_kernels convs, stack, mean).
    outs = []
    for i in range(num_kernels):
        p = i
        o = jax.lax.conv_general_dilated(
            x, weights[i], window_strides=(1, 1), padding=((p, p), (p, p)),
            dimension_numbers=("NCHW", "OIHW", "NCHW"))
        outs.append(o + biases[i][None, :, None, None])
    expected = jnp.mean(jnp.stack(outs, axis=-1), axis=-1)

    assert y.shape == (B, C_out, H, W), y.shape
    assert y.dtype == x.dtype
    assert jnp.allclose(y, expected, rtol=1e-4, atol=1e-4), \
        float(jnp.max(jnp.abs(y - expected)))
    print("KERNEL_OK")
</pallas_src>

<mosaic_0001>
module attributes {stable_mosaic.version = 11 : i64} {
  func.func @_inception_conv_kernel(%arg0: i32, %arg1: i32, %arg2: memref<1x4x256xf32, #tpu.memory_space<vmem>>, %arg3: memref<8x484xf32, #tpu.memory_space<vmem>>, %arg4: memref<8x1xf32, #tpu.memory_space<vmem>>, %arg5: memref<1x8x256xf32, #tpu.memory_space<vmem>>, %arg6: memref<4x702xf32, #tpu.memory_space<vmem>>, %arg7: memref<44x426xf32, #tpu.memory_space<vmem>>, %arg8: memref<484x416xf32, #tpu.memory_space<vmem>>) attributes {dimension_semantics = [#tpu.dimension_semantics<parallel>, #tpu.dimension_semantics<parallel>], iteration_bounds = array<i64: 1, 2>, scalar_prefetch = 0 : i64, scratch_operands = 3 : i64, tpu.core_type = #tpu.core_type<tc>, window_params = [{transform_indices = @transform_0, window_bounds = array<i64: 1, 4, 256>}, {transform_indices = @transform_1, window_bounds = array<i64: 8, 484>}, {transform_indices = @transform_2, window_bounds = array<i64: 8, 1>}, {transform_indices = @transform_3, window_bounds = array<i64: 1, 8, 256>}]} {
    %cst = arith.constant 0.000000e+00 : f32
    %0 = vector.broadcast %cst : f32 to vector<4x702xf32>
    %c0 = arith.constant 0 : index
    %c0_0 = arith.constant 0 : index
    %1 = vector.load %arg6[%c0, %c0_0] : memref<4x702xf32, #tpu.memory_space<vmem>>, vector<4x702xf32>
    tpu.vector_store %arg6[%c0, %c0_0], %0 {strides = array<i32>} : memref<4x702xf32, #tpu.memory_space<vmem>>, vector<4x702xf32>,
    %c0_1 = arith.constant 0 : index
    %c0_2 = arith.constant 0 : index
    %c0_3 = arith.constant 0 : index
    %2 = vector.load %arg2[%c0_1, %c0_2, %c0_3] : memref<1x4x256xf32, #tpu.memory_space<vmem>>, vector<1x4x16xf32>
    %3 = vector.shape_cast %2 : vector<1x4x16xf32> to vector<4x16xf32>
    %c0_4 = arith.constant 0 : index
    %c135 = arith.constant 135 : index
    %4 = vector.load %arg6[%c0_4, %c135] : memref<4x702xf32, #tpu.memory_space<vmem>>, vector<4x16xf32>
    tpu.vector_store %arg6[%c0_4, %c135], %3 {strides = array<i32>} : memref<4x702xf32, #tpu.memory_space<vmem>>, vector<4x16xf32>,
    %c0_5 = arith.constant 0 : index
    %c0_6 = arith.constant 0 : index
    %c16 = arith.constant 16 : index
    %5 = vector.load %arg2[%c0_5, %c0_6, %c16] : memref<1x4x256xf32, #tpu.memory_space<vmem>>, vector<1x4x16xf32>
    %6 = vector.shape_cast %5 : vector<1x4x16xf32> to vector<4x16xf32>
    %c0_7 = arith.constant 0 : index
    %c161 = arith.constant 161 : index
    %7 = vector.load %arg6[%c0_7, %c161] : memref<4x702xf32, #tpu.memory_space<vmem>>, vector<4x16xf32>
    tpu.vector_store %arg6[%c0_7, %c161], %6 {strides = array<i32>} : memref<4x702xf32, #tpu.memory_space<vmem>>, vector<4x16xf32>,
    %c0_8 = arith.constant 0 : index
    %c0_9 = arith.constant 0 : index
    %c32 = arith.constant 32 : index
    %8 = vector.load %arg2[%c0_8, %c0_9, %c32] : memref<1x4x256xf32, #tpu.memory_space<vmem>>, vector<1x4x16xf32>
    %9 = vector.shape_cast %8 : vector<1x4x16xf32> to vector<4x16xf32>
    %c0_10 = arith.constant 0 : index
    %c187 = arith.constant 187 : index
    %10 = vector.load %arg6[%c0_10, %c187] : memref<4x702xf32, #tpu.memory_space<vmem>>, vector<4x16xf32>
    tpu.vector_store %arg6[%c0_10, %c187], %9 {strides = array<i32>} : memref<4x702xf32, #tpu.memory_space<vmem>>, vector<4x16xf32>,
    %c0_11 = arith.constant 0 : index
    %c0_12 = arith.constant 0 : index
    %c48 = arith.constant 48 : index
    %11 = vector.load %arg2[%c0_11, %c0_12, %c48] : memref<1x4x256xf32, #tpu.memory_space<vmem>>, vector<1x4x16xf32>
    %12 = vector.shape_cast %11 : vector<1x4x16xf32> to vector<4x16xf32>
    %c0_13 = arith.constant 0 : index
    %c213 = arith.constant 213 : index
    %13 = vector.load %arg6[%c0_13, %c213] : memref<4x702xf32, #tpu.memory_space<vmem>>, vector<4x16xf32>
    tpu.vector_store %arg6[%c0_13, %c213], %12 {strides = array<i32>} : memref<4x702xf32, #tpu.memory_space<vmem>>, vector<4x16xf32>,
    %c0_14 = arith.constant 0 : index
    %c0_15 = arith.constant 0 : index
    %c64 = arith.constant 64 : index
    %14 = vector.load %arg2[%c0_14, %c0_15, %c64] : memref<1x4x256xf32, #tpu.memory_space<vmem>>, vector<1x4x16xf32>
    %15 = vector.shape_cast %14 : vector<1x4x16xf32> to vector<4x16xf32>
    %c0_16 = arith.constant 0 : index
    %c239 = arith.constant 239 : index
    %16 = vector.load %arg6[%c0_16, %c239] : memref<4x702xf32, #tpu.memory_space<vmem>>, vector<4x16xf32>
    tpu.vector_store %arg6[%c0_16, %c239], %15 {strides = array<i32>} : memref<4x702xf32, #tpu.memory_space<vmem>>, vector<4x16xf32>,
    %c0_17 = arith.constant 0 : index
    %c0_18 = arith.constant 0 : index
    %c80 = arith.constant 80 : index
    %17 = vector.load %arg2[%c0_17, %c0_18, %c80] : memref<1x4x256xf32, #tpu.memory_space<vmem>>, vector<1x4x16xf32>
    %18 = vector.shape_cast %17 : vector<1x4x16xf32> to vector<4x16xf32>
    %c0_19 = arith.constant 0 : index
    %c265 = arith.constant 265 : index
    %19 = vector.load %arg6[%c0_19, %c265] : memref<4x702xf32, #tpu.memory_space<vmem>>, vector<4x16xf32>
    tpu.vector_store %arg6[%c0_19, %c265], %18 {strides = array<i32>} : memref<4x702xf32, #tpu.memory_space<vmem>>, vector<4x16xf32>,
    %c0_20 = arith.constant 0 : index
    %c0_21 = arith.constant 0 : index
    %c96 = arith.constant 96 : index
    %20 = vector.load %arg2[%c0_20, %c0_21, %c96] : memref<1x4x256xf32, #tpu.memory_space<vmem>>, vector<1x4x16xf32>
    %21 = vector.shape_cast %20 : vector<1x4x16xf32> to vector<4x16xf32>
    %c0_22 = arith.constant 0 : index
    %c291 = arith.constant 291 : index
    %22 = vector.load %arg6[%c0_22, %c291] : memref<4x702xf32, #tpu.memory_space<vmem>>, vector<4x16xf32>
    tpu.vector_store %arg6[%c0_22, %c291], %21 {strides = array<i32>} : memref<4x702xf32, #tpu.memory_space<vmem>>, vector<4x16xf32>,
    %c0_23 = arith.constant 0 : index
    %c0_24 = arith.constant 0 : index
    %c112 = arith.constant 112 : index
    %23 = vector.load %arg2[%c0_23, %c0_24, %c112] : memref<1x4x256xf32, #tpu.memory_space<vmem>>, vector<1x4x16xf32>
    %24 = vector.shape_cast %23 : vector<1x4x16xf32> to vector<4x16xf32>
    %c0_25 = arith.constant 0 : index
    %c317 = arith.constant 317 : index
    %25 = vector.load %arg6[%c0_25, %c317] : memref<4x702xf32, #tpu.memory_space<vmem>>, vector<4x16xf32>
    tpu.vector_store %arg6[%c0_25, %c317], %24 {strides = array<i32>} : memref<4x702xf32, #tpu.memory_space<vmem>>, vector<4x16xf32>,
    %c0_26 = arith.constant 0 : index
    %c0_27 = arith.constant 0 : index
    %c128 = arith.constant 128 : index
    %26 = vector.load %arg2[%c0_26, %c0_27, %c128] : memref<1x4x256xf32, #tpu.memory_space<vmem>>, vector<1x4x16xf32>
    %27 = vector.shape_cast %26 : vector<1x4x16xf32> to vector<4x16xf32>
    %c0_28 = arith.constant 0 : index
    %c343 = arith.constant 343 : index
    %28 = vector.load %arg6[%c0_28, %c343] : memref<4x702xf32, #tpu.memory_space<vmem>>, vector<4x16xf32>
    tpu.vector_store %arg6[%c0_28, %c343], %27 {strides = array<i32>} : memref<4x702xf32, #tpu.memory_space<vmem>>, vector<4x16xf32>,
    %c0_29 = arith.constant 0 : index
    %c0_30 = arith.constant 0 : index
    %c144 = arith.constant 144 : index
    %29 = vector.load %arg2[%c0_29, %c0_30, %c144] : memref<1x4x256xf32, #tpu.memory_space<vmem>>, vector<1x4x16xf32>
    %30 = vector.shape_cast %29 : vector<1x4x16xf32> to vector<4x16xf32>
    %c0_31 = arith.constant 0 : index
    %c369 = arith.constant 369 : index
    %31 = vector.load %arg6[%c0_31, %c369] : memref<4x702xf32, #tpu.memory_space<vmem>>, vector<4x16xf32>
    tpu.vector_store %arg6[%c0_31, %c369], %30 {strides = array<i32>} : memref<4x702xf32, #tpu.memory_space<vmem>>, vector<4x16xf32>,
    %c0_32 = arith.constant 0 : index
    %c0_33 = arith.constant 0 : index
    %c160 = arith.constant 160 : index
    %32 = vector.load %arg2[%c0_32, %c0_33, %c160] : memref<1x4x256xf32, #tpu.memory_space<vmem>>, vector<1x4x16xf32>
    %33 = vector.shape_cast %32 : vector<1x4x16xf32> to vector<4x16xf32>
    %c0_34 = arith.constant 0 : index
    %c395 = arith.constant 395 : index
    %34 = vector.load %arg6[%c0_34, %c395] : memref<4x702xf32, #tpu.memory_space<vmem>>, vector<4x16xf32>
    tpu.vector_store %arg6[%c0_34, %c395], %33 {strides = array<i32>} : memref<4x702xf32, #tpu.memory_space<vmem>>, vector<4x16xf32>,
    %c0_35 = arith.constant 0 : index
    %c0_36 = arith.constant 0 : index
    %c176 = arith.constant 176 : index
    %35 = vector.load %arg2[%c0_35, %c0_36, %c176] : memref<1x4x256xf32, #tpu.memory_space<vmem>>, vector<1x4x16xf32>
    %36 = vector.shape_cast %35 : vector<1x4x16xf32> to vector<4x16xf32>
    %c0_37 = arith.constant 0 : index
    %c421 = arith.constant 421 : index
    %37 = vector.load %arg6[%c0_37, %c421] : memref<4x702xf32, #tpu.memory_space<vmem>>, vector<4x16xf32>
    tpu.vector_store %arg6[%c0_37, %c421], %36 {strides = array<i32>} : memref<4x702xf32, #tpu.memory_space<vmem>>, vector<4x16xf32>,
    %c0_38 = arith.constant 0 : index
    %c0_39 = arith.constant 0 : index
    %c192 = arith.constant 192 : index
    %38 = vector.load %arg2[%c0_38, %c0_39, %c192] : memref<1x4x256xf32, #tpu.memory_space<vmem>>, vector<1x4x16xf32>
    %39 = vector.shape_cast %38 : vector<1x4x16xf32> to vector<4x16xf32>
    %c0_40 = arith.constant 0 : index
    %c447 = arith.constant 447 : index
    %40 = vector.load %arg6[%c0_40, %c447] : memref<4x702xf32, #tpu.memory_space<vmem>>, vector<4x16xf32>
    tpu.vector_store %arg6[%c0_40, %c447], %39 {strides = array<i32>} : memref<4x702xf32, #tpu.memory_space<vmem>>, vector<4x16xf32>,
    %c0_41 = arith.constant 0 : index
    %c0_42 = arith.constant 0 : index
    %c208 = arith.constant 208 : index
    %41 = vector.load %arg2[%c0_41, %c0_42, %c208] : memref<1x4x256xf32, #tpu.memory_space<vmem>>, vector<1x4x16xf32>
    %42 = vector.shape_cast %41 : vector<1x4x16xf32> to vector<4x16xf32>
    %c0_43 = arith.constant 0 : index
    %c473 = arith.constant 473 : index
    %43 = vector.load %arg6[%c0_43, %c473] : memref<4x702xf32, #tpu.memory_space<vmem>>, vector<4x16xf32>
    tpu.vector_store %arg6[%c0_43, %c473], %42 {strides = array<i32>} : memref<4x702xf32, #tpu.memory_space<vmem>>, vector<4x16xf32>,
    %c0_44 = arith.constant 0 : index
    %c0_45 = arith.constant 0 : index
    %c224 = arith.constant 224 : index
    %44 = vector.load %arg2[%c0_44, %c0_45, %c224] : memref<1x4x256xf32, #tpu.memory_space<vmem>>, vector<1x4x16xf32>
    %45 = vector.shape_cast %44 : vector<1x4x16xf32> to vector<4x16xf32>
    %c0_46 = arith.constant 0 : index
    %c499 = arith.constant 499 : index
    %46 = vector.load %arg6[%c0_46, %c499] : memref<4x702xf32, #tpu.memory_space<vmem>>, vector<4x16xf32>
    tpu.vector_store %arg6[%c0_46, %c499], %45 {strides = array<i32>} : memref<4x702xf32, #tpu.memory_space<vmem>>, vector<4x16xf32>,
    %c0_47 = arith.constant 0 : index
    %c0_48 = arith.constant 0 : index
    %c240 = arith.constant 240 : index
    %47 = vector.load %arg2[%c0_47, %c0_48, %c240] : memref<1x4x256xf32, #tpu.memory_space<vmem>>, vector<1x4x16xf32>
    %48 = vector.shape_cast %47 : vector<1x4x16xf32> to vector<4x16xf32>
    %c0_49 = arith.constant 0 : index
    %c525 = arith.constant 525 : index
    %49 = vector.load %arg6[%c0_49, %c525] : memref<4x702xf32, #tpu.memory_space<vmem>>, vector<4x16xf32>
    tpu.vector_store %arg6[%c0_49, %c525], %48 {strides = array<i32>} : memref<4x702xf32, #tpu.memory_space<vmem>>, vector<4x16xf32>,
    %c0_50 = arith.constant 0 : index
    %c0_51 = arith.constant 0 : index
    %50 = vector.load %arg6[%c0_50, %c0_51] : memref<4x702xf32, #tpu.memory_space<vmem>>, vector<4x426xf32>
    %c0_52 = arith.constant 0 : index
    %c0_53 = arith.constant 0 : index
    %51 = vector.load %arg7[%c0_52, %c0_53] : memref<44x426xf32, #tpu.memory_space<vmem>>, vector<4x426xf32>
    tpu.vector_store %arg7[%c0_52, %c0_53], %50 {strides = array<i32>} : memref<44x426xf32, #tpu.memory_space<vmem>>, vector<4x426xf32>,
    %c0_54 = arith.constant 0 : index
    %c26 = arith.constant 26 : index
    %52 = vector.load %arg6[%c0_54, %c26] : memref<4x702xf32, #tpu.memory_space<vmem>>, vector<4x426xf32>
    %c4 = arith.constant 4 : index
    %c0_55 = arith.constant 0 : index
    %53 = vector.load %arg7[%c4, %c0_55] : memref<44x426xf32, #tpu.memory_space<vmem>>, vector<4x426xf32>
    tpu.vector_store %arg7[%c4, %c0_55], %52 {strides = array<i32>} : memref<44x426xf32, #tpu.memory_space<vmem>>, vector<4x426xf32>,
    %c0_56 = arith.constant 0 : index
    %c52 = arith.constant 52 : index
    %54 = vector.load %arg6[%c0_56, %c52] : memref<4x702xf32, #tpu.memory_space<vmem>>, vector<4x426xf32>
    %c8 = arith.constant 8 : index
    %c0_57 = arith.constant 0 : index
    %55 = vector.load %arg7[%c8, %c0_57] : memref<44x426xf32, #tpu.memory_space<vmem>>, vector<4x426xf32>
    tpu.vector_store %arg7[%c8, %c0_57], %54 {strides = array<i32>} : memref<44x426xf32, #tpu.memory_space<vmem>>, vector<4x426xf32>,
    %c0_58 = arith.constant 0 : index
    %c78 = arith.constant 78 : index
    %56 = vector.load %arg6[%c0_58, %c78] : memref<4x702xf32, #tpu.memory_space<vmem>>, vector<4x426xf32>
    %c12 = arith.constant 12 : index
    %c0_59 = arith.constant 0 : index
    %57 = vector.load %arg7[%c12, %c0_59] : memref<44x426xf32, #tpu.memory_space<vmem>>, vector<4x426xf32>
    tpu.vector_store %arg7[%c12, %c0_59], %56 {strides = array<i32>} : memref<44x426xf32, #tpu.memory_space<vmem>>, vector<4x426xf32>,
    %c0_60 = arith.constant 0 : index
    %c104 = arith.constant 104 : index
    %58 = vector.load %arg6[%c0_60, %c104] : memref<4x702xf32, #tpu.memory_space<vmem>>, vector<4x426xf32>
    %c16_61 = arith.constant 16 : index
    %c0_62 = arith.constant 0 : index
    %59 = vector.load %arg7[%c16_61, %c0_62] : memref<44x426xf32, #tpu.memory_space<vmem>>, vector<4x426xf32>
    tpu.vector_store %arg7[%c16_61, %c0_62], %58 {strides = array<i32>} : memref<44x426xf32, #tpu.memory_space<vmem>>, vector<4x426xf32>,
    %c0_63 = arith.constant 0 : index
    %c130 = arith.constant 130 : index
    %60 = vector.load %arg6[%c0_63, %c130] : memref<4x702xf32, #tpu.memory_space<vmem>>, vector<4x426xf32>
    %c20 = arith.constant 20 : index
    %c0_64 = arith.constant 0 : index
    %61 = vector.load %arg7[%c20, %c0_64] : memref<44x426xf32, #tpu.memory_space<vmem>>, vector<4x426xf32>
    tpu.vector_store %arg7[%c20, %c0_64], %60 {strides = array<i32>} : memref<44x426xf32, #tpu.memory_space<vmem>>, vector<4x426xf32>,
    %c0_65 = arith.constant 0 : index
    %c156 = arith.constant 156 : index
    %62 = vector.load %arg6[%c0_65, %c156] : memref<4x702xf32, #tpu.memory_space<vmem>>, vector<4x426xf32>
    %c24 = arith.constant 24 : index
    %c0_66 = arith.constant 0 : index
    %63 = vector.load %arg7[%c24, %c0_66] : memref<44x426xf32, #tpu.memory_space<vmem>>, vector<4x426xf32>
    tpu.vector_store %arg7[%c24, %c0_66], %62 {strides = array<i32>} : memref<44x426xf32, #tpu.memory_space<vmem>>, vector<4x426xf32>,
    %c0_67 = arith.constant 0 : index
    %c182 = arith.constant 182 : index
    %64 = vector.load %arg6[%c0_67, %c182] : memref<4x702xf32, #tpu.memory_space<vmem>>, vector<4x426xf32>
    %c28 = arith.constant 28 : index
    %c0_68 = arith.constant 0 : index
    %65 = vector.load %arg7[%c28, %c0_68] : memref<44x426xf32, #tpu.memory_space<vmem>>, vector<4x426xf32>
    tpu.vector_store %arg7[%c28, %c0_68], %64 {strides = array<i32>} : memref<44x426xf32, #tpu.memory_space<vmem>>, vector<4x426xf32>,
    %c0_69 = arith.constant 0 : index
    %c208_70 = arith.constant 208 : index
    %66 = vector.load %arg6[%c0_69, %c208_70] : memref<4x702xf32, #tpu.memory_space<vmem>>, vector<4x426xf32>
    %c32_71 = arith.constant 32 : index
    %c0_72 = arith.constant 0 : index
    %67 = vector.load %arg7[%c32_71, %c0_72] : memref<44x426xf32, #tpu.memory_space<vmem>>, vector<4x426xf32>
    tpu.vector_store %arg7[%c32_71, %c0_72], %66 {strides = array<i32>} : memref<44x426xf32, #tpu.memory_space<vmem>>, vector<4x426xf32>,
    %c0_73 = arith.constant 0 : index
    %c234 = arith.constant 234 : index
    %68 = vector.load %arg6[%c0_73, %c234] : memref<4x702xf32, #tpu.memory_space<vmem>>, vector<4x426xf32>
    %c36 = arith.constant 36 : index
    %c0_74 = arith.constant 0 : index
    %69 = vector.load %arg7[%c36, %c0_74] : memref<44x426xf32, #tpu.memory_space<vmem>>, vector<4x426xf32>
    tpu.vector_store %arg7[%c36, %c0_74], %68 {strides = array<i32>} : memref<44x426xf32, #tpu.memory_space<vmem>>, vector<4x426xf32>,
    %c0_75 = arith.constant 0 : index
    %c260 = arith.constant 260 : index
    %70 = vector.load %arg6[%c0_75, %c260] : memref<4x702xf32, #tpu.memory_space<vmem>>, vector<4x426xf32>
    %c40 = arith.constant 40 : index
    %c0_76 = arith.constant 0 : index
    %71 = vector.load %arg7[%c40, %c0_76] : memref<44x426xf32, #tpu.memory_space<vmem>>, vector<4x426xf32>
    tpu.vector_store %arg7[%c40, %c0_76], %70 {strides = array<i32>} : memref<44x426xf32, #tpu.memory_space<vmem>>, vector<4x426xf32>,
    %c0_77 = arith.constant 0 : index
    %c0_78 = arith.constant 0 : index
    %72 = vector.load %arg7[%c0_77, %c0_78] : memref<44x426xf32, #tpu.memory_space<vmem>>, vector<44x416xf32>
    %c0_79 = arith.constant 0 : index
    %c0_80 = arith.constant 0 : index
    %73 = vector.load %arg8[%c0_79, %c0_80] : memref<484x416xf32, #tpu.memory_space<vmem>>, vector<44x416xf32>
    tpu.vector_store %arg8[%c0_79, %c0_80], %72 {strides = array<i32>} : memref<484x416xf32, #tpu.memory_space<vmem>>, vector<44x416xf32>,
    %c0_81 = arith.constant 0 : index
    %c1 = arith.constant 1 : index
    %74 = vector.load %arg7[%c0_81, %c1] : memref<44x426xf32, #tpu.memory_space<vmem>>, vector<44x416xf32>
    %c44 = arith.constant 44 : index
    %c0_82 = arith.constant 0 : index
    %75 = vector.load %arg8[%c44, %c0_82] : memref<484x416xf32, #tpu.memory_space<vmem>>, vector<44x416xf32>
    tpu.vector_store %arg8[%c44, %c0_82], %74 {strides = array<i32>} : memref<484x416xf32, #tpu.memory_space<vmem>>, vector<44x416xf32>,
    %c0_83 = arith.constant 0 : index
    %c2 = arith.constant 2 : index
    %76 = vector.load %arg7[%c0_83, %c2] : memref<44x426xf32, #tpu.memory_space<vmem>>, vector<44x416xf32>
    %c88 = arith.constant 88 : index
    %c0_84 = arith.constant 0 : index
    %77 = vector.load %arg8[%c88, %c0_84] : memref<484x416xf32, #tpu.memory_space<vmem>>, vector<44x416xf32>
    tpu.vector_store %arg8[%c88, %c0_84], %76 {strides = array<i32>} : memref<484x416xf32, #tpu.memory_space<vmem>>, vector<44x416xf32>,
    %c0_85 = arith.constant 0 : index
    %c3 = arith.constant 3 : index
    %78 = vector.load %arg7[%c0_85, %c3] : memref<44x426xf32, #tpu.memory_space<vmem>>, vector<44x416xf32>
    %c132 = arith.constant 132 : index
    %c0_86 = arith.constant 0 : index
    %79 = vector.load %arg8[%c132, %c0_86] : memref<484x416xf32, #tpu.memory_space<vmem>>, vector<44x416xf32>
    tpu.vector_store %arg8[%c132, %c0_86], %78 {strides = array<i32>} : memref<484x416xf32, #tpu.memory_space<vmem>>, vector<44x416xf32>,
    %c0_87 = arith.constant 0 : index
    %c4_88 = arith.constant 4 : index
    %80 = vector.load %arg7[%c0_87, %c4_88] : memref<44x426xf32, #tpu.memory_space<vmem>>, vector<44x416xf32>
    %c176_89 = arith.constant 176 : index
    %c0_90 = arith.constant 0 : index
    %81 = vector.load %arg8[%c176_89, %c0_90] : memref<484x416xf32, #tpu.memory_space<vmem>>, vector<44x416xf32>
    tpu.vector_store %arg8[%c176_89, %c0_90], %80 {strides = array<i32>} : memref<484x416xf32, #tpu.memory_space<vmem>>, vector<44x416xf32>,
    %c0_91 = arith.constant 0 : index
    %c5 = arith.constant 5 : index
    %82 = vector.load %arg7[%c0_91, %c5] : memref<44x426xf32, #tpu.memory_space<vmem>>, vector<44x416xf32>
    %c220 = arith.constant 220 : index
    %c0_92 = arith.constant 0 : index
    %83 = vector.load %arg8[%c220, %c0_92] : memref<484x416xf32, #tpu.memory_space<vmem>>, vector<44x416xf32>
    tpu.vector_store %arg8[%c220, %c0_92], %82 {strides = array<i32>} : memref<484x416xf32, #tpu.memory_space<vmem>>, vector<44x416xf32>,
    %c0_93 = arith.constant 0 : index
    %c6 = arith.constant 6 : index
    %84 = vector.load %arg7[%c0_93, %c6] : memref<44x426xf32, #tpu.memory_space<vmem>>, vector<44x416xf32>
    %c264 = arith.constant 264 : index
    %c0_94 = arith.constant 0 : index
    %85 = vector.load %arg8[%c264, %c0_94] : memref<484x416xf32, #tpu.memory_space<vmem>>, vector<44x416xf32>
    tpu.vector_store %arg8[%c264, %c0_94], %84 {strides = array<i32>} : memref<484x416xf32, #tpu.memory_space<vmem>>, vector<44x416xf32>,
    %c0_95 = arith.constant 0 : index
    %c7 = arith.constant 7 : index
    %86 = vector.load %arg7[%c0_95, %c7] : memref<44x426xf32, #tpu.memory_space<vmem>>, vector<44x416xf32>
    %c308 = arith.constant 308 : index
    %c0_96 = arith.constant 0 : index
    %87 = vector.load %arg8[%c308, %c0_96] : memref<484x416xf32, #tpu.memory_space<vmem>>, vector<44x416xf32>
    tpu.vector_store %arg8[%c308, %c0_96], %86 {strides = array<i32>} : memref<484x416xf32, #tpu.memory_space<vmem>>, vector<44x416xf32>,
    %c0_97 = arith.constant 0 : index
    %c8_98 = arith.constant 8 : index
    %88 = vector.load %arg7[%c0_97, %c8_98] : memref<44x426xf32, #tpu.memory_space<vmem>>, vector<44x416xf32>
    %c352 = arith.constant 352 : index
    %c0_99 = arith.constant 0 : index
    %89 = vector.load %arg8[%c352, %c0_99] : memref<484x416xf32, #tpu.memory_space<vmem>>, vector<44x416xf32>
    tpu.vector_store %arg8[%c352, %c0_99], %88 {strides = array<i32>} : memref<484x416xf32, #tpu.memory_space<vmem>>, vector<44x416xf32>,
    %c0_100 = arith.constant 0 : index
    %c9 = arith.constant 9 : index
    %90 = vector.load %arg7[%c0_100, %c9] : memref<44x426xf32, #tpu.memory_space<vmem>>, vector<44x416xf32>
    %c396 = arith.constant 396 : index
    %c0_101 = arith.constant 0 : index
    %91 = vector.load %arg8[%c396, %c0_101] : memref<484x416xf32, #tpu.memory_space<vmem>>, vector<44x416xf32>
    tpu.vector_store %arg8[%c396, %c0_101], %90 {strides = array<i32>} : memref<484x416xf32, #tpu.memory_space<vmem>>, vector<44x416xf32>,
    %c0_102 = arith.constant 0 : index
    %c10 = arith.constant 10 : index
    %92 = vector.load %arg7[%c0_102, %c10] : memref<44x426xf32, #tpu.memory_space<vmem>>, vector<44x416xf32>
    %c440 = arith.constant 440 : index
    %c0_103 = arith.constant 0 : index
    %93 = vector.load %arg8[%c440, %c0_103] : memref<484x416xf32, #tpu.memory_space<vmem>>, vector<44x416xf32>
    tpu.vector_store %arg8[%c440, %c0_103], %92 {strides = array<i32>} : memref<484x416xf32, #tpu.memory_space<vmem>>, vector<44x416xf32>,
    %c0_104 = arith.constant 0 : index
    %c0_105 = arith.constant 0 : index
    %94 = vector.load %arg3[%c0_104, %c0_105] : memref<8x484xf32, #tpu.memory_space<vmem>>, vector<8x484xf32>
    %c0_106 = arith.constant 0 : index
    %c0_107 = arith.constant 0 : index
    %95 = vector.load %arg8[%c0_106, %c0_107] : memref<484x416xf32, #tpu.memory_space<vmem>>, vector<484x416xf32>
    %cst_108 = arith.constant dense<0.000000e+00> : vector<8x416xf32>
    %96 = tpu.matmul %94, %95, %cst_108 {dimension_numbers = #tpu.dot_dimension_numbers<[1], [0], [0], [1], [0, 0, 1, 1], [], []>} : vector<8x484xf32>, vector<484x416xf32>, vector<8x416xf32> -> vector<8x416xf32>
    %c0_109 = arith.constant 0 : index
    %c0_110 = arith.constant 0 : index
    %97 = vector.load %arg4[%c0_109, %c0_110] : memref<8x1xf32, #tpu.memory_space<vmem>>, vector<8x1xf32>
    %98 = vector.broadcast %97 : vector<8x1xf32> to vector<8x416xf32>
    %99 = arith.addf %96, %98 : vector<8x416xf32>
    %100 = vector.extract_strided_slice %99 {offsets = [0, 0], sizes = [8, 16], strides = [1, 1]} : vector<8x416xf32> to vector<8x16xf32>
    %c0_111 = arith.constant 0 : index
    %c0_112 = arith.constant 0 : index
    %c0_113 = arith.constant 0 : index
    %101 = vector.load %arg5[%c0_111, %c0_112, %c0_113] : memref<1x8x256xf32, #tpu.memory_space<vmem>>, vector<1x8x16xf32>
    %102 = vector.shape_cast %101 : vector<1x8x16xf32> to vector<8x16xf32>
    %103 = vector.shape_cast %100 : vector<8x16xf32> to vector<1x8x16xf32>
    tpu.vector_store %arg5[%c0_111, %c0_112, %c0_113], %103 {strides = array<i32>} : memref<1x8x256xf32, #tpu.memory_space<vmem>>, vector<1x8x16xf32>,
    %104 = vector.extract_strided_slice %99 {offsets = [0, 26], sizes = [8, 16], strides = [1, 1]} : vector<8x416xf32> to vector<8x16xf32>
    %c0_114 = arith.constant 0 : index
    %c0_115 = arith.constant 0 : index
    %c16_116 = arith.constant 16 : index
    %105 = vector.load %arg5[%c0_114, %c0_115, %c16_116] : memref<1x8x256xf32, #tpu.memory_space<vmem>>, vector<1x8x16xf32>
    %106 = vector.shape_cast %105 : vector<1x8x16xf32> to vector<8x16xf32>
    %107 = vector.shape_cast %104 : vector<8x16xf32> to vector<1x8x16xf32>
    tpu.vector_store %arg5[%c0_114, %c0_115, %c16_116], %107 {strides = array<i32>} : memref<1x8x256xf32, #tpu.memory_space<vmem>>, vector<1x8x16xf32>,
    %108 = vector.extract_strided_slice %99 {offsets = [0, 52], sizes = [8, 16], strides = [1, 1]} : vector<8x416xf32> to vector<8x16xf32>
    %c0_117 = arith.constant 0 : index
    %c0_118 = arith.constant 0 : index
    %c32_119 = arith.constant 32 : index
    %109 = vector.load %arg5[%c0_117, %c0_118, %c32_119] : memref<1x8x256xf32, #tpu.memory_space<vmem>>, vector<1x8x16xf32>
    %110 = vector.shape_cast %109 : vector<1x8x16xf32> to vector<8x16xf32>
    %111 = vector.shape_cast %108 : vector<8x16xf32> to vector<1x8x16xf32>
    tpu.vector_store %arg5[%c0_117, %c0_118, %c32_119], %111 {strides = array<i32>} : memref<1x8x256xf32, #tpu.memory_space<vmem>>, vector<1x8x16xf32>,
    %112 = vector.extract_strided_slice %99 {offsets = [0, 78], sizes = [8, 16], strides = [1, 1]} : vector<8x416xf32> to vector<8x16xf32>
    %c0_120 = arith.constant 0 : index
    %c0_121 = arith.constant 0 : index
    %c48_122 = arith.constant 48 : index
    %113 = vector.load %arg5[%c0_120, %c0_121, %c48_122] : memref<1x8x256xf32, #tpu.memory_space<vmem>>, vector<1x8x16xf32>
    %114 = vector.shape_cast %113 : vector<1x8x16xf32> to vector<8x16xf32>
    %115 = vector.shape_cast %112 : vector<8x16xf32> to vector<1x8x16xf32>
    tpu.vector_store %arg5[%c0_120, %c0_121, %c48_122], %115 {strides = array<i32>} : memref<1x8x256xf32, #tpu.memory_space<vmem>>, vector<1x8x16xf32>,
    %116 = vector.extract_strided_slice %99 {offsets = [0, 104], sizes = [8, 16], strides = [1, 1]} : vector<8x416xf32> to vector<8x16xf32>
    %c0_123 = arith.constant 0 : index
    %c0_124 = arith.constant 0 : index
    %c64_125 = arith.constant 64 : index
    %117 = vector.load %arg5[%c0_123, %c0_124, %c64_125] : memref<1x8x256xf32, #tpu.memory_space<vmem>>, vector<1x8x16xf32>
    %118 = vector.shape_cast %117 : vector<1x8x16xf32> to vector<8x16xf32>
    %119 = vector.shape_cast %116 : vector<8x16xf32> to vector<1x8x16xf32>
    tpu.vector_store %arg5[%c0_123, %c0_124, %c64_125], %119 {strides = array<i32>} : memref<1x8x256xf32, #tpu.memory_space<vmem>>, vector<1x8x16xf32>,
    %120 = vector.extract_strided_slice %99 {offsets = [0, 130], sizes = [8, 16], strides = [1, 1]} : vector<8x416xf32> to vector<8x16xf32>
    %c0_126 = arith.constant 0 : index
    %c0_127 = arith.constant 0 : index
    %c80_128 = arith.constant 80 : index
    %121 = vector.load %arg5[%c0_126, %c0_127, %c80_128] : memref<1x8x256xf32, #tpu.memory_space<vmem>>, vector<1x8x16xf32>
    %122 = vector.shape_cast %121 : vector<1x8x16xf32> to vector<8x16xf32>
    %123 = vector.shape_cast %120 : vector<8x16xf32> to vector<1x8x16xf32>
    tpu.vector_store %arg5[%c0_126, %c0_127, %c80_128], %123 {strides = array<i32>} : memref<1x8x256xf32, #tpu.memory_space<vmem>>, vector<1x8x16xf32>,
    %124 = vector.extract_strided_slice %99 {offsets = [0, 156], sizes = [8, 16], strides = [1, 1]} : vector<8x416xf32> to vector<8x16xf32>
    %c0_129 = arith.constant 0 : index
    %c0_130 = arith.constant 0 : index
    %c96_131 = arith.constant 96 : index
    %125 = vector.load %arg5[%c0_129, %c0_130, %c96_131] : memref<1x8x256xf32, #tpu.memory_space<vmem>>, vector<1x8x16xf32>
    %126 = vector.shape_cast %125 : vector<1x8x16xf32> to vector<8x16xf32>
    %127 = vector.shape_cast %124 : vector<8x16xf32> to vector<1x8x16xf32>
    tpu.vector_store %arg5[%c0_129, %c0_130, %c96_131], %127 {strides = array<i32>} : memref<1x8x256xf32, #tpu.memory_space<vmem>>, vector<1x8x16xf32>,
    %128 = vector.extract_strided_slice %99 {offsets = [0, 182], sizes = [8, 16], strides = [1, 1]} : vector<8x416xf32> to vector<8x16xf32>
    %c0_132 = arith.constant 0 : index
    %c0_133 = arith.constant 0 : index
    %c112_134 = arith.constant 112 : index
    %129 = vector.load %arg5[%c0_132, %c0_133, %c112_134] : memref<1x8x256xf32, #tpu.memory_space<vmem>>, vector<1x8x16xf32>
    %130 = vector.shape_cast %129 : vector<1x8x16xf32> to vector<8x16xf32>
    %131 = vector.shape_cast %128 : vector<8x16xf32> to vector<1x8x16xf32>
    tpu.vector_store %arg5[%c0_132, %c0_133, %c112_134], %131 {strides = array<i32>} : memref<1x8x256xf32, #tpu.memory_space<vmem>>, vector<1x8x16xf32>,
    %132 = vector.extract_strided_slice %99 {offsets = [0, 208], sizes = [8, 16], strides = [1, 1]} : vector<8x416xf32> to vector<8x16xf32>
    %c0_135 = arith.constant 0 : index
    %c0_136 = arith.constant 0 : index
    %c128_137 = arith.constant 128 : index
    %133 = vector.load %arg5[%c0_135, %c0_136, %c128_137] : memref<1x8x256xf32, #tpu.memory_space<vmem>>, vector<1x8x16xf32>
    %134 = vector.shape_cast %133 : vector<1x8x16xf32> to vector<8x16xf32>
    %135 = vector.shape_cast %132 : vector<8x16xf32> to vector<1x8x16xf32>
    tpu.vector_store %arg5[%c0_135, %c0_136, %c128_137], %135 {strides = array<i32>} : memref<1x8x256xf32, #tpu.memory_space<vmem>>, vector<1x8x16xf32>,
    %136 = vector.extract_strided_slice %99 {offsets = [0, 234], sizes = [8, 16], strides = [1, 1]} : vector<8x416xf32> to vector<8x16xf32>
    %c0_138 = arith.constant 0 : index
    %c0_139 = arith.constant 0 : index
    %c144_140 = arith.constant 144 : index
    %137 = vector.load %arg5[%c0_138, %c0_139, %c144_140] : memref<1x8x256xf32, #tpu.memory_space<vmem>>, vector<1x8x16xf32>
    %138 = vector.shape_cast %137 : vector<1x8x16xf32> to vector<8x16xf32>
    %139 = vector.shape_cast %136 : vector<8x16xf32> to vector<1x8x16xf32>
    tpu.vector_store %arg5[%c0_138, %c0_139, %c144_140], %139 {strides = array<i32>} : memref<1x8x256xf32, #tpu.memory_space<vmem>>, vector<1x8x16xf32>,
    %140 = vector.extract_strided_slice %99 {offsets = [0, 260], sizes = [8, 16], strides = [1, 1]} : vector<8x416xf32> to vector<8x16xf32>
    %c0_141 = arith.constant 0 : index
    %c0_142 = arith.constant 0 : index
    %c160_143 = arith.constant 160 : index
    %141 = vector.load %arg5[%c0_141, %c0_142, %c160_143] : memref<1x8x256xf32, #tpu.memory_space<vmem>>, vector<1x8x16xf32>
    %142 = vector.shape_cast %141 : vector<1x8x16xf32> to vector<8x16xf32>
    %143 = vector.shape_cast %140 : vector<8x16xf32> to vector<1x8x16xf32>
    tpu.vector_store %arg5[%c0_141, %c0_142, %c160_143], %143 {strides = array<i32>} : memref<1x8x256xf32, #tpu.memory_space<vmem>>, vector<1x8x16xf32>,
    %144 = vector.extract_strided_slice %99 {offsets = [0, 286], sizes = [8, 16], strides = [1, 1]} : vector<8x416xf32> to vector<8x16xf32>
    %c0_144 = arith.constant 0 : index
    %c0_145 = arith.constant 0 : index
    %c176_146 = arith.constant 176 : index
    %145 = vector.load %arg5[%c0_144, %c0_145, %c176_146] : memref<1x8x256xf32, #tpu.memory_space<vmem>>, vector<1x8x16xf32>
    %146 = vector.shape_cast %145 : vector<1x8x16xf32> to vector<8x16xf32>
    %147 = vector.shape_cast %144 : vector<8x16xf32> to vector<1x8x16xf32>
    tpu.vector_store %arg5[%c0_144, %c0_145, %c176_146], %147 {strides = array<i32>} : memref<1x8x256xf32, #tpu.memory_space<vmem>>, vector<1x8x16xf32>,
    %148 = vector.extract_strided_slice %99 {offsets = [0, 312], sizes = [8, 16], strides = [1, 1]} : vector<8x416xf32> to vector<8x16xf32>
    %c0_147 = arith.constant 0 : index
    %c0_148 = arith.constant 0 : index
    %c192_149 = arith.constant 192 : index
    %149 = vector.load %arg5[%c0_147, %c0_148, %c192_149] : memref<1x8x256xf32, #tpu.memory_space<vmem>>, vector<1x8x16xf32>
    %150 = vector.shape_cast %149 : vector<1x8x16xf32> to vector<8x16xf32>
    %151 = vector.shape_cast %148 : vector<8x16xf32> to vector<1x8x16xf32>
    tpu.vector_store %arg5[%c0_147, %c0_148, %c192_149], %151 {strides = array<i32>} : memref<1x8x256xf32, #tpu.memory_space<vmem>>, vector<1x8x16xf32>,
    %152 = vector.extract_strided_slice %99 {offsets = [0, 338], sizes = [8, 16], strides = [1, 1]} : vector<8x416xf32> to vector<8x16xf32>
    %c0_150 = arith.constant 0 : index
    %c0_151 = arith.constant 0 : index
    %c208_152 = arith.constant 208 : index
    %153 = vector.load %arg5[%c0_150, %c0_151, %c208_152] : memref<1x8x256xf32, #tpu.memory_space<vmem>>, vector<1x8x16xf32>
    %154 = vector.shape_cast %153 : vector<1x8x16xf32> to vector<8x16xf32>
    %155 = vector.shape_cast %152 : vector<8x16xf32> to vector<1x8x16xf32>
    tpu.vector_store %arg5[%c0_150, %c0_151, %c208_152], %155 {strides = array<i32>} : memref<1x8x256xf32, #tpu.memory_space<vmem>>, vector<1x8x16xf32>,
    %156 = vector.extract_strided_slice %99 {offsets = [0, 364], sizes = [8, 16], strides = [1, 1]} : vector<8x416xf32> to vector<8x16xf32>
    %c0_153 = arith.constant 0 : index
    %c0_154 = arith.constant 0 : index
    %c224_155 = arith.constant 224 : index
    %157 = vector.load %arg5[%c0_153, %c0_154, %c224_155] : memref<1x8x256xf32, #tpu.memory_space<vmem>>, vector<1x8x16xf32>
    %158 = vector.shape_cast %157 : vector<1x8x16xf32> to vector<8x16xf32>
    %159 = vector.shape_cast %156 : vector<8x16xf32> to vector<1x8x16xf32>
    tpu.vector_store %arg5[%c0_153, %c0_154, %c224_155], %159 {strides = array<i32>} : memref<1x8x256xf32, #tpu.memory_space<vmem>>, vector<1x8x16xf32>,
    %160 = vector.extract_strided_slice %99 {offsets = [0, 390], sizes = [8, 16], strides = [1, 1]} : vector<8x416xf32> to vector<8x16xf32>
    %c0_156 = arith.constant 0 : index
    %c0_157 = arith.constant 0 : index
    %c240_158 = arith.constant 240 : index
    %161 = vector.load %arg5[%c0_156, %c0_157, %c240_158] : memref<1x8x256xf32, #tpu.memory_space<vmem>>, vector<1x8x16xf32>
    %162 = vector.shape_cast %161 : vector<1x8x16xf32> to vector<8x16xf32>
    %163 = vector.shape_cast %160 : vector<8x16xf32> to vector<1x8x16xf32>
    tpu.vector_store %arg5[%c0_156, %c0_157, %c240_158], %163 {strides = array<i32>} : memref<1x8x256xf32, #tpu.memory_space<vmem>>, vector<1x8x16xf32>,
    return
  }
  func.func @transform_0(%arg0: i32, %arg1: i32) -> (i32, i32, i32) {
    %c0_i32 = arith.constant 0 : i32
    %c0_i32_0 = arith.constant 0 : i32
    %c0_i32_1 = arith.constant 0 : i32
    return %arg1, %c0_i32, %c0_i32_0 : i32, i32, i32
  }
  func.func @transform_1(%arg0: i32, %arg1: i32) -> (i32, i32) {
    %c0_i32 = arith.constant 0 : i32
    %c0_i32_0 = arith.constant 0 : i32
    return %arg0, %c0_i32 : i32, i32
  }
  func.func @transform_2(%arg0: i32, %arg1: i32) -> (i32, i32) {
    %c0_i32 = arith.constant 0 : i32
    %c0_i32_0 = arith.constant 0 : i32
    return %arg0, %c0_i32 : i32, i32
  }
  func.func @transform_3(%arg0: i32, %arg1: i32) -> (i32, i32, i32) {
    %c0_i32 = arith.constant 0 : i32
    %c0_i32_0 = arith.constant 0 : i32
    return %arg1, %arg0, %c0_i32 : i32, i32, i32
  }
}

</mosaic_0001>

<bundles_post_ra>
// kernel: tpu_custom_call.1
= control target key start
LH: loop header
LB: loop body
LE: loop exit
PB: predicated region body
PF: predicated region fallthrough
CT: control target
= control target key end

     0   :  { %8 = vsyncpa [#allocation6], 0  ;;  %s5381_s0 = inlined_call_operand.hbm [shape: f32[2,4,256], index: 0, kind: input, shape index: {}]   ;;  %s5382_s1 = inlined_call_operand.hbm [shape: f32[8,484], index: 1, kind: input, shape index: {}]   ;;  %s5383_s2 = inlined_call_operand.vmem [shape: f32[8,1], index: 2, kind: input, shape index: {}]   ;;  %s5384_s3 = inlined_call_operand.hbm [shape: f32[2,8,256], index: 3, kind: output, shape index: {}]  }
   0x1   :  { %10 = vsyncpa [#allocation6 + $0x1], 0 }
   0x2   :  { %11 = vsyncpa [#allocation9], 0 }
   0x3   :  { %12 = vsyncpa [#allocation7], 0 }
   0x4   :  { %14 = vsyncpa [#allocation7 + $0x1], 0  ;;  %s3791_s12 = smov 0   ;;  %s3793_s13 = smov 0  }
   0x5   :  { %s3795_s14 = smov 0   ;;  %s3797_s15 = smov 0  }
   0x6   :  { %s3799_s16 = smov 0   ;;  %s3801_s17 = smov 0  }
   0x7 LB: > { %s3411_s18 = sadd.s32 4294967295, %s3721_s17   ;;  %s3412_s19 = sadd.s32 4294967294, %s3721_s17   ;;  %s3721_s17 = sphi %s3801_s17, %s20_s17   ;;  %s3717_s16 = sphi %s3799_s16, %s5396_s16   ;;  %s3713_s15 = sphi %s3797_s15, %s5395_s15   ;;  %s3709_s14 = sphi %s3795_s14, %s5394_s14   ;;  %s3705_s13 = sphi %s3793_s13, %s5393_s13   ;;  %s3701_s12 = sphi %s3791_s12, %s5392_s12  }
   0x8   : > { %p52_p0 = scmp.ne.s32.totalorder %s3705_s13, %s3701_s12  ;;  %p3825_p1 = scmp.eq.s32.totalorder %s3411_s18, 0 }
   0x9   : > { %p3829_p2 = scmp.eq.s32.totalorder %s3411_s18, 1  ;;  %p136_p3 = scmp.eq.s32.totalorder %s3412_s19, 1 }
   0xa   : > { %p3835_p4 = por %p3825_p1, %p52_p0  ;;  %p3413_p5 = scmp.ge.s32.totalorder %s3721_s17, 1 }
   0xb   : > { %p3840_p6 = por %p136_p3, %p52_p0  ;;  %p143_p7 = scmp.lt.s32.totalorder %s3721_s17, 3 }
   0xc   : > { %s158_s26 = sshll.u32 %s5382_s1, 4  ;;  %p3416_p9 = scmp.ge.s32.totalorder %s3721_s17, 2  ;;  %s159_s26 = int_to_ptr.hbm [resolvable:$true] %s158_s26 }
   0xd   : > { %p3848_p8 = pnand %p3413_p5, %p143_p7  ;;  %s3723_s28 = smov [#allocation8]  }
   0xe   : > { %s160_s29 = sshll.u32 %s3723_s28, 4  ;;  %s29_s30 = sadd.s32 1, %s3717_s16  ;;  %s161_s29 = int_to_ptr.vmem [resolvable:$true] %s160_s29 }
   0xf   : > { %p3447_p10 = pneg %p3848_p8  ;;  %p30_p12 = scmp.ge.s32.totalorder %s29_s30, 2 }
  0x10   : > { %s39_s4 = sadd.s32 1, %s3709_s14  ;;  %p46_p13 = scmp.ne.s32.totalorder %s3709_s14, %s3705_s13 }
  0x11   : > { %p3448_p11 = pnand %p3447_p10, %p3825_p1  ;;  %p47_p0 = scmp.eq.s32.totalorder %s3721_s17, 0 }
  0x12   : > { %s5398_s30 = smov (%p30_p12, %s29_s30), 0  ;;  %p3870_p5 = por %p3829_p2, %p46_p13 }
  0x13   : > { %3450 = dma.hbm_to_vmem [thread:$0]  (!%p3448_p11), %s159_s26, 512, %s161_s29, [#allocation9]  }
  0x14   : > { %p3864_p3 = por %p47_p0, %p46_p13  ;;  %s36_s7 = ssub.s32 %s3717_s16, %s5398_s30 }
  0x15   : > { %p3460_p7 = scmp.lt.s32.totalorder %s3721_s17, 2  ;;  %p37_p10 = scmp.eq.s32.totalorder %s36_s7, 0 }
  0x16   : > { %s178_s8 = sand.u32 1, %s3709_s14   ;;  %s3437_s11 = sshll.u32 %s3717_s16, 3 }
  0x17   : > { %s3417_s9 = sshll.u32 %s178_s8, 3  ;;  %s187_s24 = scalar_lea.hbm %s5381_s0, %s3437_s11 }
  0x18   : > { %s3879_s10 = scalar_select %p37_p10, %s3709_s14, %s39_s4  }
  0x19   : > { %s182_s25 = scalar_lea.vmem [#allocation5], %s3417_s9  ;;  %s189_s21 = sshll.u32 %s187_s24, 4  ;;  %s190_s21 = int_to_ptr.hbm [resolvable:$true] %s189_s21 }
  0x1a   : > { %s191_s26 = sshll.u32 %s182_s25, 4  ;;  %p3452_p2 = pnand %p3460_p7, %p3864_p3  ;;  %s192_s26 = int_to_ptr.vmem [resolvable:$true] %s191_s26 }
  0x1b   : > { %s179_s28 = scalar_lea.sflag [#allocation6], %s178_s8  ;;  %200 = sbr.rel (%p3848_p8) target bundleno = 1369 (0x559), region = 32 }
  0x1c   : > { %3454 = dma.hbm_to_vmem [thread:$0]  (!%p3452_p2), %s190_s21, 128, %s192_s26, %s179_s28  }
  0x1d   : > { %s3890_s29 = sand.u32 (!%p3848_p8), 1, %s3705_s13  }
  0x1e   : > { %s3421_s4 = sshll.u32 (!%p3848_p8), %s3890_s29, 3  ;;  %s203_s7 = scalar_lea.sflag (!%p3848_p8), [#allocation6], %s3890_s29 }
  0x1f   : > { %s3894_s9 = scalar_lea.vmem (!%p3848_p8), [#allocation5], %s3421_s4 }
  0x20   : > { %3688 = dma.done.wait (%p3835_p4), %s203_s7, 128  }
  0x21   : > { %3690 = vsyncadd (%p3835_p4), %s203_s7, 4294967168 }
  0x22   : > { %3692 = dma.done.wait (%p3825_p1), [#allocation9], 512  }
  0x23   : > { %3694 = vsyncadd (%p3825_p1), [#allocation9], 4294966784  ;;  %v249_v0 = vld [vmem:[%s3894_s9] sm:$0xf]  ;;  %s3724_s27 = smov 7   ;;  %s3725_s22 = smov 27  }
  0x24   : > { %v263_v1 = vld [vmem:[%s3894_s9] sm:$0xf]  ;;  %251 = vrot.lane.b32.xlu0 %v249_v0, %s3724_s27  ;;  %s3726_s5 = smov 47   ;;  %s3727_s20 = smov 17   ;;  %v305_v8 = vld [vmem:[%s3894_s9 + $0x4] sm:$0xf] }
  0x25   : > { %265 = vrot.lane.b32.xlu1 %v263_v1, %s3725_s22  ;;  %v277_v2 = vld [vmem:[%s3894_s9] sm:$0xf]  ;;  %s3728_s8 = smov 37   ;;  %s3729_s11 = smov 57   ;;  %v312_v9 = vld [vmem:[%s3894_s9 + $0x4] sm:$0xf] }
  0x26   : > { %279 = vrot.lane.b32.xlu2 %v277_v2, %s3726_s5  ;;  %v256_v3 = vld [vmem:[%s3894_s9] sm:$0xf]  ;;  %s3730_s18 = smov 67   ;;  %s3731_s19 = smov 77   ;;  %v324_v10 = vld [vmem:[%s3894_s9 + $0x4] sm:$0xf] }
  0x27   : > { %v270_v4 = vld [vmem:[%s3894_s9] sm:$0xf]  ;;  %s3732_s24 = smov 87   ;;  %v331_v11 = vld [vmem:[%s3894_s9 + $0x4] sm:$0xf]  ;;  %s3733_s25 = smov 97  }
  0x28   : > { %v284_v5 = vld [vmem:[%s3894_s9] sm:$0xf]  ;;  %s3734_s26 = smov 107   ;;  %s3735_s21 = smov 117   ;;  %v338_v12 = vld [vmem:[%s3894_s9 + $0x4] sm:$0xf] }
  0x29   : > { %v291_v6 = vld [vmem:[%s3894_s9] sm:$0xf]  ;;  %v345_v13 = vld [vmem:[%s3894_s9 + $0x4] sm:$0xf]  ;;  %s3736_s28 = smov 127   ;;  %s3737_s4 = smov 9  }
  0x2a   : > { %v298_v7 = vld [vmem:[%s3894_s9] sm:$0xf]  ;;  %v352_v14 = vld [vmem:[%s3894_s9 + $0x4] sm:$0xf]  ;;  %s3738_s7 = smov 19   ;;  %s3739_s27 = smov 29  }
  0x2b   : > { %v364_v15 = vld [vmem:[%s3894_s9 + $0x4] sm:$0xf]  ;;  %v3740_v16 = vmov 0.0   ;;  %vm289_vm0 = vcmask 199752   ;;  %vm254_vm1 = vcmask 183352   ;;  %vm245_vm2 = vcmask 1043456  }
  0x2c   : > { %258 = vrot.lane.b32.xlu0 %v256_v3, %s3727_s20  ;;  %243 = vst [vmem:[#allocation2] sm:$0xff] %v3740_v16  ;;  %vm246_vm3 = vcmask 506884   ;;  %vm261_vm5 = vcmask 396552   ;;  %vm268_vm6 = vcmask 609752   ;;  %vm275_vm7 = vcmask 822952   ;;  %s3741_s9 = smov 102  }
  0x2d   : > { %272 = vrot.lane.b32.xlu1 %v270_v4, %s3728_s8  ;;  %244 = vst [vmem:[#allocation2 + $0x8] sm:$0xff] %v3740_v16  ;;  %vm247_vm4 = vmor %vm246_vm3, %vm245_vm2  ;;  %vm282_vm8 = vcmask 1036152   ;;  %vm296_vm9 = vcmask 412952   ;;  %vm303_vm10 = vcmask 626152   ;;  %vm310_vm11 = vcmask 839352   ;;  %s3742_s22 = smov 24  }
  0x2e   : > { %286 = vrot.lane.b32.xlu2 %v284_v5, %s3729_s11  ;;  %248 = vst.msk [vmem:[#allocation2 + $0x10] sm:$0xff] %vm247_vm4, %v3740_v16  ;;  %vm317_vm12 = vcmask 793600   ;;  %vm320_vm13 = vcmask 1044360   ;;  %vm321_vm14 = vcmask 7172   ;;  %vm360_vm3 = vcmask 1044376   ;;  %s3743_s5 = smov 76  }
  0x2f   : > { %vm322_vm15 = vmor %vm321_vm14, %vm320_vm13  ;;  %vm361_vm4 = vcmask 23556   ;;  %s3744_s20 = smov 22   ;;  %s3745_s8 = smov 50   ;;  %vm443_vm13 = vcmask 621568   ;;  %vm750_vm14 = vcmask 261120  }
  0x30   : > { %s3746_s11 = smov 126  }
  0x34   : > { %293 = vrot.lane.b32.xlu0 %v291_v6, %s3730_s18  ;;  %s3747_s18 = smov 100  }
  0x35   : > { %300 = vrot.lane.b32.xlu1 %v298_v7, %s3731_s19  ;;  %v654_v48 = vld [vmem:[#allocation2 + $0x14] sm:$0xf]  ;;  %s3748_s19 = smov 74  }
  0x36   : > { %307 = vrot.lane.b32.xlu2 %v305_v8, %s3732_s24  ;;  %s3749_s24 = smov 48  }
  0x3c   : > { %314 = vrot.lane.b32.xlu0 %v312_v9, %s3733_s25  ;;  %s3750_s25 = smov 124  }
  0x3d   : > { %326 = vrot.lane.b32.xlu1 %v324_v10, %s3734_s26  ;;  %s3751_s26 = smov 125  }
  0x3e   : > { %333 = vrot.lane.b32.xlu2 %v331_v11, %s3735_s21  ;;  %s3752_s21 = smov 123  }
  0x44   : > { %340 = vrot.lane.b32.xlu0 %v338_v12, %s3736_s28 }
  0x45   : > { %347 = vrot.lane.b32.xlu1 %v345_v13, %s3737_s4  ;;  %s3754_s4 = smov 121  }
  0x46   : > { %354 = vrot.lane.b32.xlu2 %v352_v14, %s3738_s7  ;;  %s3755_s7 = smov 120  }
  0x4c   : > { %366 = vrot.lane.b32.xlu0 %v364_v15, %s3739_s27  ;;  %s3756_s27 = smov 118  }
  0x80   : > { %v280_v17 = vpop.permute.xlu2 %279 }
  0x88   : > { %v287_v18 = vpop.permute.xlu2 %286 }
  0x89   : > { %290 = vst.msk [vmem:[#allocation2 + $0x8] sm:$0xf] %vm289_vm0, %v287_v18  ;;  %vm329_vm0 = vcmask 216152  }
  0x90   : > { %v308_v21 = vpop.permute.xlu2 %307 }
  0x96   : > { %v252_v19 = vpop.permute.xlu0 %251 }
  0x97   : > { %v266_v20 = vpop.permute.xlu1 %265  ;;  %255 = vst.msk [vmem:[#allocation2 + $0x4] sm:$0xf] %vm254_vm1, %v252_v19  ;;  %vm336_vm1 = vcmask 429352  }
  0x98   : > { %v334_v26 = vpop.permute.xlu2 %333 }
  0x9e   : > { %v259_v22 = vpop.permute.xlu0 %258 }
  0x9f   : > { %v273_v23 = vpop.permute.xlu1 %272  ;;  %262 = vst.msk [vmem:[#allocation2 + $0x4] sm:$0xf] %vm261_vm5, %v259_v22  ;;  %vm343_vm5 = vcmask 642552  }
  0xa0   : > { %269 = vst.msk [vmem:[#allocation2 + $0x4] sm:$0xf] %vm268_vm6, %v266_v20  ;;  %v355_v34 = vpop.permute.xlu2 %354  ;;  %vm357_vm6 = vcmask 154624  }
  0xa1   : > { %276 = vst.msk [vmem:[#allocation2 + $0x4] sm:$0xf] %vm275_vm7, %v273_v23  ;;  %v356_v35 = vrot.slane %v355_v34, 4  ;;  %vm350_vm7 = vcmask 855752  }
  0xa2   : > { %283 = vst.msk [vmem:[#allocation2 + $0x4] sm:$0xf] %vm282_vm8, %v280_v17  ;;  %vm362_vm8 = vmor %vm361_vm4, %vm360_vm3  ;;  %vm577_vm3 = vcmask 818176   ;;  %vm609_vm4 = vcmask 605184  }
  0xa3   : > { %v358_v38 = vsel %vm357_vm6, %v356_v35, %v355_v34  ;;  %vm679_vm6 = vcmask 179200  }
  0xa6   : > { %v294_v24 = vpop.permute.xlu0 %293 }
  0xa7   : > { %v301_v25 = vpop.permute.xlu1 %300  ;;  %297 = vst.msk [vmem:[#allocation2 + $0x8] sm:$0xf] %vm296_vm9, %v294_v24  ;;  %vm369_vm9 = vcmask 232552  }
  0xa8   : > { %304 = vst.msk [vmem:[#allocation2 + $0x8] sm:$0xf] %vm303_vm10, %v301_v25  ;;  %vm389_vm10 = vcmask 338944  }
  0xa9   : > { %v371_v27 = vld [vmem:[#allocation2] sm:$0xff]  ;;  %311 = vst.msk [vmem:[#allocation2 + $0x8] sm:$0xf] %vm310_vm11, %v308_v21  ;;  %vm411_vm11 = vcmask 834560  }
  0xaa   : > { %375 = vst [vmem:[#allocation1] ss:$2 sm:$0xff] %v371_v27 }
  0xae   : > { %v315_v28 = vpop.permute.xlu0 %314 }
  0xaf   : > { %v327_v29 = vpop.permute.xlu1 %326  ;;  %v316_v30 = vrot.slane %v315_v28, 4 }
  0xb1   : > { %v378_v31 = vld.sshfl [vmem:[#allocation1] sm:$0xff pattern:$0x75316420]  ;;  %v379_v32 = vld.sshfl [vmem:[#allocation1 + $0x8] sm:$0xff pattern:$0x75316420]  ;;  %v318_v33 = vsel %vm317_vm12, %v316_v30, %v315_v28 }
  0xb2   : > { %396 = vst [vmem:[#allocation1 + $0x1] ss:$2 sm:$0xff] %v371_v27  ;;  %vm422_vm12 = vcmask 343044  }
  0xb3   : > { %386 = vst [vmem:[#allocation3] sm:$0xf] %v378_v31 }
  0xb4   : > { %387 = vst [vmem:[#allocation3 + $0x8] sm:$0xf] %v379_v32 }
  0xb5   : > { %323 = vst.msk [vmem:[#allocation2 + $0x8] sm:$0xff] %vm322_vm15, %v318_v33  ;;  %vm475_vm15 = vcmask 408576  }
  0xb6   : > { %330 = vst.msk [vmem:[#allocation2 + $0xc] sm:$0xf] %vm329_vm0, %v327_v29  ;;  %v341_v36 = vpop.permute.xlu0 %340  ;;  %vm513_vm0 = vcmask 195584  }
  0xb7   : > { %v348_v37 = vpop.permute.xlu1 %347  ;;  %337 = vst.msk [vmem:[#allocation2 + $0xc] sm:$0xf] %vm336_vm1, %v334_v26  ;;  %vm546_vm1 = vcmask 1031168  }
  0xb8   : > { %344 = vst.msk [vmem:[#allocation2 + $0xc] sm:$0xf] %vm343_vm5, %v341_v36  ;;  %vm640_vm5 = vcmask 392192  }
  0xb9   : > { %351 = vst.msk [vmem:[#allocation2 + $0xc] sm:$0xf] %vm350_vm7, %v348_v37  ;;  %v399_v39 = vld.sshfl [vmem:[#allocation1] sm:$0xff pattern:$0x75316420]  ;;  %vm711_vm7 = vcmask 1014784  }
  0xba   : > { %363 = vst.msk [vmem:[#allocation2 + $0xc] sm:$0xff] %vm362_vm8, %v358_v38  ;;  %403 = vrot.lane.b32.xlu1 %v399_v39, %s3741_s9  ;;  %v400_v40 = vld.sshfl [vmem:[#allocation1 + $0x8] sm:$0xff pattern:$0x75316420]  ;;  %vm771_vm8 = vcmask 257024  }
  0xbb   : > { %428 = vst [vmem:[#allocation1] ss:$2 sm:$0xff] %v371_v27 }
  0xbc   : > { %v526_v54 = vld [vmem:[#allocation2 + $0x4] sm:$0xff] }
  0xbe   : > { %v367_v41 = vpop.permute.xlu0 %366 }
  0xbf   : > { %370 = vst.msk [vmem:[#allocation2 + $0x10] sm:$0xf] %vm369_vm9, %v367_v41  ;;  %vm913_vm9 = vcmask 1039360  }
  0xc1   : > { %v3923_v42 = vld [vmem:[#allocation2 + $0x8] sm:$0xff] }
  0xc2   : > { %377 = vst [vmem:[#allocation1 + $0x10] ss:$2 sm:$0xff] %v3923_v42  ;;  %v432_v43 = vld.sshfl [vmem:[#allocation1 + $0x8] sm:$0xff pattern:$0x75316420] }
  0xc3   : > { %v431_v44 = vld.sshfl [vmem:[#allocation1] sm:$0xff pattern:$0x75316420] }
  0xc4   : > { %460 = vst [vmem:[#allocation1 + $0x1] ss:$2 sm:$0xff] %v371_v27 }
  0xc6   : > { %v489_v45 = vld [vmem:[#allocation2 + $0x10] sm:$0xf] }
  0xc7   : > { %497 = vst [vmem:[#allocation1 + $0x20] ss:$2 sm:$0xff] %v489_v45  ;;  %v527_v2 = vld [vmem:[#allocation2 + $0xc] sm:$0xff] }
  0xc8   : > { %v693_v19 = vld [vmem:[#allocation2 + $0x10] sm:$0xff] }
  0xc9   : > { %v380_v46 = vld.sshfl [vmem:[#allocation1 + $0x10] sm:$0xff pattern:$0x75316420]  ;;  %v381_v47 = vld.sshfl [vmem:[#allocation1 + $0x18] sm:$0xff pattern:$0x75316420] }
  0xca   : > { %398 = vst [vmem:[#allocation1 + $0x11] ss:$2 sm:$0xff] %v3923_v42 }
  0xcb   : > { %388 = vst [vmem:[#allocation3 + $0x10] sm:$0xf] %v380_v46  ;;  %v464_v49 = vld.sshfl [vmem:[#allocation1 + $0x8] sm:$0xff pattern:$0x75316420] }
  0xcc   : > { %v463_v50 = vld.sshfl [vmem:[#allocation1] sm:$0xff pattern:$0x75316420]  ;;  %390 = vst.msk [vmem:[#allocation3 + $0x18] sm:$0xf] %vm389_vm10, %v381_v47 }
  0xcd   : > { %493 = vst [vmem:[#allocation1] ss:$2 sm:$0xff] %v371_v27 }
  0xce   : > { %v502_v51 = vld.sshfl [vmem:[#allocation1 + $0x20] sm:$0xff pattern:$0x75316420] }
  0xcf   : > { %511 = vrot.lane.b32.xlu2 %v502_v51, %s3742_s22  ;;  %663 = vst [vmem:[#allocation1 + $0x21] ss:$2 sm:$0xff] %v654_v48 }
  0xd1   : > { %v401_v52 = vld.sshfl [vmem:[#allocation1 + $0x10] sm:$0xff pattern:$0x75316420]  ;;  %v402_v53 = vld.sshfl [vmem:[#allocation1 + $0x18] sm:$0xff pattern:$0x75316420] }
  0xd2   : > { %407 = vrot.lane.b32.xlu0 %v401_v52, %s3741_s9  ;;  %430 = vst [vmem:[#allocation1 + $0x10] ss:$2 sm:$0xff] %v3923_v42  ;;  %409 = vrot.lane.b32.xlu1 %v402_v53, %s3741_s9 }
  0xd4   : > { %v498_v55 = vld.sshfl [vmem:[#allocation1] sm:$0xff pattern:$0x75316420]  ;;  %v499_v56 = vld.sshfl [vmem:[#allocation1 + $0x8] sm:$0xff pattern:$0x75316420] }
  0xd5   : > { %531 = vst [vmem:[#allocation1 + $0x1] ss:$2 sm:$0xff] %v526_v54 }
  0xd6   : > { %v668_v61 = vld.sshfl [vmem:[#allocation1 + $0x20] sm:$0xff pattern:$0x75316420] }
  0xd7   : > { %405 = vrot.lane.b32.xlu2 %v400_v40, %s3741_s9  ;;  %s3757_s9 = smov 119  }
  0xd9   : > { %v433_v57 = vld.sshfl [vmem:[#allocation1 + $0x10] sm:$0xff pattern:$0x75316420]  ;;  %v434_v58 = vld.sshfl [vmem:[#allocation1 + $0x18] sm:$0xff pattern:$0x75316420] }
  0xda   : > { %462 = vst [vmem:[#allocation1 + $0x11] ss:$2 sm:$0xff] %v3923_v42  ;;  %439 = vrot.lane.b32.xlu1 %v433_v57, %s3743_s5  ;;  %437 = vrot.lane.b32.xlu0 %v432_v43, %s3743_s5 }
  0xdc   : > { %v535_v59 = vld.sshfl [vmem:[#allocation1 + $0x8] sm:$0xff pattern:$0x75316420]  ;;  %v534_v60 = vld.sshfl [vmem:[#allocation1] sm:$0xff pattern:$0x75316420] }
  0xdd   : > { %562 = vst [vmem:[#allocation1] ss:$2 sm:$0xff] %v526_v54 }
  0xdf   : > { %677 = vrot.lane.b32.xlu2 %v668_v61, %s3744_s20 }
  0xe1   : > { %v465_v62 = vld.sshfl [vmem:[#allocation1 + $0x10] sm:$0xff pattern:$0x75316420]  ;;  %v466_v63 = vld.sshfl [vmem:[#allocation1 + $0x18] sm:$0xff pattern:$0x75316420] }
  0xe2   : > { %469 = vrot.lane.b32.xlu1 %v464_v49, %s3745_s8  ;;  %467 = vrot.lane.b32.xlu0 %v463_v50, %s3745_s8  ;;  %495 = vst [vmem:[#allocation1 + $0x10] ss:$2 sm:$0xff] %v3923_v42 }
  0xe4   : > { %v565_v0 = vld.sshfl [vmem:[#allocation1] sm:$0xff pattern:$0x75316420]  ;;  %v566_v1 = vld.sshfl [vmem:[#allocation1 + $0x8] sm:$0xff pattern:$0x75316420] }
  0xe5   : > { %594 = vst [vmem:[#allocation1 + $0x1] ss:$2 sm:$0xff] %v526_v54 }
  0xe7   : > { %435 = vrot.lane.b32.xlu2 %v431_v44, %s3743_s5 }
  0xe9   : > { %v500_v3 = vld.sshfl [vmem:[#allocation1 + $0x10] sm:$0xff pattern:$0x75316420]  ;;  %v501_v4 = vld.sshfl [vmem:[#allocation1 + $0x18] sm:$0xff pattern:$0x75316420] }
  0xea   : > { %473 = vrot.lane.b32.xlu0 %v466_v63, %s3745_s8  ;;  %503 = vrot.lane.b32.xlu1 %v498_v55, %s3742_s22  ;;  %533 = vst [vmem:[#allocation1 + $0x11] ss:$2 sm:$0xff] %v527_v2 }
  0xec   : > { %v598_v5 = vld.sshfl [vmem:[#allocation1 + $0x8] sm:$0xff pattern:$0x75316420]  ;;  %v597_v6 = vld.sshfl [vmem:[#allocation1] sm:$0xff pattern:$0x75316420] }
  0xed   : > { %625 = vst [vmem:[#allocation1] ss:$2 sm:$0xff] %v526_v54 }
  0xef   : > { %441 = vrot.lane.b32.xlu2 %v434_v58, %s3743_s5 }
  0xf1   : > { %v537_v7 = vld.sshfl [vmem:[#allocation1 + $0x18] sm:$0xff pattern:$0x75316420]  ;;  %v536_v8 = vld.sshfl [vmem:[#allocation1 + $0x10] sm:$0xff pattern:$0x75316420] }
  0xf2   : > { %507 = vrot.lane.b32.xlu0 %v500_v3, %s3742_s22  ;;  %509 = vrot.lane.b32.xlu1 %v501_v4, %s3742_s22  ;;  %564 = vst [vmem:[#allocation1 + $0x10] ss:$2 sm:$0xff] %v527_v2 }
  0xf4   : > { %v629_v9 = vld.sshfl [vmem:[#allocation1 + $0x8] sm:$0xff pattern:$0x75316420]  ;;  %v628_v10 = vld.sshfl [vmem:[#allocation1] sm:$0xff pattern:$0x75316420] }
  0xf5   : > { %659 = vst [vmem:[#allocation1 + $0x1] ss:$2 sm:$0xff] %v526_v54 }
  0xf7   : > { %471 = vrot.lane.b32.xlu2 %v465_v62, %s3745_s8 }
  0xf9   : > { %v567_v11 = vld.sshfl [vmem:[#allocation1 + $0x10] sm:$0xff pattern:$0x75316420]  ;;  %v568_v12 = vld.sshfl [vmem:[#allocation1 + $0x18] sm:$0xff pattern:$0x75316420] }
  0xfa   : > { %540 = vrot.lane.b32.xlu1 %v535_v59, %s3746_s11  ;;  %538 = vrot.lane.b32.xlu0 %v534_v60, %s3746_s11  ;;  %596 = vst [vmem:[#allocation1 + $0x11] ss:$2 sm:$0xff] %v527_v2 }
  0xfc   : > { %v664_v13 = vld.sshfl [vmem:[#allocation1] sm:$0xff pattern:$0x75316420]  ;;  %v665_v14 = vld.sshfl [vmem:[#allocation1 + $0x8] sm:$0xff pattern:$0x75316420] }
  0xfd   : > { %696 = vst [vmem:[#allocation1] ss:$2 sm:$0xff] %v3923_v42 }
  0xff   : > { %505 = vrot.lane.b32.xlu2 %v499_v56, %s3742_s22  ;;  %s3770_s22 = smov 106  }
 0x101   : > { %v599_v15 = vld.sshfl [vmem:[#allocation1 + $0x10] sm:$0xff pattern:$0x75316420]  ;;  %v600_v16 = vld.sshfl [vmem:[#allocation1 + $0x18] sm:$0xff pattern:$0x75316420] }
 0x102   : > { %544 = vrot.lane.b32.xlu0 %v537_v7, %s3746_s11  ;;  %569 = vrot.lane.b32.xlu1 %v565_v0, %s3747_s18  ;;  %627 = vst [vmem:[#allocation1 + $0x10] ss:$2 sm:$0xff] %v527_v2 }
 0x104   : > { %v700_v25 = vld.sshfl [vmem:[#allocation1 + $0x8] sm:$0xff pattern:$0x75316420]  ;;  %v699_v26 = vld.sshfl [vmem:[#allocation1] sm:$0xff pattern:$0x75316420] }
 0x107   : > { %542 = vrot.lane.b32.xlu2 %v536_v8, %s3746_s11 }
 0x109   : > { %v631_v17 = vld.sshfl [vmem:[#allocation1 + $0x18] sm:$0xff pattern:$0x75316420]  ;;  %v630_v18 = vld.sshfl [vmem:[#allocation1 + $0x10] sm:$0xff pattern:$0x75316420] }
 0x10a   : > { %573 = vrot.lane.b32.xlu0 %v567_v11, %s3747_s18  ;;  %575 = vrot.lane.b32.xlu1 %v568_v12, %s3747_s18  ;;  %661 = vst [vmem:[#allocation1 + $0x11] ss:$2 sm:$0xff] %v527_v2 }
 0x10f   : > { %571 = vrot.lane.b32.xlu2 %v566_v1, %s3747_s18  ;;  %s3759_s18 = smov 38  }
 0x111   : > { %v666_v20 = vld.sshfl [vmem:[#allocation1 + $0x10] sm:$0xff pattern:$0x75316420]  ;;  %v667_v21 = vld.sshfl [vmem:[#allocation1 + $0x18] sm:$0xff pattern:$0x75316420] }
 0x112   : > { %605 = vrot.lane.b32.xlu1 %v599_v15, %s3748_s19  ;;  %603 = vrot.lane.b32.xlu0 %v598_v5, %s3748_s19  ;;  %698 = vst [vmem:[#allocation1 + $0x10] ss:$2 sm:$0xff] %v693_v19 }
 0x117   : > { %601 = vrot.lane.b32.xlu2 %v597_v6, %s3748_s19 }
 0x119   : > { %v701_v28 = vld.sshfl [vmem:[#allocation1 + $0x10] sm:$0xff pattern:$0x75316420]  ;;  %v702_v30 = vld.sshfl [vmem:[#allocation1 + $0x18] sm:$0xff pattern:$0x75316420] }
 0x11a   : > { %634 = vrot.lane.b32.xlu1 %v629_v9, %s3749_s24  ;;  %632 = vrot.lane.b32.xlu0 %v628_v10, %s3749_s24 }
 0x11f   : > { %607 = vrot.lane.b32.xlu2 %v600_v16, %s3748_s19  ;;  %s3760_s19 = smov 98  }
 0x122   : > { %638 = vrot.lane.b32.xlu0 %v631_v17, %s3749_s24  ;;  %669 = vrot.lane.b32.xlu1 %v664_v13, %s3744_s20 }
 0x127   : > { %636 = vrot.lane.b32.xlu2 %v630_v18, %s3749_s24 }
 0x129   : > { %v3950_v22 = vpop.permute.xlu2 %511 }
 0x12a   : > { %673 = vrot.lane.b32.xlu0 %v666_v20, %s3744_s20  ;;  %675 = vrot.lane.b32.xlu1 %v667_v21, %s3744_s20 }
 0x12c   : > { %v404_v23 = vpop.permute.xlu1 %403 }
 0x12f   : > { %671 = vrot.lane.b32.xlu2 %v665_v14, %s3744_s20  ;;  %s3423_s20 = sshll.u32 %s3890_s29, 4 }
 0x130   : > { %s5320_s8 = scalar_lea.vmem [#allocation10], %s3423_s20 }
 0x131   : > { %v406_v24 = vpop.permute.xlu2 %405 }
 0x132   : > { %v412_v27 = vsel %vm411_vm11, %v404_v23, %v406_v24  ;;  %705 = vrot.lane.b32.xlu1 %v700_v25, %s3750_s25  ;;  %703 = vrot.lane.b32.xlu0 %v699_v26, %s3750_s25 }
 0x133   : > { %419 = vst [vmem:[#allocation3] sm:$0xf0] %v412_v27 }
 0x137   : > { %707 = vrot.lane.b32.xlu2 %v701_v28, %s3750_s25 }
 0x139   : > { %v3959_v29 = vpop.permute.xlu2 %677 }
 0x13a   : > { %709 = vrot.lane.b32.xlu0 %v702_v30, %s3750_s25  ;;  %v981_v31 = vld [vmem:[#allocation3] sm:$0xff] }
 0x13b   : > { %v3962_v32 = vld [vmem:[#allocation3] sm:$0xff]  ;;  %1029 = vrot.lane.b32.xlu1 %v981_v31, %s3746_s11  ;;  %v3970_v39 = vrot.slane %v981_v31, 4 }
 0x13c   : > { %747 = vst [vmem:[#allocation4] sm:$0xff] %v3962_v32 }
 0x141   : > { %v436_v33 = vpop.permute.xlu2 %435 }
 0x143   : > { %1398 = vrot.lane.b32.xlu1 %v981_v31, %s3750_s25 }
 0x144   : > { %v408_v34 = vpop.permute.xlu0 %407  ;;  %v410_v35 = vpop.permute.xlu1 %409 }
 0x145   : > { %v413_v36 = vsel %vm411_vm11, %v406_v24, %v408_v34  ;;  %v414_v37 = vsel %vm411_vm11, %v408_v34, %v410_v35  ;;  %423 = vst.msk [vmem:[#allocation3 + $0x18] sm:$0xf0] %vm422_vm12, %v410_v35  ;;  %vm959_vm11 = vcmask 261124  }
 0x146   : > { %420 = vst [vmem:[#allocation3 + $0x8] sm:$0xf0] %v413_v36 }
 0x147   : > { %421 = vst [vmem:[#allocation3 + $0x10] sm:$0xf0] %v414_v37 }
 0x149   : > { %v442_v38 = vpop.permute.xlu2 %441 }
 0x14a   : > { %454 = vst.msk [vmem:[#allocation3 + $0x38] sm:$0xf] %vm389_vm10, %v442_v38 }
 0x14b   : > { %865 = vrot.lane.b32.xlu1 %v3970_v39, %s3736_s28 }
 0x14c   : > { %v440_v40 = vpop.permute.xlu1 %439  ;;  %v438_v41 = vpop.permute.xlu0 %437  ;;  %v726_v50 = vld [vmem:[#allocation3 + $0x18] sm:$0xff] }
 0x14d   : > { %v446_v42 = vsel %vm443_vm13, %v440_v40, %v442_v38  ;;  %v444_v43 = vsel %vm443_vm13, %v436_v33, %v438_v41  ;;  %v445_v44 = vsel %vm443_vm13, %v438_v41, %v440_v40  ;;  %v982_v45 = vld [vmem:[#allocation3 + $0x8] sm:$0xff]  ;;  %751 = vst.msk [vmem:[#allocation4 + $0x18] sm:$0xff] %vm750_vm14, %v726_v50  ;;  %v984_v56 = vld [vmem:[#allocation3 + $0x18] sm:$0xff]  ;;  %vm1815_vm13 = vcmask 998400  }
 0x14e   : > { %453 = vst [vmem:[#allocation3 + $0x30] sm:$0xf] %v446_v42  ;;  %1031 = vrot.lane.b32.xlu2 %v982_v45, %s3746_s11  ;;  %v983_v46 = vld [vmem:[#allocation3 + $0x10] sm:$0xff]  ;;  %v724_v47 = vld [vmem:[#allocation3 + $0x8] sm:$0xff]  ;;  %v822_v59 = vrot.slane %v982_v45, 4  ;;  %v4009_v10 = vrot.slane %v984_v56, 4 }
 0x14f   : > { %451 = vst [vmem:[#allocation3 + $0x20] sm:$0xf] %v444_v43  ;;  %1033 = vrot.lane.b32.xlu0 %v983_v46, %s3746_s11  ;;  %v725_v49 = vld [vmem:[#allocation3 + $0x10] sm:$0xff]  ;;  %v3988_v62 = vrot.slane %v983_v46, 4 }
 0x150   : > { %452 = vst [vmem:[#allocation3 + $0x28] sm:$0xf] %v445_v44 }
 0x151   : > { %v472_v48 = vpop.permute.xlu2 %471  ;;  %748 = vst [vmem:[#allocation4 + $0x8] sm:$0xff] %v724_v47 }
 0x152   : > { %749 = vst [vmem:[#allocation4 + $0x10] sm:$0xff] %v725_v49 }
 0x153   : > { %1235 = vrot.lane.b32.xlu1 %v3970_v39, %s3751_s26 }
 0x154   : > { %v470_v51 = vpop.permute.xlu1 %469  ;;  %v468_v52 = vpop.permute.xlu0 %467 }
 0x155   : > { %v477_v53 = vsel %vm475_vm15, %v470_v51, %v472_v48  ;;  %v476_v54 = vsel %vm475_vm15, %v468_v52, %v470_v51 }
 0x156   : > { %484 = vst [vmem:[#allocation3 + $0x28] sm:$0xf0] %v477_v53  ;;  %1400 = vrot.lane.b32.xlu2 %v982_v45, %s3750_s25 }
 0x157   : > { %483 = vst [vmem:[#allocation3 + $0x20] sm:$0xf0] %v476_v54  ;;  %1402 = vrot.lane.b32.xlu0 %v983_v46, %s3750_s25 }
 0x159   : > { %v506_v55 = vpop.permute.xlu2 %505 }
 0x15b   : > { %1035 = vrot.lane.b32.xlu1 %v984_v56, %s3746_s11 }
 0x15c   : > { %v474_v57 = vpop.permute.xlu0 %473  ;;  %v504_v58 = vpop.permute.xlu1 %503 }
 0x15d   : > { %v478_v60 = vsel %vm475_vm15, %v472_v48, %v474_v57  ;;  %486 = vst.msk [vmem:[#allocation3 + $0x38] sm:$0xf0] %vm422_vm12, %v474_v57  ;;  %v514_v61 = vsel %vm513_vm0, %v504_v58, %v506_v55  ;;  %v728_v0 = vld [vmem:[#allocation3 + $0x28] sm:$0xff]  ;;  %vm2022_vm15 = vcmask 990208  }
 0x15e   : > { %485 = vst [vmem:[#allocation3 + $0x30] sm:$0xf0] %v478_v60  ;;  %867 = vrot.lane.b32.xlu2 %v822_v59, %s3736_s28  ;;  %v3991_v63 = vld [vmem:[#allocation3 + $0x20] sm:$0xff]  ;;  %v4019_v16 = vld [vmem:[#allocation3 + $0x28] sm:$0xff] }
 0x15f   : > { %522 = vst [vmem:[#allocation3 + $0x40] sm:$0xf] %v514_v61  ;;  %869 = vrot.lane.b32.xlu0 %v3988_v62, %s3736_s28  ;;  %v4015_v15 = vld [vmem:[#allocation3 + $0x20] sm:$0xff]  ;;  %v4024_v18 = vrot.slane %v4019_v16, 4 }
 0x160   : > { %752 = vst [vmem:[#allocation4 + $0x20] sm:$0xff] %v3991_v63  ;;  %v825_v27 = vrot.slane %v4015_v15, 4 }
 0x161   : > { %v543_v1 = vpop.permute.xlu2 %542  ;;  %753 = vst [vmem:[#allocation4 + $0x28] sm:$0xff] %v728_v0  ;;  %v828_v23 = vsel %vm245_vm2, %v822_v59, %v4024_v18 }
 0x162   : > { %v826_v36 = vsel %vm245_vm2, %v3970_v39, %v825_v27 }
 0x163   : > { %1404 = vrot.lane.b32.xlu1 %v984_v56, %s3750_s25 }
 0x164   : > { %v3997_v2 = vld [vmem:[#allocation3 + $0x38] sm:$0xff]  ;;  %v508_v3 = vpop.permute.xlu0 %507  ;;  %v510_v4 = vpop.permute.xlu1 %509 }
 0x165   : > { %v515_v5 = vsel %vm513_vm0, %v506_v55, %v508_v3  ;;  %v516_v6 = vsel %vm513_vm0, %v508_v3, %v510_v4  ;;  %v517_v7 = vsel %vm513_vm0, %v510_v4, %v3950_v22  ;;  %755 = vst.msk [vmem:[#allocation4 + $0x38] sm:$0xff] %vm750_vm14, %v3997_v2  ;;  %v2258_v8 = vld [vmem:[#allocation3 + $0x30] sm:$0xff]  ;;  %v831_v57 = vrot.slane %v3997_v2, 4 }
 0x166   : > { %523 = vst [vmem:[#allocation3 + $0x48] sm:$0xf] %v515_v5  ;;  %1237 = vrot.lane.b32.xlu2 %v822_v59, %s3751_s26  ;;  %v4038_v28 = vld [vmem:[#allocation3 + $0x30] sm:$0xff]  ;;  %vm2185_vm0 = vcmask 982016  }
 0x167   : > { %524 = vst [vmem:[#allocation3 + $0x50] sm:$0xf] %v516_v6  ;;  %1239 = vrot.lane.b32.xlu0 %v3988_v62, %s3751_s26  ;;  %v4051_v37 = vrot.slane %v4038_v28, 4 }
 0x168   : > { %525 = vst.msk [vmem:[#allocation3 + $0x58] sm:$0xf] %vm389_vm10, %v517_v7 }
 0x169   : > { %v572_v9 = vpop.permute.xlu2 %571  ;;  %754 = vst [vmem:[#allocation4 + $0x30] sm:$0xff] %v2258_v8  ;;  %v830_v40 = vsel %vm245_vm2, %v3988_v62, %v4051_v37 }
 0x16b   : > { %871 = vrot.lane.b32.xlu1 %v4009_v10, %s3736_s28 }
 0x16c   : > { %v541_v11 = vpop.permute.xlu1 %540  ;;  %v539_v12 = vpop.permute.xlu0 %538 }
 0x16d   : > { %v548_v13 = vsel %vm546_vm1, %v541_v11, %v543_v1  ;;  %v547_v14 = vsel %vm546_vm1, %v539_v12, %v541_v11 }
 0x16e   : > { %555 = vst [vmem:[#allocation3 + $0x48] sm:$0xf0] %v548_v13  ;;  %1037 = vrot.lane.b32.xlu2 %v4015_v15, %s3746_s11 }
 0x16f   : > { %554 = vst [vmem:[#allocation3 + $0x40] sm:$0xf0] %v547_v14  ;;  %1039 = vrot.lane.b32.xlu0 %v4019_v16, %s3746_s11 }
 0x171   : > { %v602_v17 = vpop.permute.xlu2 %601 }
 0x173   : > { %1241 = vrot.lane.b32.xlu1 %v4009_v10, %s3751_s26 }
 0x174   : > { %v545_v19 = vpop.permute.xlu0 %544  ;;  %v570_v20 = vpop.permute.xlu1 %569 }
 0x175   : > { %v549_v21 = vsel %vm546_vm1, %v543_v1, %v545_v19  ;;  %557 = vst.msk [vmem:[#allocation3 + $0x58] sm:$0xf0] %vm422_vm12, %v545_v19  ;;  %v578_v22 = vsel %vm577_vm3, %v570_v20, %v572_v9  ;;  %v732_v25 = vld [vmem:[#allocation3 + $0x48] sm:$0xff]  ;;  %v832_v1 = vsel %vm245_vm2, %v4009_v10, %v831_v57 }
 0x176   : > { %556 = vst [vmem:[#allocation3 + $0x50] sm:$0xf0] %v549_v21  ;;  %1406 = vrot.lane.b32.xlu2 %v4015_v15, %s3750_s25  ;;  %v731_v24 = vld [vmem:[#allocation3 + $0x40] sm:$0xff]  ;;  %v4084_v58 = vld [vmem:[#allocation3 + $0x48] sm:$0xff] }
 0x177   : > { %585 = vst [vmem:[#allocation3 + $0x60] sm:$0xf] %v578_v22  ;;  %875 = vrot.lane.b32.xlu0 %v828_v23, %s3736_s28  ;;  %v4064_v46 = vld [vmem:[#allocation3 + $0x40] sm:$0xff]  ;;  %v835_v3 = vrot.slane %v4084_v58, 4 }
 0x178   : > { %756 = vst [vmem:[#allocation4 + $0x40] sm:$0xff] %v731_v24  ;;  %v4070_v48 = vrot.slane %v4064_v46, 4 }
 0x179   : > { %v608_v26 = vpop.permute.xlu2 %607  ;;  %757 = vst [vmem:[#allocation4 + $0x48] sm:$0xff] %v732_v25  ;;  %v4100_v4 = vsel %vm245_vm2, %v4024_v18, %v835_v3 }
 0x17a   : > { %620 = vst.msk [vmem:[#allocation3 + $0x78] sm:$0xf0] %vm422_vm12, %v608_v26  ;;  %v834_v53 = vsel %vm245_vm2, %v825_v27, %v4070_v48 }
 0x17b   : > { %1041 = vrot.lane.b32.xlu1 %v4038_v28, %s3746_s11 }
 0x17c   : > { %v574_v30 = vpop.permute.xlu0 %573  ;;  %v576_v31 = vpop.permute.xlu1 %575  ;;  %v4042_v33 = vld [vmem:[#allocation3 + $0x58] sm:$0xff] }
 0x17d   : > { %v579_v34 = vsel %vm577_vm3, %v572_v9, %v574_v30  ;;  %v580_v35 = vsel %vm577_vm3, %v574_v30, %v576_v31  ;;  %588 = vst.msk [vmem:[#allocation3 + $0x78] sm:$0xf] %vm389_vm10, %v576_v31  ;;  %v2262_v38 = vld [vmem:[#allocation3 + $0x50] sm:$0xff]  ;;  %v839_v13 = vrot.slane %v4042_v33, 4 }
 0x17e   : > { %586 = vst [vmem:[#allocation3 + $0x68] sm:$0xf] %v579_v34  ;;  %873 = vrot.lane.b32.xlu2 %v826_v36, %s3736_s28  ;;  %v4119_v19 = vld [vmem:[#allocation3 + $0x50] sm:$0xff] }
 0x17f   : > { %587 = vst [vmem:[#allocation3 + $0x70] sm:$0xf] %v580_v35  ;;  %1245 = vrot.lane.b32.xlu0 %v828_v23, %s3751_s26  ;;  %v840_v21 = vsel %vm245_vm2, %v831_v57, %v839_v13  ;;  %v837_v25 = vrot.slane %v4119_v19, 4 }
 0x180   : > { %759 = vst.msk [vmem:[#allocation4 + $0x58] sm:$0xff] %vm750_vm14, %v4042_v33 }
 0x181   : > { %758 = vst [vmem:[#allocation4 + $0x50] sm:$0xff] %v2262_v38  ;;  %v637_v47 = vpop.permute.xlu2 %636  ;;  %v4137_v34 = vsel %vm245_vm2, %v4051_v37, %v837_v25 }
 0x183   : > { %877 = vrot.lane.b32.xlu1 %v830_v40, %s3736_s28 }
 0x184   : > { %v4060_v39 = vld [vmem:[#allocation3 + $0x78] sm:$0xff]  ;;  %v606_v41 = vpop.permute.xlu1 %605  ;;  %v604_v42 = vpop.permute.xlu0 %603 }
 0x185   : > { %v612_v43 = vsel %vm609_vm4, %v606_v41, %v608_v26  ;;  %v610_v44 = vsel %vm609_vm4, %v602_v17, %v604_v42  ;;  %v611_v45 = vsel %vm609_vm4, %v604_v42, %v606_v41  ;;  %763 = vst.msk [vmem:[#allocation4 + $0x78] sm:$0xff] %vm750_vm14, %v4060_v39  ;;  %vm2392_vm4 = vcmask 973824  }
 0x186   : > { %619 = vst [vmem:[#allocation3 + $0x70] sm:$0xf0] %v612_v43  ;;  %1243 = vrot.lane.b32.xlu2 %v826_v36, %s3751_s26 }
 0x187   : > { %617 = vst [vmem:[#allocation3 + $0x60] sm:$0xf0] %v610_v44  ;;  %1045 = vrot.lane.b32.xlu0 %v4064_v46, %s3746_s11 }
 0x188   : > { %618 = vst [vmem:[#allocation3 + $0x68] sm:$0xf0] %v611_v45 }
 0x189   : > { %v672_v59 = vpop.permute.xlu2 %671 }
 0x18b   : > { %1247 = vrot.lane.b32.xlu1 %v830_v40, %s3751_s26 }
 0x18c   : > { %v635_v49 = vpop.permute.xlu1 %634  ;;  %v633_v50 = vpop.permute.xlu0 %632 }
 0x18d   : > { %v642_v51 = vsel %vm640_vm5, %v635_v49, %v637_v47  ;;  %v641_v52 = vsel %vm640_vm5, %v633_v50, %v635_v49  ;;  %v737_v55 = vld [vmem:[#allocation3 + $0x70] sm:$0xff] }
 0x18e   : > { %649 = vst [vmem:[#allocation3 + $0x88] sm:$0xf] %v642_v51  ;;  %1043 = vrot.lane.b32.xlu2 %v3997_v2, %s3746_s11  ;;  %v4079_v54 = vld [vmem:[#allocation3 + $0x60] sm:$0xff]  ;;  %v4154_v43 = vld [vmem:[#allocation3 + $0x70] sm:$0xff] }
 0x18f   : > { %648 = vst [vmem:[#allocation3 + $0x80] sm:$0xf] %v641_v52  ;;  %881 = vrot.lane.b32.xlu0 %v834_v53, %s3736_s28  ;;  %v736_v56 = vld [vmem:[#allocation3 + $0x68] sm:$0xff]  ;;  %v4128_v26 = vld [vmem:[#allocation3 + $0x60] sm:$0xff]  ;;  %v845_v49 = vrot.slane %v4154_v43, 4 }
 0x190   : > { %760 = vst [vmem:[#allocation4 + $0x60] sm:$0xff] %v4079_v54  ;;  %v841_v36 = vrot.slane %v4128_v26, 4  ;;  %v4165_v51 = vld [vmem:[#allocation3 + $0x68] sm:$0xff] }
 0x191   : > { %761 = vst [vmem:[#allocation4 + $0x68] sm:$0xff] %v736_v56  ;;  %v708_v12 = vpop.permute.xlu2 %707  ;;  %v4170_v52 = vsel %vm245_vm2, %v837_v25, %v845_v49  ;;  %v843_v57 = vrot.slane %v4165_v51, 4 }
 0x192   : > { %762 = vst [vmem:[#allocation4 + $0x70] sm:$0xff] %v737_v55  ;;  %v4150_v40 = vsel %vm245_vm2, %v4070_v48, %v841_v36 }
 0x193   : > { %1047 = vrot.lane.b32.xlu1 %v4084_v58, %s3746_s11 }
 0x194   : > { %v639_v60 = vpop.permute.xlu0 %638  ;;  %v670_v61 = vpop.permute.xlu1 %669 }
 0x195   : > { %v643_v62 = vsel %vm640_vm5, %v637_v47, %v639_v60  ;;  %651 = vst.msk [vmem:[#allocation3 + $0x98] sm:$0xf] %vm389_vm10, %v639_v60  ;;  %v680_v0 = vsel %vm679_vm6, %v670_v61, %v672_v59  ;;  %vm3227_vm5 = vcmask 523648  }
 0x196   : > { %650 = vst [vmem:[#allocation3 + $0x90] sm:$0xf] %v643_v62  ;;  %879 = vrot.lane.b32.xlu2 %v832_v1, %s3736_s28 }
 0x197   : > { %688 = vst [vmem:[#allocation3 + $0x80] sm:$0xf0] %v680_v0  ;;  %1251 = vrot.lane.b32.xlu0 %v834_v53, %s3751_s26  ;;  %v4184_v0 = vsel %vm245_vm2, %v835_v3, %v843_v57 }
 0x19b   : > { %883 = vrot.lane.b32.xlu1 %v4100_v4, %s3736_s28 }
 0x19c   : > { %v674_v5 = vpop.permute.xlu0 %673  ;;  %v676_v6 = vpop.permute.xlu1 %675 }
 0x19d   : > { %v681_v7 = vsel %vm679_vm6, %v672_v59, %v674_v5  ;;  %v682_v8 = vsel %vm679_vm6, %v674_v5, %v676_v6  ;;  %v683_v9 = vsel %vm679_vm6, %v676_v6, %v3959_v29  ;;  %v847_v5 = vrot.slane %v4060_v39, 4 }
 0x19e   : > { %689 = vst [vmem:[#allocation3 + $0x88] sm:$0xf0] %v681_v7  ;;  %1249 = vrot.lane.b32.xlu2 %v832_v1, %s3751_s26  ;;  %v4109_v11 = vld [vmem:[#allocation3 + $0x80] sm:$0xff]  ;;  %vm3232_vm6 = vcmask 654848  }
 0x19f   : > { %690 = vst [vmem:[#allocation3 + $0x90] sm:$0xf0] %v682_v8  ;;  %1051 = vrot.lane.b32.xlu0 %v4042_v33, %s3746_s11  ;;  %v848_v3 = vsel %vm245_vm2, %v839_v13, %v847_v5  ;;  %v4225_v25 = vrot.slane %v4109_v11, 4 }
 0x1a0   : > { %691 = vst.msk [vmem:[#allocation3 + $0x98] sm:$0xf0] %vm422_vm12, %v683_v9  ;;  %vm1652_vm12 = vcmask 1006592  }
 0x1a3   : > { %1253 = vrot.lane.b32.xlu1 %v4100_v4, %s3751_s26 }
 0x1a4   : > { %v706_v14 = vpop.permute.xlu1 %705  ;;  %v704_v29 = vpop.permute.xlu0 %703 }
 0x1a5   : > { %v713_v15 = vsel %vm711_vm7, %v706_v14, %v708_v12  ;;  %v712_v17 = vsel %vm711_vm7, %v704_v29, %v706_v14  ;;  %v740_v20 = vld [vmem:[#allocation3 + $0x88] sm:$0xff] }
 0x1a6   : > { %720 = vst [vmem:[#allocation3 + $0xa8] sm:$0xf] %v713_v15  ;;  %1049 = vrot.lane.b32.xlu2 %v4119_v19, %s3746_s11  ;;  %v741_v23 = vld [vmem:[#allocation3 + $0x90] sm:$0xff] }
 0x1a7   : > { %719 = vst [vmem:[#allocation3 + $0xa0] sm:$0xf] %v712_v17  ;;  %887 = vrot.lane.b32.xlu0 %v840_v21, %s3736_s28  ;;  %v742_v24 = vld [vmem:[#allocation3 + $0x98] sm:$0xff] }
 0x1a8   : > { %v1032_v22 = vpop.permute.xlu2 %1031  ;;  %765 = vst [vmem:[#allocation4 + $0x88] sm:$0xff] %v740_v20 }
 0x1a9   : > { %766 = vst [vmem:[#allocation4 + $0x90] sm:$0xff] %v741_v23 }
 0x1aa   : > { %767 = vst.msk [vmem:[#allocation4 + $0x98] sm:$0xff] %vm750_vm14, %v742_v24 }
 0x1ab   : > { %1053 = vrot.lane.b32.xlu1 %v4128_v26, %s3746_s11 }
 0x1ac   : > { %v710_v27 = vpop.permute.xlu0 %709 }
 0x1ad   : > { %v714_v30 = vsel %vm711_vm7, %v708_v12, %v710_v27  ;;  %722 = vst.msk [vmem:[#allocation3 + $0xb8] sm:$0xf] %vm389_vm10, %v710_v27  ;;  %v1030_v31 = vpop.permute.xlu1 %1029  ;;  %v744_v60 = vld [vmem:[#allocation3 + $0xa8] sm:$0xf]  ;;  %vm1283_vm10 = vcmask 1022976  }
 0x1ae   : > { %721 = vst [vmem:[#allocation3 + $0xb0] sm:$0xf] %v714_v30  ;;  %v4140_v35 = vsel %vm546_vm1, %v1030_v31, %v1032_v22  ;;  %885 = vrot.lane.b32.xlu2 %v4137_v34, %s3736_s28  ;;  %v743_v41 = vld [vmem:[#allocation3 + $0xa0] sm:$0xf]  ;;  %v4199_v12 = vld [vmem:[#allocation3 + $0x88] sm:$0xff]  ;;  %v4228_v30 = vld [vmem:[#allocation3 + $0x90] sm:$0xff] }
 0x1af   : > { %1257 = vrot.lane.b32.xlu0 %v840_v21, %s3751_s26  ;;  %768 = vst [vmem:[#allocation4 + $0xa0] sm:$0xf] %v743_v41  ;;  %v4211_v17 = vrot.slane %v4199_v12, 4  ;;  %v1001_v41 = vld [vmem:[#allocation3 + $0xa0] sm:$0xf] }
 0x1b0   : > { %v1401_v38 = vpop.permute.xlu2 %1400  ;;  %769 = vst [vmem:[#allocation4 + $0xa8] sm:$0xf] %v744_v60 }
 0x1b1   : > { %v4216_v21 = vsel %vm245_vm2, %v843_v57, %v4211_v17 }
 0x1b3   : > { %889 = vrot.lane.b32.xlu1 %v4150_v40, %s3736_s28 }
 0x1b4   : > { %v746_v45 = vld [vmem:[#allocation3 + $0xb8] sm:$0xf] }
 0x1b5   : > { %v1399_v42 = vpop.permute.xlu1 %1398  ;;  %772 = vst.msk [vmem:[#allocation4 + $0xb8] sm:$0xf] %vm771_vm8, %v746_v45  ;;  %v745_v61 = vld [vmem:[#allocation3 + $0xb0] sm:$0xf] }
 0x1b6   : > { %v1446_v44 = vsel %vm711_vm7, %v1399_v42, %v1401_v38  ;;  %1255 = vrot.lane.b32.xlu2 %v4137_v34, %s3751_s26  ;;  %770 = vst [vmem:[#allocation4 + $0xb0] sm:$0xf] %v745_v61 }
 0x1b7   : > { %1057 = vrot.lane.b32.xlu0 %v4154_v43, %s3746_s11  ;;  %1488 = vst [vmem:[#allocation4 + $0x2c0] sm:$0xff] %v1446_v44  ;;  %v4243_v44 = vrot.slane %v4228_v30, 4 }
 0x1b8   : > { %v868_v47 = vpop.permute.xlu2 %867 }
 0x1bb   : > { %1259 = vrot.lane.b32.xlu1 %v4150_v40, %s3751_s26 }
 0x1bd   : > { %v866_v50 = vpop.permute.xlu1 %865 }
 0x1be   : > { %v914_v53 = vsel %vm913_vm9, %v866_v50, %v868_v47  ;;  %1055 = vrot.lane.b32.xlu2 %v4165_v51, %s3746_s11 }
 0x1bf   : > { %893 = vrot.lane.b32.xlu0 %v4170_v52, %s3736_s28  ;;  %956 = vst [vmem:[#allocation4 + $0xa0] sm:$0xf0] %v914_v53 }
 0x1c0   : > { %v1238_v55 = vpop.permute.xlu2 %1237 }
 0x1c1   : > { %v1034_v56 = vpop.permute.xlu0 %1033 }
 0x1c2   : > { %v1078_v59 = vsel %vm546_vm1, %v1032_v22, %v1034_v56 }
 0x1c3   : > { %1120 = vst [vmem:[#allocation4 + $0x168] sm:$0xff] %v1078_v59  ;;  %1059 = vrot.lane.b32.xlu1 %v4060_v39, %s3746_s11 }
 0x1c5   : > { %v1236_v62 = vpop.permute.xlu1 %1235 }
 0x1c6   : > { %v1284_v1 = vsel %vm1283_vm10, %v1236_v62, %v1238_v55  ;;  %891 = vrot.lane.b32.xlu2 %v4184_v0, %s3736_s28  ;;  %v4269_v62 = vld [vmem:[#allocation3 + $0x98] sm:$0xff] }
 0x1c7   : > { %1263 = vrot.lane.b32.xlu0 %v4170_v52, %s3751_s26  ;;  %1326 = vst [vmem:[#allocation4 + $0x200] sm:$0xf0] %v1284_v1 }
 0x1c8   : > { %v1038_v6 = vpop.permute.xlu2 %1037 }
 0x1c9   : > { %v1403_v7 = vpop.permute.xlu0 %1402 }
 0x1ca   : > { %v1447_v8 = vsel %vm711_vm7, %v1401_v38, %v1403_v7  ;;  %v4236_v38 = vsel %vm245_vm2, %v841_v36, %v4225_v25  ;;  %v4253_v36 = vsel %vm245_vm2, %v845_v49, %v4243_v44 }
 0x1cb   : > { %1489 = vst [vmem:[#allocation4 + $0x2c8] sm:$0xff] %v1447_v8  ;;  %895 = vrot.lane.b32.xlu1 %v848_v3, %s3736_s28  ;;  %v1163_v8 = vld [vmem:[#allocation3 + $0xa0] sm:$0xf] }
 0x1cd   : > { %v1036_v9 = vpop.permute.xlu1 %1035 }
 0x1ce   : > { %v1079_v14 = vsel %vm546_vm1, %v1034_v56, %v1036_v9  ;;  %1122 = vst.msk [vmem:[#allocation4 + $0x178] sm:$0xff] %vm750_vm14, %v1036_v9  ;;  %1261 = vrot.lane.b32.xlu2 %v4184_v0, %s3751_s26  ;;  %v793_v56 = vld [vmem:[#allocation3 + $0xa0] sm:$0xf] }
 0x1cf   : > { %1063 = vrot.lane.b32.xlu0 %v4199_v12, %s3746_s11  ;;  %1121 = vst [vmem:[#allocation4 + $0x170] sm:$0xff] %v1079_v14  ;;  %v857_v60 = vrot.slane %v793_v56, 4  ;;  %v4280_v14 = vrot.slane %v4269_v62, 4  ;;  %v1004_v56 = vld [vmem:[#allocation3 + $0xb8] sm:$0xf] }
 0x1d0   : > { %v4207_v29 = vpop.permute.xlu2 %1406 }
 0x1d1   : > { %v870_v13 = vpop.permute.xlu0 %869  ;;  %v858_v1 = vsel %vm245_vm2, %v4225_v25, %v857_v60 }
 0x1d2   : > { %v915_v15 = vsel %vm913_vm9, %v868_v47, %v870_v13 }
 0x1d3   : > { %957 = vst [vmem:[#allocation4 + $0xa8] sm:$0xf0] %v915_v15  ;;  %1265 = vrot.lane.b32.xlu1 %v848_v3, %s3751_s26  ;;  %v1002_v15 = vld [vmem:[#allocation3 + $0xa8] sm:$0xf] }
 0x1d5   : > { %v1405_v20 = vpop.permute.xlu1 %1404 }
 0x1d6   : > { %v1448_v22 = vsel %vm711_vm7, %v1403_v7, %v1405_v20  ;;  %1491 = vst.msk [vmem:[#allocation4 + $0x2d8] sm:$0xff] %vm750_vm14, %v1405_v20  ;;  %1061 = vrot.lane.b32.xlu2 %v4109_v11, %s3746_s11  ;;  %v1227_v20 = vrot.slane %v1163_v8, 4 }
 0x1d7   : > { %899 = vrot.lane.b32.xlu0 %v4216_v21, %s3736_s28  ;;  %1490 = vst [vmem:[#allocation4 + $0x2d0] sm:$0xff] %v1448_v22  ;;  %v794_v22 = vld [vmem:[#allocation3 + $0xa8] sm:$0xf] }
 0x1d8   : > { %v874_v23 = vpop.permute.xlu2 %873 }
 0x1d9   : > { %v1240_v24 = vpop.permute.xlu0 %1239 }
 0x1da   : > { %v1285_v27 = vsel %vm1283_vm10, %v1238_v55, %v1240_v24 }
 0x1db   : > { %1327 = vst [vmem:[#allocation4 + $0x208] sm:$0xf0] %v1285_v27  ;;  %1065 = vrot.lane.b32.xlu1 %v4228_v30, %s3746_s11  ;;  %v1228_v27 = vsel %vm245_vm2, %v4225_v25, %v1227_v20 }
 0x1dd   : > { %v872_v31 = vpop.permute.xlu1 %871 }
 0x1de   : > { %v916_v42 = vsel %vm913_vm9, %v870_v13, %v872_v31  ;;  %960 = vst.msk [vmem:[#allocation4 + $0xb8] sm:$0xf0] %vm959_vm11, %v872_v31  ;;  %897 = vrot.lane.b32.xlu2 %v4236_v38, %s3736_s28 }
 0x1df   : > { %1069 = vrot.lane.b32.xlu0 %v1001_v41, %s3746_s11  ;;  %958 = vst [vmem:[#allocation4 + $0xb0] sm:$0xf0] %v916_v42  ;;  %v859_v42 = vrot.slane %v794_v22, 4  ;;  %v795_v22 = vld [vmem:[#allocation3 + $0xb0] sm:$0xf] }
 0x1e0   : > { %v1244_v45 = vpop.permute.xlu2 %1243 }
 0x1e1   : > { %v1040_v47 = vpop.permute.xlu0 %1039 }
 0x1e2   : > { %v4247_v50 = vsel %vm546_vm1, %v1038_v6, %v1040_v47 }
 0x1e3   : > { %901 = vrot.lane.b32.xlu1 %v4253_v36, %s3736_s28 }
 0x1e5   : > { %v1242_v53 = vpop.permute.xlu1 %1241 }
 0x1e6   : > { %v1286_v55 = vsel %vm1283_vm10, %v1240_v24, %v1242_v53  ;;  %1329 = vst.msk [vmem:[#allocation4 + $0x218] sm:$0xf0] %vm959_vm11, %v1242_v53  ;;  %1267 = vrot.lane.b32.xlu2 %v4236_v38, %s3751_s26  ;;  %v856_v24 = vsel %vm245_vm2, %v847_v5, %v4280_v14  ;;  %v860_v5 = vsel %vm245_vm2, %v4211_v17, %v859_v42  ;;  %v1164_v53 = vld [vmem:[#allocation3 + $0xa8] sm:$0xf] }
 0x1e7   : > { %1269 = vrot.lane.b32.xlu0 %v4216_v21, %s3751_s26  ;;  %1328 = vst [vmem:[#allocation4 + $0x210] sm:$0xf0] %v1286_v55  ;;  %v1229_v60 = vrot.slane %v1164_v53, 4 }
 0x1e8   : > { %v1044_v57 = vpop.permute.xlu2 %1043 }
 0x1e9   : > { %v876_v59 = vpop.permute.xlu0 %875  ;;  %1126 = vst.msk [vmem:[#allocation4 + $0x198] sm:$0xff] %vm750_vm14, %v1044_v57 }
 0x1ea   : > { %v4265_v49 = vsel %vm913_vm9, %v874_v23, %v876_v59 }
 0x1eb   : > { %1271 = vrot.lane.b32.xlu1 %v4253_v36, %s3751_s26 }
 0x1ed   : > { %v1042_v61 = vpop.permute.xlu1 %1041 }
 0x1ee   : > { %v1081_v6 = vsel %vm546_vm1, %v1040_v47, %v1042_v61  ;;  %v1082_v7 = vsel %vm546_vm1, %v1042_v61, %v1044_v57  ;;  %1067 = vrot.lane.b32.xlu2 %v4269_v62, %s3746_s11  ;;  %v796_v61 = vld [vmem:[#allocation3 + $0xb8] sm:$0xf] }
 0x1ef   : > { %905 = vrot.lane.b32.xlu0 %v858_v1, %s3736_s28  ;;  %1124 = vst [vmem:[#allocation4 + $0x188] sm:$0xff] %v1081_v6  ;;  %v863_v8 = vrot.slane %v796_v61, 4 }
 0x1f0   : > { %1125 = vst [vmem:[#allocation4 + $0x190] sm:$0xff] %v1082_v7  ;;  %v880_v3 = vpop.permute.xlu2 %879  ;;  %v1230_v7 = vsel %vm245_vm2, %v4211_v17, %v1229_v60 }
 0x1f1   : > { %v1246_v9 = vpop.permute.xlu0 %1245  ;;  %964 = vst.msk [vmem:[#allocation4 + $0xd8] sm:$0xff] %vm750_vm14, %v880_v3 }
 0x1f2   : > { %v1287_v13 = vsel %vm1283_vm10, %v1244_v45, %v1246_v9 }
 0x1f3   : > { %1330 = vst [vmem:[#allocation4 + $0x220] sm:$0xff] %v1287_v13  ;;  %1071 = vrot.lane.b32.xlu1 %v1002_v15, %s3746_s11  ;;  %v864_v13 = vsel %vm245_vm2, %v4280_v14, %v863_v8 }
 0x1f5   : > { %v878_v23 = vpop.permute.xlu1 %877 }
 0x1f6   : > { %v918_v31 = vsel %vm913_vm9, %v876_v59, %v878_v23  ;;  %v919_v41 = vsel %vm913_vm9, %v878_v23, %v880_v3  ;;  %903 = vrot.lane.b32.xlu2 %v856_v24, %s3736_s28  ;;  %v1166_v23 = vld [vmem:[#allocation3 + $0xb8] sm:$0xf] }
 0x1f7   : > { %1275 = vrot.lane.b32.xlu0 %v1228_v27, %s3751_s26  ;;  %962 = vst [vmem:[#allocation4 + $0xc8] sm:$0xff] %v918_v31  ;;  %v861_v31 = vrot.slane %v795_v22, 4 }
 0x1f8   : > { %963 = vst [vmem:[#allocation4 + $0xd0] sm:$0xff] %v919_v41  ;;  %v1250_v45 = vpop.permute.xlu2 %1249  ;;  %v1233_v41 = vrot.slane %v1166_v23, 4 }
 0x1f9   : > { %v1046_v47 = vpop.permute.xlu0 %1045  ;;  %1333 = vst.msk [vmem:[#allocation4 + $0x238] sm:$0xff] %vm750_vm14, %v1250_v45 }
 0x1fb   : > { %907 = vrot.lane.b32.xlu1 %v860_v5, %s3736_s28 }
 0x1fd   : > { %v1248_v55 = vpop.permute.xlu1 %1247 }
 0x1fe   : > { %v1288_v57 = vsel %vm1283_vm10, %v1246_v9, %v1248_v55  ;;  %v1289_v59 = vsel %vm1283_vm10, %v1248_v55, %v1250_v45  ;;  %1273 = vrot.lane.b32.xlu2 %v856_v24, %s3751_s26  ;;  %v1003_v9 = vld [vmem:[#allocation3 + $0xb0] sm:$0xf]  ;;  %v862_v45 = vsel %vm245_vm2, %v4243_v44, %v861_v31  ;;  %v1371_v31 = vld [vmem:[#allocation3 + $0xa8] sm:$0xf] }
 0x1ff   : > { %1075 = vrot.lane.b32.xlu0 %v1004_v56, %s3746_s11  ;;  %1331 = vst [vmem:[#allocation4 + $0x228] sm:$0xff] %v1288_v57  ;;  %v1165_v55 = vld [vmem:[#allocation3 + $0xb0] sm:$0xf] }
 0x200   : > { %1332 = vst [vmem:[#allocation4 + $0x230] sm:$0xff] %v1289_v59  ;;  %v1050_v1 = vpop.permute.xlu2 %1049  ;;  %v1231_v57 = vrot.slane %v1165_v55, 4  ;;  %v1370_v55 = vld [vmem:[#allocation3 + $0xa0] sm:$0xf] }
 0x201   : > { %v882_v6 = vpop.permute.xlu0 %881 }
 0x202   : > { %v1232_v61 = vsel %vm245_vm2, %v4243_v44, %v1231_v57 }
 0x203   : > { %1277 = vrot.lane.b32.xlu1 %v1230_v7, %s3751_s26 }
 0x205   : > { %v1048_v3 = vpop.permute.xlu1 %1047 }
 0x206   : > { %v4308_v15 = vsel %vm546_vm1, %v1046_v47, %v1048_v3  ;;  %v1084_v20 = vsel %vm546_vm1, %v1048_v3, %v1050_v1  ;;  %1073 = vrot.lane.b32.xlu2 %v1003_v9, %s3746_s11  ;;  %v1234_v47 = vsel %vm245_vm2, %v4280_v14, %v1233_v41 }
 0x207   : > { %911 = vrot.lane.b32.xlu0 %v864_v13, %s3736_s28  ;;  %1128 = vst [vmem:[#allocation4 + $0x1a8] sm:$0xff] %v1084_v20 }
 0x208   : > { %v886_v24 = vpop.permute.xlu2 %885 }
 0x209   : > { %v1252_v27 = vpop.permute.xlu0 %1251 }
 0x20b   : > { %1410 = vrot.lane.b32.xlu1 %v4038_v28, %s3750_s25 }
 0x20d   : > { %v884_v42 = vpop.permute.xlu1 %883 }
 0x20e   : > { %v4320_v5 = vsel %vm913_vm9, %v882_v6, %v884_v42  ;;  %v921_v53 = vsel %vm913_vm9, %v884_v42, %v886_v24  ;;  %909 = vrot.lane.b32.xlu2 %v862_v45, %s3736_s28  ;;  %v4373_v45 = vrot.slane %v3962_v32, 4  ;;  %s3753_s28 = smov 122  }
 0x20f   : > { %1281 = vrot.lane.b32.xlu0 %v1234_v47, %s3751_s26  ;;  %966 = vst [vmem:[#allocation4 + $0xe8] sm:$0xff] %v921_v53 }
 0x210   : > { %v1256_v56 = vpop.permute.xlu2 %1255 }
 0x211   : > { %v1052_v28 = vpop.permute.xlu0 %1051 }
 0x212   : > { %v1085_v59 = vsel %vm546_vm1, %v1050_v1, %v1052_v28  ;;  %1130 = vst.msk [vmem:[#allocation4 + $0x1b8] sm:$0xff] %vm750_vm14, %v1052_v28 }
 0x213   : > { %1129 = vst [vmem:[#allocation4 + $0x1b0] sm:$0xff] %v1085_v59  ;;  %1416 = vrot.lane.b32.xlu1 %v4084_v58, %s3750_s25  ;;  %v1372_v59 = vld [vmem:[#allocation3 + $0xb0] sm:$0xf] }
 0x215   : > { %v1254_v60 = vpop.permute.xlu1 %1253 }
 0x216   : > { %v1290_v6 = vsel %vm1283_vm10, %v1252_v27, %v1254_v60  ;;  %v1291_v7 = vsel %vm1283_vm10, %v1254_v60, %v1256_v56  ;;  %1279 = vrot.lane.b32.xlu2 %v1232_v61, %s3751_s26  ;;  %v4386_v60 = vld [vmem:[#allocation3 + $0x10] sm:$0xff]  ;;  %v1373_v61 = vld [vmem:[#allocation3 + $0xb8] sm:$0xf]  ;;  %s3762_s26 = smov 8  }
 0x217   : > { %1408 = vrot.lane.b32.xlu0 %v4019_v16, %s3750_s25  ;;  %1334 = vst [vmem:[#allocation4 + $0x240] sm:$0xff] %v1290_v6 }
 0x218   : > { %1335 = vst [vmem:[#allocation4 + $0x248] sm:$0xff] %v1291_v7  ;;  %v1056_v1 = vpop.permute.xlu2 %1055 }
 0x219   : > { %v888_v8 = vpop.permute.xlu0 %887 }
 0x21a   : > { %v922_v3 = vsel %vm913_vm9, %v886_v24, %v888_v8  ;;  %968 = vst.msk [vmem:[#allocation4 + $0xf8] sm:$0xff] %vm750_vm14, %v888_v8 }
 0x21b   : > { %967 = vst [vmem:[#allocation4 + $0xf0] sm:$0xff] %v922_v3  ;;  %1422 = vrot.lane.b32.xlu1 %v4128_v26, %s3750_s25  ;;  %v4397_v3 = vld [vmem:[#allocation3 + $0x8] sm:$0xff] }
 0x21d   : > { %v1054_v58 = vpop.permute.xlu1 %1053 }
 0x21e   : > { %v1086_v9 = vsel %vm546_vm1, %v1054_v58, %v1056_v1  ;;  %1412 = vrot.lane.b32.xlu2 %v3997_v2, %s3750_s25 }
 0x21f   : > { %1414 = vrot.lane.b32.xlu0 %v4064_v46, %s3750_s25 }
 0x220   : > { %v892_v16 = vpop.permute.xlu2 %891 }
 0x221   : > { %v1258_v13 = vpop.permute.xlu0 %1257 }
 0x222   : > { %v1292_v20 = vsel %vm1283_vm10, %v1256_v56, %v1258_v13  ;;  %1337 = vst.msk [vmem:[#allocation4 + $0x258] sm:$0xff] %vm750_vm14, %v1258_v13 }
 0x223   : > { %1336 = vst [vmem:[#allocation4 + $0x250] sm:$0xff] %v1292_v20  ;;  %1428 = vrot.lane.b32.xlu1 %v4060_v39, %s3750_s25 }
 0x225   : > { %v890_v26 = vpop.permute.xlu1 %889 }
 0x226   : > { %v4350_v22 = vsel %vm913_vm9, %v890_v26, %v892_v16  ;;  %1418 = vrot.lane.b32.xlu2 %v4119_v19, %s3750_s25 }
 0x227   : > { %1420 = vrot.lane.b32.xlu0 %v4042_v33, %s3750_s25 }
 0x228   : > { %v1262_v2 = vpop.permute.xlu2 %1261 }
 0x229   : > { %v1058_v46 = vpop.permute.xlu0 %1057 }
 0x22a   : > { %v1087_v23 = vsel %vm546_vm1, %v1056_v1, %v1058_v46  ;;  %v4394_v1 = vrot.slane %v4386_v60, 4 }
 0x22b   : > { %1132 = vst [vmem:[#allocation4 + $0x1c8] sm:$0xff] %v1087_v23  ;;  %1434 = vrot.lane.b32.xlu1 %v4228_v30, %s3750_s25 }
 0x22d   : > { %v1260_v24 = vpop.permute.xlu1 %1259 }
 0x22e   : > { %v1293_v39 = vsel %vm1283_vm10, %v1260_v24, %v1262_v2  ;;  %1424 = vrot.lane.b32.xlu2 %v4165_v51, %s3750_s25 }
 0x22f   : > { %1426 = vrot.lane.b32.xlu0 %v4154_v43, %s3750_s25  ;;  %1338 = vst [vmem:[#allocation4 + $0x260] sm:$0xff] %v1293_v39 }
 0x230   : > { %v1062_v19 = vpop.permute.xlu2 %1061 }
 0x231   : > { %v894_v33 = vpop.permute.xlu0 %893 }
 0x232   : > { %v924_v27 = vsel %vm913_vm9, %v892_v16, %v894_v33 }
 0x233   : > { %970 = vst [vmem:[#allocation4 + $0x108] sm:$0xff] %v924_v27  ;;  %1440 = vrot.lane.b32.xlu1 %v1371_v31, %s3750_s25 }
 0x235   : > { %v1060_v41 = vpop.permute.xlu1 %1059 }
 0x236   : > { %v1088_v42 = vsel %vm546_vm1, %v1058_v46, %v1060_v41  ;;  %1134 = vst.msk [vmem:[#allocation4 + $0x1d8] sm:$0xff] %vm750_vm14, %v1060_v41  ;;  %1430 = vrot.lane.b32.xlu2 %v4109_v11, %s3750_s25  ;;  %v4452_v41 = vld [vmem:[#allocation3 + $0x58] sm:$0xff] }
 0x237   : > { %1432 = vrot.lane.b32.xlu0 %v4199_v12, %s3750_s25  ;;  %1133 = vst [vmem:[#allocation4 + $0x1d0] sm:$0xff] %v1088_v42 }
 0x238   : > { %v898_v43 = vpop.permute.xlu2 %897 }
 0x239   : > { %v1264_v51 = vpop.permute.xlu0 %1263 }
 0x23a   : > { %v1294_v47 = vsel %vm1283_vm10, %v1262_v2, %v1264_v51 }
 0x23b   : > { %1339 = vst [vmem:[#allocation4 + $0x268] sm:$0xff] %v1294_v47  ;;  %1604 = vrot.lane.b32.xlu1 %v4373_v45, %s3752_s21 }
 0x23d   : > { %v896_v53 = vpop.permute.xlu1 %895 }
 0x23e   : > { %v925_v56 = vsel %vm913_vm9, %v894_v33, %v896_v53  ;;  %972 = vst.msk [vmem:[#allocation4 + $0x118] sm:$0xff] %vm750_vm14, %v896_v53  ;;  %1436 = vrot.lane.b32.xlu2 %v4269_v62, %s3750_s25  ;;  %v4447_v33 = vld [vmem:[#allocation3 + $0x78] sm:$0xff] }
 0x23f   : > { %1438 = vrot.lane.b32.xlu0 %v1370_v55, %s3750_s25  ;;  %971 = vst [vmem:[#allocation4 + $0x110] sm:$0xff] %v925_v56 }
 0x240   : > { %v1268_v32 = vpop.permute.xlu2 %1267 }
 0x241   : > { %v1064_v12 = vpop.permute.xlu0 %1063 }
 0x242   : > { %v1089_v28 = vsel %vm546_vm1, %v1062_v19, %v1064_v12 }
 0x243   : > { %1610 = vrot.lane.b32.xlu1 %v4009_v10, %s3752_s21  ;;  %2891 = vmatpush.msra.mxu0 %v1089_v28 }
 0x245   : > { %v1266_v57 = vpop.permute.xlu1 %1265  ;;  %2892 = vmatpush.msra.mxu0 %v1086_v9  ;;  %v1569_v9 = vsel %vm245_vm2, %v4394_v1, %v4051_v37 }
 0x246   : > { %v1295_v6 = vsel %vm1283_vm10, %v1264_v51, %v1266_v57  ;;  %1341 = vst.msk [vmem:[#allocation4 + $0x278] sm:$0xff] %vm750_vm14, %v1266_v57  ;;  %1442 = vrot.lane.b32.xlu2 %v1372_v59, %s3750_s25  ;;  %v1533_v59 = vld [vmem:[#allocation3 + $0xa8] sm:$0xf] }
 0x247   : > { %1444 = vrot.lane.b32.xlu0 %v1373_v61, %s3750_s25  ;;  %1340 = vst [vmem:[#allocation4 + $0x270] sm:$0xff] %v1295_v6  ;;  %2893 = vmatpush.msra.mxu0 %v4308_v15  ;;  %v4409_v15 = vrot.slane %v4397_v3, 4  ;;  %s3761_s25 = smov 108  }
 0x248   : > { %v1068_v7 = vpop.permute.xlu2 %1067 }
 0x249   : > { %v900_v8 = vpop.permute.xlu0 %899  ;;  %1138 = vst.msk [vmem:[#allocation4 + $0x1f8] sm:$0xff] %vm750_vm14, %v1068_v7  ;;  %2894 = vmatpush.msra.mxu0 %v4247_v50  ;;  %v1567_v46 = vsel %vm245_vm2, %v4409_v15, %v4024_v18 }
 0x24a   : > { %v4401_v58 = vsel %vm913_vm9, %v898_v43, %v900_v8 }
 0x24b   : > { %1616 = vrot.lane.b32.xlu1 %v1569_v9, %s3752_s21  ;;  %2895 = vmatpush.msra.mxu0 %v4140_v35  ;;  %v4419_v35 = vrot.slane %v3991_v63, 4  ;;  %v4435_v63 = vld [vmem:[#allocation3 + $0x38] sm:$0xff] }
 0x24c   : > { %v4440_v19 = vrot.slane %v4435_v63, 4 }
 0x24d   : > { %v1066_v16 = vpop.permute.xlu1 %1065  ;;  %v4426_v2 = vsel %vm245_vm2, %v4373_v45, %v4419_v35  ;;  %v1573_v42 = vsel %vm245_vm2, %v4419_v35, %v4070_v48 }
 0x24e   : > { %v1090_v13 = vsel %vm546_vm1, %v1064_v12, %v1066_v16  ;;  %v1091_v20 = vsel %vm546_vm1, %v1066_v16, %v1068_v7  ;;  %1606 = vrot.lane.b32.xlu2 %v4409_v15, %s3752_s21  ;;  %v1571_v31 = vsel %vm245_vm2, %v4009_v10, %v4440_v19  ;;  %v4465_v10 = vrot.slane %v4452_v41, 4 }
 0x24f   : > { %1608 = vrot.lane.b32.xlu0 %v4394_v1, %s3752_s21  ;;  %1136 = vst [vmem:[#allocation4 + $0x1e8] sm:$0xff] %v1090_v13 }
 0x250   : > { %1137 = vst [vmem:[#allocation4 + $0x1f0] sm:$0xff] %v1091_v20  ;;  %v904_v37 = vpop.permute.xlu2 %903  ;;  %v4473_v56 = vsel %vm245_vm2, %v4440_v19, %v4465_v10 }
 0x251   : > { %v1070_v50 = vpop.permute.xlu0 %1069  ;;  %976 = vst.msk [vmem:[#allocation4 + $0x138] sm:$0xff] %vm750_vm14, %v904_v37 }
 0x253   : > { %1622 = vrot.lane.b32.xlu1 %v4100_v4, %s3752_s21 }
 0x255   : > { %v902_v26 = vpop.permute.xlu1 %901 }
 0x256   : > { %v927_v23 = vsel %vm913_vm9, %v900_v8, %v902_v26  ;;  %v928_v24 = vsel %vm913_vm9, %v902_v26, %v904_v37  ;;  %1612 = vrot.lane.b32.xlu2 %v4426_v2, %s3752_s21 }
 0x257   : > { %1614 = vrot.lane.b32.xlu0 %v1567_v46, %s3752_s21  ;;  %974 = vst [vmem:[#allocation4 + $0x128] sm:$0xff] %v927_v23  ;;  %v1534_v46 = vld [vmem:[#allocation3 + $0xb0] sm:$0xf]  ;;  %v1535_v23 = vld [vmem:[#allocation3 + $0xb8] sm:$0xf] }
 0x258   : > { %975 = vst [vmem:[#allocation4 + $0x130] sm:$0xff] %v928_v24  ;;  %v1274_v4 = vpop.permute.xlu2 %1273  ;;  %v4524_v24 = vld [vmem:[#allocation4 + $0x40] sm:$0xff] }
 0x259   : > { %v1270_v39 = vpop.permute.xlu0 %1269  ;;  %1345 = vst.msk [vmem:[#allocation4 + $0x298] sm:$0xff] %vm750_vm14, %v1274_v4 }
 0x25a   : > { %v4443_v18 = vsel %vm1283_vm10, %v1268_v32, %v1270_v39 }
 0x25b   : > { %1628 = vrot.lane.b32.xlu1 %v4150_v40, %s3752_s21  ;;  %v1586_v40 = vrot.slane %v4447_v33, 4 }
 0x25d   : > { %v1272_v27 = vpop.permute.xlu1 %1271  ;;  %v1587_v48 = vsel %vm245_vm2, %v4465_v10, %v1586_v40 }
 0x25e   : > { %v4458_v43 = vsel %vm1283_vm10, %v1270_v39, %v1272_v27  ;;  %v1298_v51 = vsel %vm1283_vm10, %v1272_v27, %v1274_v4  ;;  %1618 = vrot.lane.b32.xlu2 %v1571_v31, %s3752_s21  ;;  %v1600_v39 = vrot.slane %v1534_v46, 4  ;;  %v4527_v27 = vld [vmem:[#allocation4 + $0x20] sm:$0xff]  ;;  %v4532_v31 = vld [vmem:[#allocation3 + $0x18] sm:$0xff] }
 0x25f   : > { %1620 = vrot.lane.b32.xlu0 %v1573_v42, %s3752_s21  ;;  %1344 = vst [vmem:[#allocation4 + $0x290] sm:$0xff] %v1298_v51  ;;  %v1602_v42 = vrot.slane %v1535_v23, 4 }
 0x260   : > { %v1074_v47 = vpop.permute.xlu2 %1073 }
 0x261   : > { %v906_v53 = vpop.permute.xlu0 %905 }
 0x263   : > { %1634 = vrot.lane.b32.xlu1 %v1587_v48, %s3752_s21 }
 0x265   : > { %v1072_v55 = vpop.permute.xlu1 %1071 }
 0x266   : > { %v1092_v32 = vsel %vm546_vm1, %v1070_v50, %v1072_v55  ;;  %v1093_v12 = vsel %vm546_vm1, %v1072_v55, %v1074_v47  ;;  %1624 = vrot.lane.b32.xlu2 %v4137_v34, %s3752_s21  ;;  %v1598_v34 = vrot.slane %v1533_v59, 4  ;;  %v4511_v50 = vld [vmem:[#allocation4] sm:$0xff] }
 0x267   : > { %1626 = vrot.lane.b32.xlu0 %v4473_v56, %s3752_s21  ;;  %1139 = vst [vmem:[#allocation4 + $0x200] sm:$0xf] %v1092_v32 }
 0x268   : > { %1140 = vst [vmem:[#allocation4 + $0x208] sm:$0xf] %v1093_v12  ;;  %v910_v28 = vpop.permute.xlu2 %909  ;;  %v1599_v16 = vsel %vm245_vm2, %v4211_v17, %v1598_v34  ;;  %v1532_v17 = vld [vmem:[#allocation3 + $0xa0] sm:$0xf] }
 0x269   : > { %v1276_v57 = vpop.permute.xlu0 %1275  ;;  %v1596_v37 = vrot.slane %v1532_v17, 4 }
 0x26b   : > { %1640 = vrot.lane.b32.xlu1 %v4253_v36, %s3752_s21 }
 0x26d   : > { %v908_v61 = vpop.permute.xlu1 %907 }
 0x26e   : > { %v929_v6 = vsel %vm913_vm9, %v906_v53, %v908_v61  ;;  %v930_v7 = vsel %vm913_vm9, %v908_v61, %v910_v28  ;;  %1630 = vrot.lane.b32.xlu2 %v4184_v0, %s3752_s21  ;;  %v4567_v61 = vld [vmem:[#allocation3 + $0x48] sm:$0xff] }
 0x26f   : > { %1632 = vrot.lane.b32.xlu0 %v4170_v52, %s3752_s21  ;;  %2896 = vmatpush.msra.mxu0 %v929_v6  ;;  %978 = vst [vmem:[#allocation4 + $0x148] sm:$0xff] %v930_v7  ;;  %v4571_v7 = vld [vmem:[#allocation3 + $0x28] sm:$0xff] }
 0x270   : > { %v1280_v8 = vpop.permute.xlu2 %1279 }
 0x271   : > { %v1076_v9 = vpop.permute.xlu0 %1075  ;;  %2897 = vmatpush.msra.mxu0 %v4401_v58 }
 0x272   : > { %v1094_v36 = vsel %vm546_vm1, %v1074_v47, %v1076_v9  ;;  %1142 = vst.msk [vmem:[#allocation4 + $0x218] sm:$0xf] %vm771_vm8, %v1076_v9  ;;  %v1603_v47 = vsel %vm245_vm2, %v4280_v14, %v1602_v42  ;;  %vm2555_vm1 = vcmask 965632  }
 0x273   : > { %1141 = vst [vmem:[#allocation4 + $0x210] sm:$0xf] %v1094_v36  ;;  %1646 = vrot.lane.b32.xlu1 %v1599_v16, %s3752_s21  ;;  %2898 = vmatpush.msra.mxu0 %v4350_v22  ;;  %v2646_v22 = vld [vmem:[#allocation4 + $0xa0] sm:$0xff] }
 0x275   : > { %v1278_v0 = vpop.permute.xlu1 %1277  ;;  %2899 = vmatpush.msra.mxu0 %v4320_v5 }
 0x276   : > { %v4498_v52 = vsel %vm1283_vm10, %v1276_v57, %v1278_v0  ;;  %v4501_v58 = vsel %vm1283_vm10, %v1278_v0, %v1280_v8  ;;  %1636 = vrot.lane.b32.xlu2 %v4236_v38, %s3752_s21  ;;  %v1595_v38 = vsel %vm245_vm2, %v1586_v40, %v4280_v14  ;;  %v1601_v40 = vsel %vm245_vm2, %v4243_v44, %v1600_v39  ;;  %v4553_v44 = vld [vmem:[#allocation3 + $0x30] sm:$0xff]  ;;  %v4622_v39 = vld [vmem:[#allocation3 + $0x88] sm:$0xff] }
 0x277   : > { %1638 = vrot.lane.b32.xlu0 %v4216_v21, %s3752_s21  ;;  %2900 = vmatpush.msra.mxu0 %v4265_v49  ;;  %v1597_v49 = vsel %vm245_vm2, %v4225_v25, %v1596_v37 }
 0x278   : > { %v1413_v13 = vpop.permute.xlu2 %1412 }
 0x279   : > { %v912_v20 = vpop.permute.xlu0 %911  ;;  %1495 = vst.msk [vmem:[#allocation4 + $0x2f8] sm:$0xff] %vm750_vm14, %v1413_v13  ;;  %2901 = vmatpush.msra.mxu0 %v2646_v22  ;;  %v4594_v22 = vld [vmem:[#allocation3 + $0x50] sm:$0xff] }
 0x27a   : > { %v931_v5 = vsel %vm913_vm9, %v910_v28, %v912_v20  ;;  %980 = vst.msk [vmem:[#allocation4 + $0x158] sm:$0xff] %vm750_vm14, %v912_v20  ;;  %vm3248_vm9 = vcmask 1048448  }
 0x27b   : > { %979 = vst [vmem:[#allocation4 + $0x150] sm:$0xff] %v931_v5  ;;  %1767 = vrot.lane.b32.xlu1 %v4511_v50, %s3753_s28  ;;  %2902 = vmatpush.msra.mxu0 %v4109_v11 }
 0x27d   : > { %v1411_v21 = vpop.permute.xlu1 %1410  ;;  %2903 = vmatpush.msra.mxu0 %v4079_v54 }
 0x27e   : > { %v1451_v26 = vsel %vm711_vm7, %v1411_v21, %v1413_v13  ;;  %1642 = vrot.lane.b32.xlu2 %v1595_v38, %s3752_s21  ;;  %v4609_v38 = vld [vmem:[#allocation3 + $0x68] sm:$0xff] }
 0x27f   : > { %1644 = vrot.lane.b32.xlu0 %v1597_v49, %s3752_s21  ;;  %1494 = vst [vmem:[#allocation4 + $0x2f0] sm:$0xff] %v1451_v26  ;;  %2904 = vmatpush.msra.mxu0 %v4524_v24  ;;  %v4611_v49 = vld [vmem:[#allocation3 + $0x70] sm:$0xff] }
 0x280   : > { %v1419_v11 = vpop.permute.xlu2 %1418 }
 0x281   : > { %v1282_v4 = vpop.permute.xlu0 %1281  ;;  %2905 = vmatpush.msra.mxu0 %v4527_v27 }
 0x282   : > { %v1301_v25 = vsel %vm1283_vm10, %v1280_v8, %v1282_v4  ;;  %1349 = vst.msk [vmem:[#allocation4 + $0x2b8] sm:$0xff] %vm750_vm14, %v1282_v4  ;;  %v4620_v4 = vld [vmem:[#allocation3 + $0x80] sm:$0xff] }
 0x283   : > { %1348 = vst [vmem:[#allocation4 + $0x2b0] sm:$0xff] %v1301_v25  ;;  %1773 = vrot.lane.b32.xlu1 %v4532_v31, %s3753_s28  ;;  %2906 = vmatpush.msra.mxu0 %v4511_v50 }
 0x285   : > { %v1417_v51 = vpop.permute.xlu1 %1416 }
 0x286   : > { %v4542_v53 = vsel %vm711_vm7, %v1417_v51, %v1419_v11  ;;  %1648 = vrot.lane.b32.xlu2 %v1601_v40, %s3752_s21 }
 0x287   : > { %1650 = vrot.lane.b32.xlu0 %v1603_v47, %s3752_s21  ;;  %v1739_v47 = vld [vmem:[#allocation3 + $0xa0] sm:$0xf]  ;;  %s3763_s21 = smov 18  }
 0x288   : > { %v1425_v48 = vpop.permute.xlu2 %1424 }
 0x289   : > { %v1409_v55 = vpop.permute.xlu0 %1408 }
 0x28a   : > { %v4548_v32 = vsel %vm711_vm7, %v4207_v29, %v1409_v55  ;;  %v4551_v12 = vsel %vm711_vm7, %v1409_v55, %v1411_v21 }
 0x28b   : > { %1779 = vrot.lane.b32.xlu1 %v4553_v44, %s3753_s28 }
 0x28d   : > { %v1423_v14 = vpop.permute.xlu1 %1422 }
 0x28e   : > { %v4558_v28 = vsel %vm711_vm7, %v1423_v14, %v1425_v48  ;;  %1769 = vrot.lane.b32.xlu2 %v4397_v3, %s3753_s28 }
 0x28f   : > { %1771 = vrot.lane.b32.xlu0 %v4386_v60, %s3753_s28 }
 0x290   : > { %v1431_v29 = vpop.permute.xlu2 %1430 }
 0x291   : > { %v1415_v57 = vpop.permute.xlu0 %1414 }
 0x292   : > { %v4565_v59 = vsel %vm711_vm7, %v1415_v57, %v1417_v51 }
 0x293   : > { %1785 = vrot.lane.b32.xlu1 %v4567_v61, %s3753_s28 }
 0x295   : > { %v1429_v6 = vpop.permute.xlu1 %1428 }
 0x296   : > { %1503 = vst.msk [vmem:[#allocation4 + $0x338] sm:$0xff] %vm750_vm14, %v1429_v6  ;;  %1775 = vrot.lane.b32.xlu2 %v4527_v27, %s3753_s28 }
 0x297   : > { %1777 = vrot.lane.b32.xlu0 %v4571_v7, %s3753_s28 }
 0x298   : > { %v1437_v60 = vpop.permute.xlu2 %1436 }
 0x299   : > { %v1421_v34 = vpop.permute.xlu0 %1420  ;;  %1507 = vst.msk [vmem:[#allocation4 + $0x358] sm:$0xff] %vm750_vm14, %v1437_v60 }
 0x29a   : > { %v1454_v8 = vsel %vm711_vm7, %v1419_v11, %v1421_v34  ;;  %1499 = vst.msk [vmem:[#allocation4 + $0x318] sm:$0xff] %vm750_vm14, %v1421_v34  ;;  %v1742_v34 = vld [vmem:[#allocation3 + $0xb8] sm:$0xf] }
 0x29b   : > { %1498 = vst [vmem:[#allocation4 + $0x310] sm:$0xff] %v1454_v8  ;;  %1791 = vrot.lane.b32.xlu1 %v4079_v54, %s3753_s28  ;;  %v1938_v8 = vrot.slane %v4553_v44, 4 }
 0x29d   : > { %v1435_v9 = vpop.permute.xlu1 %1434 }
 0x29e   : > { %v1460_v36 = vsel %vm711_vm7, %v1435_v9, %v1437_v60  ;;  %1781 = vrot.lane.b32.xlu2 %v4435_v63, %s3753_s28  ;;  %v1741_v60 = vld [vmem:[#allocation3 + $0xb0] sm:$0xf] }
 0x29f   : > { %1783 = vrot.lane.b32.xlu0 %v4524_v24, %s3753_s28  ;;  %1506 = vst [vmem:[#allocation4 + $0x350] sm:$0xff] %v1460_v36 }
 0x2a0   : > { %v1443_v16 = vpop.permute.xlu2 %1442 }
 0x2a1   : > { %v1427_v0 = vpop.permute.xlu0 %1426 }
 0x2a2   : > { %v4589_v17 = vsel %vm711_vm7, %v1425_v48, %v1427_v0  ;;  %v1457_v13 = vsel %vm711_vm7, %v1427_v0, %v1429_v6  ;;  %v1939_v0 = vsel %vm245_vm2, %v4394_v1, %v1938_v8 }
 0x2a3   : > { %1797 = vrot.lane.b32.xlu1 %v4447_v33, %s3753_s28  ;;  %1502 = vst [vmem:[#allocation4 + $0x330] sm:$0xff] %v1457_v13 }
 0x2a5   : > { %v1441_v54 = vpop.permute.xlu1 %1440 }
 0x2a6   : > { %v1462_v63 = vsel %vm711_vm7, %v1441_v54, %v1443_v16  ;;  %1787 = vrot.lane.b32.xlu2 %v4594_v22, %s3753_s28 }
 0x2a7   : > { %1789 = vrot.lane.b32.xlu0 %v4452_v41, %s3753_s28  ;;  %1509 = vst [vmem:[#allocation4 + $0x368] sm:$0xf] %v1462_v63  ;;  %v1944_v63 = vrot.slane %v4567_v61, 4 }
 0x2a8   : > { %v1607_v20 = vpop.permute.xlu2 %1606 }
 0x2a9   : > { %v1433_v5 = vpop.permute.xlu0 %1432 }
 0x2aa   : > { %v4602_v37 = vsel %vm711_vm7, %v1431_v29, %v1433_v5  ;;  %v4605_v33 = vsel %vm711_vm7, %v1433_v5, %v1435_v9  ;;  %v1933_v29 = vrot.slane %v4532_v31, 4  ;;  %v4664_v5 = vrot.slane %v4571_v7, 4 }
 0x2ab   : > { %1803 = vrot.lane.b32.xlu1 %v4228_v30, %s3753_s28  ;;  %v1740_v30 = vld [vmem:[#allocation3 + $0xa8] sm:$0xf] }
 0x2ad   : > { %v1605_v21 = vpop.permute.xlu1 %1604 }
 0x2ae   : > { %v1653_v41 = vsel %vm1652_vm12, %v1605_v21, %v1607_v20  ;;  %1793 = vrot.lane.b32.xlu2 %v4609_v38, %s3753_s28 }
 0x2af   : > { %1795 = vrot.lane.b32.xlu0 %v4611_v49, %s3753_s28  ;;  %1695 = vst [vmem:[#allocation4 + $0x360] sm:$0xf0] %v1653_v41 }
 0x2b0   : > { %v1613_v26 = vpop.permute.xlu2 %1612 }
 0x2b1   : > { %v1439_v46 = vpop.permute.xlu0 %1438 }
 0x2b2   : > { %v1461_v23 = vsel %vm711_vm7, %v1439_v46, %v1441_v54 }
 0x2b3   : > { %1508 = vst [vmem:[#allocation4 + $0x360] sm:$0xf] %v1461_v23  ;;  %1809 = vrot.lane.b32.xlu1 %v1740_v30, %s3753_s28  ;;  %v1937_v23 = vsel %vm245_vm2, %v4409_v15, %v4664_v5 }
 0x2b5   : > { %v1611_v11 = vpop.permute.xlu1 %1610 }
 0x2b6   : > { %1698 = vst.msk [vmem:[#allocation4 + $0x378] sm:$0xf0] %vm959_vm11, %v1611_v11  ;;  %1799 = vrot.lane.b32.xlu2 %v4620_v4, %s3753_s28 }
 0x2b7   : > { %1801 = vrot.lane.b32.xlu0 %v4622_v39, %s3753_s28 }
 0x2b8   : > { %v1619_v25 = vpop.permute.xlu2 %1618 }
 0x2b9   : > { %v1445_v42 = vpop.permute.xlu0 %1444  ;;  %1702 = vst.msk [vmem:[#allocation4 + $0x398] sm:$0xff] %vm750_vm14, %v1619_v25 }
 0x2ba   : > { %v1463_v51 = vsel %vm711_vm7, %v1443_v16, %v1445_v42  ;;  %1511 = vst.msk [vmem:[#allocation4 + $0x378] sm:$0xf] %vm771_vm8, %v1445_v42  ;;  %vm3238_vm7 = vcmask 786048  }
 0x2bb   : > { %1510 = vst [vmem:[#allocation4 + $0x370] sm:$0xf] %v1463_v51  ;;  %1974 = vrot.lane.b32.xlu1 %v4373_v45, %s3754_s4 }
 0x2bd   : > { %v1617_v40 = vpop.permute.xlu1 %1616 }
 0x2be   : > { %v1658_v48 = vsel %vm1652_vm12, %v1617_v40, %v1619_v25  ;;  %1805 = vrot.lane.b32.xlu2 %v4269_v62, %s3753_s28  ;;  %v4684_v25 = vrot.slane %v4524_v24, 4 }
 0x2bf   : > { %1807 = vrot.lane.b32.xlu0 %v1739_v47, %s3753_s28  ;;  %1701 = vst [vmem:[#allocation4 + $0x390] sm:$0xff] %v1658_v48 }
 0x2c0   : > { %v1625_v55 = vpop.permute.xlu2 %1624  ;;  %v1943_v47 = vsel %vm245_vm2, %v4419_v35, %v4684_v25 }
 0x2c1   : > { %v1609_v14 = vpop.permute.xlu0 %1608 }
 0x2c2   : > { %v1654_v57 = vsel %vm1652_vm12, %v1607_v20, %v1609_v14  ;;  %v1655_v6 = vsel %vm1652_vm12, %v1609_v14, %v1611_v11 }
 0x2c3   : > { %1696 = vst [vmem:[#allocation4 + $0x368] sm:$0xf0] %v1654_v57  ;;  %1980 = vrot.lane.b32.xlu1 %v1933_v29, %s3754_s4  ;;  %v1946_v57 = vrot.slane %v4594_v22, 4 }
 0x2c4   : > { %1697 = vst [vmem:[#allocation4 + $0x370] sm:$0xf0] %v1655_v6 }
 0x2c5   : > { %v1623_v45 = vpop.permute.xlu1 %1622 }
 0x2c6   : > { %v4643_v62 = vsel %vm1652_vm12, %v1623_v45, %v1625_v55  ;;  %1811 = vrot.lane.b32.xlu2 %v1741_v60, %s3753_s28 }
 0x2c7   : > { %1813 = vrot.lane.b32.xlu0 %v1742_v34, %s3753_s28  ;;  %s3764_s28 = smov 28  }
 0x2c8   : > { %v1631_v31 = vpop.permute.xlu2 %1630 }
 0x2c9   : > { %v1615_v9 = vpop.permute.xlu0 %1614 }
 0x2ca   : > { %v4649_v36 = vsel %vm1652_vm12, %v1613_v26, %v1615_v9  ;;  %v4652_v16 = vsel %vm1652_vm12, %v1615_v9, %v1617_v40  ;;  %v4669_v26 = vsel %vm245_vm2, %v4664_v5, %v1944_v63  ;;  %v1941_v40 = vsel %vm245_vm2, %v1933_v29, %v4440_v19 }
 0x2cb   : > { %1986 = vrot.lane.b32.xlu1 %v1939_v0, %s3754_s4  ;;  %v1947_v19 = vsel %vm245_vm2, %v1938_v8, %v1946_v57 }
 0x2cd   : > { %v1629_v13 = vpop.permute.xlu1 %1628 }
 0x2ce   : > { %v1662_v54 = vsel %vm1652_vm12, %v1629_v13, %v1631_v31  ;;  %1976 = vrot.lane.b32.xlu2 %v4409_v15, %s3754_s4 }
 0x2cf   : > { %1978 = vrot.lane.b32.xlu0 %v4394_v1, %s3754_s4  ;;  %v4679_v1 = vld [vmem:[#allocation4 + $0x60] sm:$0xff] }
 0x2d0   : > { %v1637_v20 = vpop.permute.xlu2 %1636  ;;  %v1950_v30 = vrot.slane %v4679_v1, 4 }
 0x2d1   : > { %v1621_v21 = vpop.permute.xlu0 %1620 }
 0x2d2   : > { %v1659_v41 = vsel %vm1652_vm12, %v1621_v21, %v1623_v45  ;;  %v2735_v21 = vld [vmem:[#allocation4 + $0x368] sm:$0xff] }
 0x2d3   : > { %1992 = vrot.lane.b32.xlu1 %v4669_v26, %s3754_s4 }
 0x2d5   : > { %v1635_v46 = vpop.permute.xlu1 %1634 }
 0x2d6   : > { %1710 = vst.msk [vmem:[#allocation4 + $0x3d8] sm:$0xff] %vm750_vm14, %v1635_v46  ;;  %1982 = vrot.lane.b32.xlu2 %v4426_v2, %s3754_s4  ;;  %v4693_v2 = vsel %vm245_vm2, %v4684_v25, %v1950_v30 }
 0x2d7   : > { %1984 = vrot.lane.b32.xlu0 %v1937_v23, %s3754_s4 }
 0x2d8   : > { %v1643_v11 = vpop.permute.xlu2 %1642 }
 0x2d9   : > { %v1627_v42 = vpop.permute.xlu0 %1626  ;;  %1714 = vst.msk [vmem:[#allocation4 + $0x3f8] sm:$0xff] %vm750_vm14, %v1643_v11 }
 0x2da   : > { %v1661_v15 = vsel %vm1652_vm12, %v1625_v55, %v1627_v42  ;;  %1706 = vst.msk [vmem:[#allocation4 + $0x3b8] sm:$0xff] %vm750_vm14, %v1627_v42 }
 0x2db   : > { %1705 = vst [vmem:[#allocation4 + $0x3b0] sm:$0xff] %v1661_v15  ;;  %1998 = vrot.lane.b32.xlu1 %v4693_v2, %s3754_s4 }
 0x2dd   : > { %v1641_v51 = vpop.permute.xlu1 %1640 }
 0x2de   : > { %v1667_v48 = vsel %vm1652_vm12, %v1641_v51, %v1643_v11  ;;  %1988 = vrot.lane.b32.xlu2 %v1941_v40, %s3754_s4 }
 0x2df   : > { %1990 = vrot.lane.b32.xlu0 %v1943_v47, %s3754_s4  ;;  %1713 = vst [vmem:[#allocation4 + $0x3f0] sm:$0xff] %v1667_v48  ;;  %v2699_v48 = vld [vmem:[#allocation4 + $0x248] sm:$0xff] }
 0x2e0   : > { %v1649_v55 = vpop.permute.xlu2 %1648 }
 0x2e1   : > { %v1633_v14 = vpop.permute.xlu0 %1632 }
 0x2e2   : > { %v1663_v6 = vsel %vm1652_vm12, %v1631_v31, %v1633_v14  ;;  %v1664_v45 = vsel %vm1652_vm12, %v1633_v14, %v1635_v46  ;;  %v1952_v31 = vrot.slane %v4609_v38, 4  ;;  %v2694_v14 = vld [vmem:[#allocation4 + $0x220] sm:$0xff] }
 0x2e3   : > { %2163 = vrot.lane.b32.xlu1 %v4609_v38, %s3755_s7  ;;  %1709 = vst [vmem:[#allocation4 + $0x3d0] sm:$0xff] %v1664_v45 }
 0x2e5   : > { %v1647_v35 = vpop.permute.xlu1 %1646 }
 0x2e6   : > { %v1669_v29 = vsel %vm1652_vm12, %v1647_v35, %v1649_v55  ;;  %1994 = vrot.lane.b32.xlu2 %v1947_v19, %s3754_s4 }
 0x2e7   : > { %1996 = vrot.lane.b32.xlu0 %v4473_v56, %s3754_s4  ;;  %1716 = vst [vmem:[#allocation4 + $0x408] sm:$0xff] %v1669_v29  ;;  %v4727_v56 = vsel %vm245_vm2, %v1944_v63, %v1952_v31  ;;  %v2734_v63 = vld [vmem:[#allocation4 + $0x360] sm:$0xff]  ;;  %v2691_v29 = vld [vmem:[#allocation4 + $0x208] sm:$0xff] }
 0x2e8   : > { %v4717_v60 = vpop.permute.xlu2 %1769 }
 0x2e9   : > { %v1639_v34 = vpop.permute.xlu0 %1638 }
 0x2ea   : > { %v1665_v9 = vsel %vm1652_vm12, %v1637_v20, %v1639_v34  ;;  %v1666_v0 = vsel %vm1652_vm12, %v1639_v34, %v1641_v51  ;;  %v2698_v51 = vld [vmem:[#allocation4 + $0x240] sm:$0xff] }
 0x2eb   : > { %2145 = vrot.lane.b32.xlu1 %v4527_v27, %s3755_s7  ;;  %2911 = vmatpush.msra.mxu1 %v1665_v9  ;;  %v2480_v9 = vld [vmem:[#allocation3 + $0xa8] sm:$0xf] }
 0x2ec   : > { %2991 = vmatpush.msrb.mxu0 %v1666_v0 }
 0x2ed   : > { %v1768_v8 = vpop.permute.xlu1 %1767  ;;  %2912 = vmatpush.msra.mxu1 %v1662_v54 }
 0x2ee   : > { %v4731_v13 = vsel %vm1815_vm13, %v1768_v8, %v4717_v60  ;;  %2000 = vrot.lane.b32.xlu2 %v4727_v56, %s3754_s4  ;;  %2992 = vmatpush.msrb.mxu0 %v1663_v6  ;;  %v2695_v6 = vld [vmem:[#allocation4 + $0x228] sm:$0xff] }
 0x2ef   : > { %2161 = vrot.lane.b32.xlu0 %v4679_v1, %s3755_s7  ;;  %2913 = vmatpush.msra.mxu1 %v1659_v41 }
 0x2f0   : > { %v4737_v27 = vpop.permute.xlu2 %1775  ;;  %2993 = vmatpush.msrb.mxu0 %v4643_v62 }
 0x2f1   : > { %v1645_v20 = vpop.permute.xlu0 %1644  ;;  %2914 = vmatpush.msra.mxu1 %v4649_v36  ;;  %v2479_v36 = vld [vmem:[#allocation3 + $0xa0] sm:$0xf] }
 0x2f2   : > { %v4742_v54 = vsel %vm1652_vm12, %v1645_v20, %v1647_v35  ;;  %2994 = vmatpush.msrb.mxu0 %v4652_v16  ;;  %v4768_v16 = vrot.slane %v4622_v39, 4  ;;  %v2690_v35 = vld [vmem:[#allocation4 + $0x200] sm:$0xff] }
 0x2f3   : > { %2139 = vrot.lane.b32.xlu1 %v4397_v3, %s3755_s7  ;;  %2915 = vmatpush.msra.mxu1 %v2734_v63 }
 0x2f4   : > { %2995 = vmatpush.msrb.mxu0 %v2735_v21 }
 0x2f5   : > { %v1774_v41 = vpop.permute.xlu1 %1773  ;;  %2916 = vmatpush.msra.mxu1 %v4602_v37 }
 0x2f6   : > { %1861 = vst.msk [vmem:[#allocation4 + $0x438] sm:$0xff] %vm750_vm14, %v1774_v41  ;;  %2153 = vrot.lane.b32.xlu2 %v4524_v24, %s3755_s7  ;;  %2996 = vmatpush.msrb.mxu0 %v4605_v33  ;;  %v2715_v33 = vld [vmem:[#allocation4 + $0x2c8] sm:$0xff] }
 0x2f7   : > { %2155 = vrot.lane.b32.xlu0 %v4567_v61, %s3755_s7  ;;  %2917 = vmatpush.msra.mxu1 %v4558_v28  ;;  %v2714_v28 = vld [vmem:[#allocation4 + $0x2c0] sm:$0xff] }
 0x2f8   : > { %v1782_v62 = vpop.permute.xlu2 %1781  ;;  %2997 = vmatpush.msrb.mxu0 %v4589_v17 }
 0x2f9   : > { %v1651_v3 = vpop.permute.xlu0 %1650  ;;  %1865 = vst.msk [vmem:[#allocation4 + $0x458] sm:$0xff] %vm750_vm14, %v1782_v62  ;;  %2918 = vmatpush.msra.mxu1 %v4565_v59 }
 0x2fa   : > { %v1670_v37 = vsel %vm1652_vm12, %v1649_v55, %v1651_v3  ;;  %1718 = vst.msk [vmem:[#allocation4 + $0x418] sm:$0xff] %vm750_vm14, %v1651_v3  ;;  %2998 = vmatpush.msrb.mxu0 %v4542_v53  ;;  %v1902_v53 = vld [vmem:[#allocation3 + $0xa0] sm:$0xf]  ;;  %v2481_v3 = vld [vmem:[#allocation3 + $0xb0] sm:$0xf] }
 0x2fb   : > { %1717 = vst [vmem:[#allocation4 + $0x410] sm:$0xff] %v1670_v37  ;;  %2547 = vrot.lane.b32.xlu1 %v2479_v36, %s3756_s27  ;;  %2919 = vmatpush.msra.mxu1 %v4548_v32  ;;  %v1903_v32 = vld [vmem:[#allocation3 + $0xa8] sm:$0xf]  ;;  %v1966_v23 = vrot.slane %v1902_v53, 4 }
 0x2fc   : > { %2999 = vmatpush.msrb.mxu0 %v4551_v12  ;;  %v1968_v15 = vrot.slane %v1903_v32, 4 }
 0x2fd   : > { %v1780_v17 = vpop.permute.xlu1 %1779  ;;  %2920 = vmatpush.msra.mxu1 %v2714_v28 }
 0x2fe   : > { %v1821_v59 = vsel %vm1815_vm13, %v1780_v17, %v1782_v62  ;;  %2147 = vrot.lane.b32.xlu2 %v4571_v7, %s3755_s7  ;;  %3000 = vmatpush.msrb.mxu0 %v2715_v33 }
 0x2ff   : > { %2137 = vrot.lane.b32.xlu0 %v4511_v50, %s3755_s7  ;;  %1864 = vst [vmem:[#allocation4 + $0x450] sm:$0xff] %v1821_v59  ;;  %2921 = vmatpush.msra.mxu1 %v4498_v52  ;;  %v4782_v50 = vsel %vm245_vm2, %v1952_v31, %v4768_v16  ;;  %v2702_v52 = vld [vmem:[#allocation4 + $0x260] sm:$0xff] }
 0x300   : > { %v1788_v12 = vpop.permute.xlu2 %1787  ;;  %3001 = vmatpush.msrb.mxu0 %v4501_v58  ;;  %v2703_v58 = vld [vmem:[#allocation4 + $0x268] sm:$0xff] }
 0x301   : > { %v1772_v46 = vpop.permute.xlu0 %1771  ;;  %2922 = vmatpush.msra.mxu1 %v4443_v18  ;;  %v4788_v18 = vrot.slane %v4620_v4, 4 }
 0x302   : > { %v1817_v11 = vsel %vm1815_vm13, %v4717_v60, %v1772_v46  ;;  %v1818_v42 = vsel %vm1815_vm13, %v1772_v46, %v1774_v41  ;;  %3002 = vmatpush.msrb.mxu0 %v4458_v43  ;;  %v1969_v43 = vsel %vm245_vm2, %v4768_v16, %v1968_v15 }
 0x303   : > { %1859 = vst [vmem:[#allocation4 + $0x428] sm:$0xff] %v1817_v11  ;;  %2008 = vrot.lane.b32.xlu1 %v4782_v50, %s3754_s4  ;;  %2923 = vmatpush.msra.mxu1 %v2702_v52  ;;  %v1967_v47 = vsel %vm245_vm2, %v4788_v18, %v1966_v23  ;;  %v4810_v0 = vsel %vm245_vm2, %v1950_v30, %v4788_v18  ;;  %v1904_v23 = vld [vmem:[#allocation3 + $0xb0] sm:$0xf] }
 0x304   : > { %1860 = vst [vmem:[#allocation4 + $0x430] sm:$0xff] %v1818_v42  ;;  %3003 = vmatpush.msrb.mxu0 %v2703_v58  ;;  %v4858_v11 = vld [vmem:[#allocation3 + $0x90] sm:$0xff]  ;;  %v1970_v15 = vrot.slane %v1904_v23, 4 }
 0x305   : > { %v1786_v40 = vpop.permute.xlu1 %1785  ;;  %2924 = vmatpush.msra.mxu1 %v2698_v51  ;;  %v4868_v58 = vrot.slane %v4858_v11, 4 }
 0x306   : > { %v1823_v55 = vsel %vm1815_vm13, %v1786_v40, %v1788_v12  ;;  %2014 = vrot.lane.b32.xlu2 %v1967_v47, %s3754_s4  ;;  %3004 = vmatpush.msrb.mxu0 %v2699_v48 }
 0x307   : > { %2016 = vrot.lane.b32.xlu0 %v1969_v43, %s3754_s4  ;;  %1867 = vst [vmem:[#allocation4 + $0x468] sm:$0xff] %v1823_v55  ;;  %2925 = vmatpush.msra.mxu1 %v2694_v14  ;;  %v1971_v47 = vsel %vm245_vm2, %v4868_v58, %v1970_v15  ;;  %v4874_v43 = vld [vmem:[#allocation3 + $0x10] sm:$0xff] }
 0x308   : > { %v1794_v45 = vpop.permute.xlu2 %1793  ;;  %3005 = vmatpush.msrb.mxu0 %v2695_v6 }
 0x309   : > { %v1778_v19 = vpop.permute.xlu0 %1777  ;;  %2926 = vmatpush.msra.mxu1 %v2690_v35  ;;  %v4886_v35 = vld [vmem:[#allocation3 + $0x8] sm:$0xff] }
 0x30a   : > { %v4799_v60 = vsel %vm1815_vm13, %v4737_v27, %v1778_v19  ;;  %v4802_v34 = vsel %vm1815_vm13, %v1778_v19, %v1780_v17  ;;  %3006 = vmatpush.msrb.mxu0 %v2691_v29  ;;  %v2272_v29 = vld [vmem:[#allocation3 + $0xa0] sm:$0xf] }
 0x30b   : > { %2165 = vrot.lane.b32.xlu1 %v4611_v49, %s3755_s7 }
 0x30d   : > { %v1792_v31 = vpop.permute.xlu1 %1791 }
 0x30e   : > { %v4813_v8 = vsel %vm1815_vm13, %v1792_v31, %v1794_v45  ;;  %2549 = vrot.lane.b32.xlu2 %v2480_v9, %s3756_s27  ;;  %v2273_v31 = vld [vmem:[#allocation3 + $0xa8] sm:$0xf] }
 0x30f   : > { %2006 = vrot.lane.b32.xlu0 %v4810_v0, %s3754_s4 }
 0x310   : > { %v1800_v27 = vpop.permute.xlu2 %1799 }
 0x311   : > { %v1784_v20 = vpop.permute.xlu0 %1783 }
 0x312   : > { %v4819_v63 = vsel %vm1815_vm13, %v1784_v20, %v1786_v40  ;;  %v2336_v20 = vrot.slane %v2272_v29, 4 }
 0x313   : > { %2157 = vrot.lane.b32.xlu1 %v4594_v22, %s3755_s7 }
 0x315   : > { %v1798_v21 = vpop.permute.xlu1 %1797 }
 0x316   : > { %1873 = vst.msk [vmem:[#allocation4 + $0x498] sm:$0xff] %vm750_vm14, %v1798_v21  ;;  %2539 = vrot.lane.b32.xlu2 %v4620_v4, %s3756_s27 }
 0x317   : > { %2541 = vrot.lane.b32.xlu0 %v4622_v39, %s3756_s27 }
 0x318   : > { %v1806_v30 = vpop.permute.xlu2 %1805 }
 0x319   : > { %v1790_v41 = vpop.permute.xlu0 %1789  ;;  %1877 = vst.msk [vmem:[#allocation4 + $0x4b8] sm:$0xff] %vm750_vm14, %v1806_v30 }
 0x31a   : > { %v1824_v62 = vsel %vm1815_vm13, %v1788_v12, %v1790_v41  ;;  %1869 = vst.msk [vmem:[#allocation4 + $0x478] sm:$0xff] %vm750_vm14, %v1790_v41  ;;  %v2338_v41 = vrot.slane %v2273_v31, 4 }
 0x31b   : > { %1868 = vst [vmem:[#allocation4 + $0x470] sm:$0xff] %v1824_v62  ;;  %2551 = vrot.lane.b32.xlu1 %v2481_v3, %s3756_s27  ;;  %v2337_v3 = vsel %vm245_vm2, %v4788_v18, %v2336_v20 }
 0x31d   : > { %v1804_v37 = vpop.permute.xlu1 %1803 }
 0x31e   : > { %v1830_v36 = vsel %vm1815_vm13, %v1804_v37, %v1806_v30  ;;  %2531 = vrot.lane.b32.xlu2 %v4679_v1, %s3756_s27 }
 0x31f   : > { %2533 = vrot.lane.b32.xlu0 %v4609_v38, %s3756_s27  ;;  %1876 = vst [vmem:[#allocation4 + $0x4b0] sm:$0xff] %v1830_v36 }
 0x320   : > { %v1812_v28 = vpop.permute.xlu2 %1811 }
 0x321   : > { %v1796_v17 = vpop.permute.xlu0 %1795 }
 0x322   : > { %v4838_v33 = vsel %vm1815_vm13, %v1794_v45, %v1796_v17  ;;  %v1827_v59 = vsel %vm1815_vm13, %v1796_v17, %v1798_v21 }
 0x323   : > { %2517 = vrot.lane.b32.xlu1 %v4571_v7, %s3756_s27  ;;  %1872 = vst [vmem:[#allocation4 + $0x490] sm:$0xff] %v1827_v59  ;;  %v4854_v7 = vld [vmem:[#allocation3] sm:$0xff] }
 0x325   : > { %v1810_v53 = vpop.permute.xlu1 %1809 }
 0x326   : > { %v1832_v32 = vsel %vm1815_vm13, %v1810_v53, %v1812_v28  ;;  %2523 = vrot.lane.b32.xlu2 %v4524_v24, %s3756_s27 }
 0x327   : > { %2525 = vrot.lane.b32.xlu0 %v4567_v61, %s3756_s27  ;;  %1879 = vst [vmem:[#allocation4 + $0x4c8] sm:$0xf] %v1832_v32  ;;  %v4860_v61 = vld [vmem:[#allocation3 + $0x20] sm:$0xff] }
 0x328   : > { %v1977_v38 = vpop.permute.xlu2 %1976 }
 0x329   : > { %v1802_v1 = vpop.permute.xlu0 %1801 }
 0x32a   : > { %v4849_v12 = vsel %vm1815_vm13, %v1800_v27, %v1802_v1  ;;  %v4852_v46 = vsel %vm1815_vm13, %v1802_v1, %v1804_v37  ;;  %v2339_v37 = vsel %vm245_vm2, %v4768_v16, %v2338_v41  ;;  %v4917_v16 = vrot.slane %v4611_v49, 4 }
 0x32b   : > { %2507 = vrot.lane.b32.xlu1 %v4854_v7, %s3756_s27 }
 0x32d   : > { %v1975_v24 = vpop.permute.xlu1 %1974 }
 0x32e   : > { %v2023_v42 = vsel %vm2022_vm15, %v1975_v24, %v1977_v38  ;;  %2149 = vrot.lane.b32.xlu2 %v4553_v44, %s3755_s7 }
 0x32f   : > { %2515 = vrot.lane.b32.xlu0 %v4860_v61, %s3756_s27  ;;  %2065 = vst [vmem:[#allocation4 + $0x4c0] sm:$0xf0] %v2023_v42  ;;  %v1955_v42 = vsel %vm245_vm2, %v1946_v57, %v4917_v16  ;;  %v2274_v57 = vld [vmem:[#allocation3 + $0xb0] sm:$0xf] }
 0x330   : > { %v1983_v52 = vpop.permute.xlu2 %1982 }
 0x331   : > { %v1808_v51 = vpop.permute.xlu0 %1807 }
 0x332   : > { %v1831_v40 = vsel %vm1815_vm13, %v1808_v51, %v1810_v53  ;;  %v1963_v53 = vsel %vm245_vm2, %v4917_v16, %v4868_v58 }
 0x333   : > { %1878 = vst [vmem:[#allocation4 + $0x4c0] sm:$0xf] %v1831_v40  ;;  %2018 = vrot.lane.b32.xlu1 %v1971_v47, %s3754_s4  ;;  %v2109_v47 = vld [vmem:[#allocation3 + $0xa0] sm:$0xf] }
 0x335   : > { %v1981_v48 = vpop.permute.xlu1 %1980 }
 0x336   : > { %2068 = vst.msk [vmem:[#allocation4 + $0x4d8] sm:$0xf0] %vm959_vm11, %v1981_v48  ;;  %2543 = vrot.lane.b32.xlu2 %v4858_v11, %s3756_s27 }
 0x337   : > { %2141 = vrot.lane.b32.xlu0 %v4874_v43, %s3755_s7 }
 0x338   : > { %v1989_v55 = vpop.permute.xlu2 %1988 }
 0x339   : > { %v1814_v14 = vpop.permute.xlu0 %1813  ;;  %2072 = vst.msk [vmem:[#allocation4 + $0x4f8] sm:$0xff] %vm750_vm14, %v1989_v55 }
 0x33a   : > { %v1833_v6 = vsel %vm1815_vm13, %v1812_v28, %v1814_v14  ;;  %1881 = vst.msk [vmem:[#allocation4 + $0x4d8] sm:$0xf] %vm771_vm8, %v1814_v14 }
 0x33b   : > { %1880 = vst [vmem:[#allocation4 + $0x4d0] sm:$0xf] %v1833_v6  ;;  %2527 = vrot.lane.b32.xlu1 %v4594_v22, %s3756_s27 }
 0x33d   : > { %v1987_v45 = vpop.permute.xlu1 %1986 }
 0x33e   : > { %v2028_v19 = vsel %vm2022_vm15, %v1987_v45, %v1989_v55  ;;  %2509 = vrot.lane.b32.xlu2 %v4886_v35, %s3756_s27 }
 0x33f   : > { %2535 = vrot.lane.b32.xlu0 %v4611_v49, %s3756_s27  ;;  %2071 = vst [vmem:[#allocation4 + $0x4f0] sm:$0xff] %v2028_v19 }
 0x340   : > { %v1995_v9 = vpop.permute.xlu2 %1994 }
 0x341   : > { %v1979_v27 = vpop.permute.xlu0 %1978 }
 0x342   : > { %v2024_v21 = vsel %vm2022_vm15, %v1977_v38, %v1979_v27  ;;  %v2025_v30 = vsel %vm2022_vm15, %v1979_v27, %v1981_v48  ;;  %v2340_v48 = vrot.slane %v2274_v57, 4 }
 0x343   : > { %2066 = vst [vmem:[#allocation4 + $0x4c8] sm:$0xf0] %v2024_v21  ;;  %2378 = vrot.lane.b32.xlu1 %v4782_v50, %s3757_s9 }
 0x344   : > { %2067 = vst [vmem:[#allocation4 + $0x4d0] sm:$0xf0] %v2025_v30  ;;  %v2341_v14 = vsel %vm245_vm2, %v4868_v58, %v2340_v48 }
 0x345   : > { %v1993_v62 = vpop.permute.xlu1 %1992 }
 0x346   : > { %v4902_v36 = vsel %vm2022_vm15, %v1993_v62, %v1995_v9  ;;  %2384 = vrot.lane.b32.xlu2 %v2337_v3, %s3757_s9 }
 0x347   : > { %2386 = vrot.lane.b32.xlu0 %v2339_v37, %s3757_s9 }
 0x348   : > { %v4906_v28 = vpop.permute.xlu2 %2000 }
 0x349   : > { %v1985_v17 = vpop.permute.xlu0 %1984 }
 0x34a   : > { %v4909_v50 = vsel %vm2022_vm15, %v1983_v52, %v1985_v17  ;;  %v4912_v59 = vsel %vm2022_vm15, %v1985_v17, %v1987_v45  ;;  %v2301_v45 = vrot.slane %v4886_v35, 4 }
 0x34b   : > { %2368 = vrot.lane.b32.xlu1 %v4693_v2, %s3757_s9  ;;  %v2304_v2 = vrot.slane %v4860_v61, 4  ;;  %v2300_v61 = vrot.slane %v4854_v7, 4 }
 0x34c   : > { %v2307_v58 = vsel %vm245_vm2, %v2301_v45, %v4664_v5  ;;  %v2110_v5 = vld [vmem:[#allocation3 + $0xa8] sm:$0xf] }
 0x34d   : > { %v1999_v18 = vpop.permute.xlu1 %1998  ;;  %v2313_v23 = vsel %vm245_vm2, %v2304_v2, %v4684_v25  ;;  %v2305_v52 = vsel %vm245_vm2, %v2300_v61, %v2304_v2 }
 0x34e   : > { %v4924_v32 = vsel %vm2022_vm15, %v1999_v18, %v4906_v28  ;;  %2010 = vrot.lane.b32.xlu2 %v1963_v53, %s3754_s4 }
 0x34f   : > { %2376 = vrot.lane.b32.xlu0 %v4810_v0, %s3757_s9 }
 0x350   : > { %v2154_v38 = vpop.permute.xlu2 %2153 }
 0x351   : > { %v1991_v1 = vpop.permute.xlu0 %1990 }
 0x352   : > { %v4931_v49 = vsel %vm2022_vm15, %v1991_v1, %v1993_v62  ;;  %v2111_v62 = vld [vmem:[#allocation3 + $0xb0] sm:$0xf]  ;;  %v2104_v1 = vld [vmem:[#allocation3 + $0x78] sm:$0xff] }
 0x353   : > { %2360 = vrot.lane.b32.xlu1 %v2313_v23, %s3757_s9  ;;  %v5008_v23 = vld [vmem:[#allocation4 + $0x30] sm:$0xff] }
 0x355   : > { %v4936_v24 = vpop.permute.xlu1 %2163 }
 0x356   : > { %2519 = vrot.lane.b32.xlu2 %v4553_v44, %s3756_s27 }
 0x357   : > { %2002 = vrot.lane.b32.xlu0 %v1955_v42, %s3754_s4 }
 0x358   : > { %v4945_v0 = vpop.permute.xlu2 %2147 }
 0x359   : > { %v1997_v15 = vpop.permute.xlu0 %1996 }
 0x35a   : > { %v2031_v25 = vsel %vm2022_vm15, %v1995_v9, %v1997_v15  ;;  %2076 = vst.msk [vmem:[#allocation4 + $0x518] sm:$0xff] %vm750_vm14, %v1997_v15 }
 0x35b   : > { %2075 = vst [vmem:[#allocation4 + $0x510] sm:$0xff] %v2031_v25  ;;  %2352 = vrot.lane.b32.xlu1 %v2305_v52, %s3757_s9 }
 0x35d   : > { %v2146_v22 = vpop.permute.xlu1 %2145 }
 0x35e   : > { %v2189_v44 = vsel %vm2185_vm0, %v2146_v22, %v4945_v0  ;;  %2370 = vrot.lane.b32.xlu2 %v4727_v56, %s3757_s9  ;;  %v5030_v22 = vld [vmem:[#allocation3 + $0x98] sm:$0xff] }
 0x35f   : > { %2511 = vrot.lane.b32.xlu0 %v4874_v43, %s3756_s27 }
 0x360   : > { %v2015_v7 = vpop.permute.xlu2 %2014 }
 0x361   : > { %v2162_v51 = vpop.permute.xlu0 %2161 }
 0x362   : > { %v2195_v40 = vsel %vm2185_vm0, %v2162_v51, %v4936_v24  ;;  %v5053_v51 = vld [vmem:[#allocation3 + $0x18] sm:$0xff] }
 0x363   : > { %2177 = vrot.lane.b32.xlu1 %v2109_v47, %s3755_s7  ;;  %2931 = vmatpush.msra.mxu2 %v2195_v40  ;;  %v5059_v40 = vld [vmem:[#allocation3 + $0x58] sm:$0xff] }
 0x365   : > { %v4961_v55 = vpop.permute.xlu1 %2139 }
 0x366   : > { %2362 = vrot.lane.b32.xlu2 %v4669_v26, %s3757_s9 }
 0x367   : > { %2388 = vrot.lane.b32.xlu0 %v2341_v14, %s3757_s9  ;;  %v5069_v14 = vld [vmem:[#allocation3 + $0x38] sm:$0xff] }
 0x368   : > { %v4968_v56 = vpop.permute.xlu2 %2549 }
 0x369   : > { %v2156_v6 = vpop.permute.xlu0 %2155 }
 0x36a   : > { %v2192_v19 = vsel %vm2185_vm0, %v2154_v38, %v2156_v6 }
 0x36b   : > { %2346 = vrot.lane.b32.xlu1 %v2301_v45, %s3757_s9  ;;  %2932 = vmatpush.msra.mxu2 %v2192_v19 }
 0x36d   : > { %v2548_v29 = vpop.permute.xlu1 %2547  ;;  %2933 = vmatpush.msra.mxu2 %v2189_v44  ;;  %v2778_v44 = vld [vmem:[#allocation4 + $0x4c0] sm:$0xff] }
 0x36e   : > { %v2571_v26 = vsel %vm2555_vm1, %v2548_v29, %v4968_v56  ;;  %2354 = vrot.lane.b32.xlu2 %v2307_v58, %s3757_s9 }
 0x36f   : > { %2380 = vrot.lane.b32.xlu0 %v1963_v53, %s3757_s9  ;;  %2618 = vst [vmem:[#allocation4 + $0x780] sm:$0xf] %v2571_v26 }
 0x370   : > { %v2540_v35 = vpop.permute.xlu2 %2539 }
 0x371   : > { %v2138_v31 = vpop.permute.xlu0 %2137 }
 0x372   : > { %v2186_v9 = vsel %vm2185_vm0, %v2138_v31, %v4961_v55 }
 0x373   : > { %2171 = vrot.lane.b32.xlu1 %v4622_v39, %s3755_s7  ;;  %2934 = vmatpush.msra.mxu2 %v2186_v9  ;;  %v4993_v39 = vld [vmem:[#allocation4 + $0x50] sm:$0xff] }
 0x374   : > { %v2316_v3 = vrot.slane %v4993_v39, 4 }
 0x375   : > { %v4983_v27 = vpop.permute.xlu1 %2008 }
 0x376   : > { %2179 = vrot.lane.b32.xlu2 %v2110_v5, %s3755_s7  ;;  %v2866_v20 = vld [vmem:[#allocation4 + $0x780] sm:$0xf]  ;;  %v2325_v17 = vsel %vm245_vm2, %v2316_v3, %v4917_v16  ;;  %v2308_v16 = vrot.slane %v5008_v23, 4 }
 0x377   : > { %2344 = vrot.lane.b32.xlu0 %v2300_v61, %s3757_s9  ;;  %3424 = vmatpush.msk.msra.mxu3 %vm245_vm2, %v2866_v20  ;;  %v2318_v20 = vrot.slane %v5059_v40, 4 }
 0x378   : > { %v2532_v21 = vpop.permute.xlu2 %2531 }
 0x379   : > { %v4988_v30 = vpop.permute.xlu0 %2016 }
 0x37a   : > { %v2038_v41 = vsel %vm2022_vm15, %v2015_v7, %v4988_v30 }
 0x37b   : > { %2181 = vrot.lane.b32.xlu1 %v2111_v62, %s3755_s7  ;;  %2935 = vmatpush.msra.mxu2 %v2038_v41 }
 0x37d   : > { %v4996_v37 = vpop.permute.xlu1 %2165 }
 0x37e   : > { %v2196_v18 = vsel %vm2185_vm0, %v4936_v24, %v4996_v37  ;;  %2372 = vrot.lane.b32.xlu2 %v2325_v17, %s3757_s9  ;;  %v2302_v24 = vrot.slane %v4874_v43, 4 }
 0x37f   : > { %2169 = vrot.lane.b32.xlu0 %v4620_v4, %s3755_s7  ;;  %3011 = vmatpush.msrb.mxu1 %v2196_v18  ;;  %v2317_v4 = vsel %vm245_vm2, %v2308_v16, %v2316_v3 }
 0x380   : > { %v2524_v53 = vpop.permute.xlu2 %2523  ;;  %v2309_v61 = vsel %vm245_vm2, %v2302_v24, %v2308_v16  ;;  %v2112_v16 = vld [vmem:[#allocation3 + $0xb8] sm:$0xf] }
 0x381   : > { %v2007_v38 = vpop.permute.xlu0 %2006 }
 0x382   : > { %v2035_v2 = vsel %vm2022_vm15, %v2007_v38, %v4983_v27 }
 0x383   : > { %2167 = vrot.lane.b32.xlu1 %v2104_v1, %s3755_s7  ;;  %2936 = vmatpush.msra.mxu2 %v2035_v2 }
 0x385   : > { %v5013_v42 = vpop.permute.xlu1 %2157  ;;  %2937 = vmatpush.msra.mxu2 %v4924_v32 }
 0x386   : > { %v2193_v15 = vsel %vm2185_vm0, %v2156_v6, %v5013_v42  ;;  %2364 = vrot.lane.b32.xlu2 %v2317_v4, %s3757_s9  ;;  %v1905_v6 = vld [vmem:[#allocation3 + $0xb8] sm:$0xf] }
 0x387   : > { %2356 = vrot.lane.b32.xlu0 %v2309_v61, %s3757_s9  ;;  %2938 = vmatpush.msra.mxu2 %v4931_v49  ;;  %v1972_v26 = vrot.slane %v1905_v6, 4 }
 0x388   : > { %v5023_v25 = vpop.permute.xlu2 %2149  ;;  %3012 = vmatpush.msrb.mxu1 %v2193_v15 }
 0x389   : > { %v2542_v43 = vpop.permute.xlu0 %2541  ;;  %v2190_v52 = vsel %vm2185_vm0, %v4945_v0, %v5023_v25  ;;  %2939 = vmatpush.msra.mxu2 %v4909_v50 }
 0x38a   : > { %v2568_v32 = vsel %vm2555_vm1, %v2540_v35, %v2542_v43  ;;  %3013 = vmatpush.msrb.mxu1 %v2190_v52  ;;  %v1964_v35 = vrot.slane %v5030_v22, 4  ;;  %v2310_v52 = vrot.slane %v5069_v14, 4 }
 0x38b   : > { %2545 = vrot.lane.b32.xlu1 %v5030_v22, %s3756_s27  ;;  %2940 = vmatpush.msra.mxu2 %v2778_v44 }
 0x38c   : > { %2955 = vmatpush.msra.mxu3 %v2568_v32  ;;  %v1973_v9 = vsel %vm245_vm2, %v1964_v35, %v1972_v26  ;;  %v2303_v32 = vrot.slane %v5053_v51, 4 }
 0x38d   : > { %v5034_v49 = vpop.permute.xlu1 %2551  ;;  %2941 = vmatpush.msra.mxu2 %v4849_v12 }
 0x38e   : > { %v2572_v0 = vsel %vm2555_vm1, %v4968_v56, %v5034_v49  ;;  %2348 = vrot.lane.b32.xlu2 %v2302_v24, %s3757_s9 }
 0x38f   : > { %2173 = vrot.lane.b32.xlu0 %v4858_v11, %s3755_s7  ;;  %2619 = vst [vmem:[#allocation4 + $0x788] sm:$0xf] %v2572_v0  ;;  %2942 = vmatpush.msra.mxu2 %v4813_v8  ;;  %v2482_v11 = vld [vmem:[#allocation3 + $0xb8] sm:$0xf]  ;;  %v2319_v0 = vsel %vm245_vm2, %v2310_v52, %v2318_v20 }
 0x390   : > { %v5044_v50 = vpop.permute.xlu2 %2543 }
 0x391   : > { %v5046_v57 = vpop.permute.xlu0 %2533  ;;  %v2569_v7 = vsel %vm2555_vm1, %v2542_v43, %v5044_v50  ;;  %2943 = vmatpush.msra.mxu2 %v4819_v63 }
 0x392   : > { %v2565_v12 = vsel %vm2555_vm1, %v2532_v21, %v5046_v57 }
 0x393   : > { %2143 = vrot.lane.b32.xlu1 %v5053_v51, %s3755_s7  ;;  %2944 = vmatpush.msra.mxu2 %v4799_v60 }
 0x394   : > { %2956 = vmatpush.msra.mxu3 %v2565_v12 }
 0x395   : > { %v2518_v8 = vpop.permute.xlu1 %2517  ;;  %2945 = vmatpush.msra.mxu2 %v4731_v13 }
 0x396   : > { %2553 = vrot.lane.b32.xlu2 %v2482_v11, %s3756_s27  ;;  %v2867_v63 = vld [vmem:[#allocation4 + $0x788] sm:$0xf] }
 0x397   : > { %2159 = vrot.lane.b32.xlu0 %v5059_v40, %s3755_s7  ;;  %2946 = vmatpush.msra.mxu2 %v4742_v54  ;;  %v1956_v54 = vrot.slane %v2104_v1, 4 }
 0x398   : > { %v5065_v47 = vpop.permute.xlu2 %2509 }
 0x399   : > { %3426 = vmatpush.msk.msrb.mxu2 %vm245_vm2, %v2867_v63  ;;  %v2526_v60 = vpop.permute.xlu0 %2525  ;;  %v1957_v58 = vsel %vm245_vm2, %v4465_v10, %v1956_v54  ;;  %v1965_v17 = vsel %vm245_vm2, %v1956_v54, %v1964_v35 }
 0x39a   : > { %v2562_v48 = vsel %vm2555_vm1, %v2524_v53, %v2526_v60 }
 0x39b   : > { %3035 = vmatpush.msrb.mxu2 %v2569_v7  ;;  %2521 = vrot.lane.b32.xlu1 %v5069_v14, %s3756_s27 }
 0x39c   : > { %2957 = vmatpush.msra.mxu3 %v2562_v48 }
 0x39d   : > { %v2508_v13 = vpop.permute.xlu1 %2507 }
 0x39e   : > { %v2556_v56 = vsel %vm2555_vm1, %v2508_v13, %v5065_v47  ;;  %2151 = vrot.lane.b32.xlu2 %v5069_v14, %s3755_s7 }
 0x39f   : > { %2537 = vrot.lane.b32.xlu0 %v2104_v1, %s3756_s27 }
 0x3a0   : > { %v2385_v45 = vpop.permute.xlu2 %2384 }
 0x3a1   : > { %v2516_v19 = vpop.permute.xlu0 %2515 }
 0x3a2   : > { %v2559_v29 = vsel %vm2555_vm1, %v2516_v19, %v2518_v8 }
 0x3a3   : > { %2004 = vrot.lane.b32.xlu1 %v1957_v58, %s3754_s4  ;;  %2958 = vmatpush.msra.mxu3 %v2559_v29  ;;  %v2755_v58 = vld [vmem:[#allocation4 + $0x408] sm:$0xff] }
 0x3a5   : > { %v5083_v31 = vpop.permute.xlu1 %2018  ;;  %2959 = vmatpush.msra.mxu3 %v2556_v56  ;;  %v2779_v56 = vld [vmem:[#allocation4 + $0x4c8] sm:$0xff] }
 0x3a6   : > { %v2039_v5 = vsel %vm2022_vm15, %v4988_v30, %v5083_v31  ;;  %2529 = vrot.lane.b32.xlu2 %v5059_v40, %s3756_s27  ;;  %v2327_v30 = vsel %vm245_vm2, %v2318_v20, %v1956_v54  ;;  %v5182_v20 = vld [vmem:[#allocation8] sm:$0xff] }
 0x3a7   : > { %2020 = vrot.lane.b32.xlu0 %v1973_v9, %s3754_s4  ;;  %2907 = vmatmul.f32.vlgmr.msra.gmra.mxu0 %v5182_v20 }
 0x3a8   : > { %v5092_v10 = vpop.permute.xlu2 %2010 }
 0x3a9   : > { %v5095_v21 = vpop.permute.xlu0 %2141  ;;  %v2036_v41 = vsel %vm2022_vm15, %v4983_v27, %v5092_v10  ;;  %v2275_v27 = vld [vmem:[#allocation3 + $0xb8] sm:$0xf] }
 0x3aa   : > { %v2187_v62 = vsel %vm2185_vm0, %v4961_v55, %v5095_v21  ;;  %v2342_v2 = vrot.slane %v2275_v27, 4  ;;  %v5192_v27 = vld [vmem:[#allocation8 + $0x10] sm:$0xff] }
 0x3ab   : > { %2374 = vrot.lane.b32.xlu1 %v2327_v30, %s3757_s9  ;;  %3014 = vmatpush.msrb.mxu1 %v2187_v62 }
 0x3ac   : > { %v2343_v4 = vsel %vm245_vm2, %v1964_v35, %v2342_v2  ;;  %2947 = vmatmul.f32.vlgmr.msra.gmra.mxu2 %v5192_v27 }
 0x3ad   : > { %v5105_v3 = vpop.permute.xlu1 %2527  ;;  %3015 = vmatpush.msrb.mxu1 %v2039_v5 }
 0x3ae   : > { %v2563_v18 = vsel %vm2555_vm1, %v2526_v60, %v5105_v3  ;;  %2012 = vrot.lane.b32.xlu2 %v1965_v17, %s3754_s4  ;;  %s3765_s4 = smov 68  }
 0x3af   : > { %2513 = vrot.lane.b32.xlu0 %v5053_v51, %s3756_s27  ;;  %3016 = vmatpush.msrb.mxu1 %v2036_v41 }
 0x3b0   : > { %v5113_v55 = vpop.permute.xlu2 %2519 }
 0x3b1   : > { %v5115_v53 = vpop.permute.xlu0 %2535  ;;  %v2560_v38 = vsel %vm2555_vm1, %v2518_v8, %v5113_v55 }
 0x3b2   : > { %v2566_v1 = vsel %vm2555_vm1, %v5046_v57, %v5115_v53  ;;  %v2311_v57 = vsel %vm245_vm2, %v2303_v32, %v2310_v52  ;;  %v2687_v52 = vld [vmem:[#allocation4 + $0x1e8] sm:$0xff] }
 0x3b3   : > { %2183 = vrot.lane.b32.xlu1 %v2112_v16, %s3755_s7  ;;  %3036 = vmatpush.msrb.mxu2 %v2566_v1 }
 0x3b5   : > { %v5123_v24 = vpop.permute.xlu1 %2378  ;;  %3037 = vmatpush.msrb.mxu2 %v2563_v18 }
 0x3b6   : > { %2390 = vrot.lane.b32.xlu2 %v2343_v4, %s3757_s9 }
 0x3b7   : > { %2382 = vrot.lane.b32.xlu0 %v1965_v17, %s3757_s9  ;;  %3038 = vmatpush.msrb.mxu2 %v2560_v38 }
 0x3b8   : > { %v2371_v61 = vpop.permute.xlu2 %2370 }
 0x3b9   : > { %v2387_v15 = vpop.permute.xlu0 %2386 }
 0x3ba   : > { %v2408_v43 = vsel %vm2392_vm4, %v2385_v45, %v2387_v15  ;;  %v2767_v45 = vld [vmem:[#allocation4 + $0x468] sm:$0xff] }
 0x3bb   : > { %2960 = vmatpush.msra.mxu3 %v2408_v43 }
 0x3bd   : > { %v2369_v44 = vpop.permute.xlu1 %2368 }
 0x3be   : > { %v2402_v7 = vsel %vm2392_vm4, %v2369_v44, %v2371_v61  ;;  %2366 = vrot.lane.b32.xlu2 %v2319_v0, %s3757_s9 }
 0x3bf   : > { %2358 = vrot.lane.b32.xlu0 %v2311_v57, %s3757_s9 }
 0x3c0   : > { %v2363_v12 = vpop.permute.xlu2 %2362 }
 0x3c1   : > { %v2377_v8 = vpop.permute.xlu0 %2376 }
 0x3c2   : > { %v2405_v11 = vsel %vm2392_vm4, %v2377_v8, %v5123_v24  ;;  %v2675_v8 = vld [vmem:[#allocation4 + $0x188] sm:$0xff] }
 0x3c3   : > { %2961 = vmatpush.msra.mxu3 %v2405_v11 }
 0x3c5   : > { %v2361_v40 = vpop.permute.xlu1 %2360  ;;  %2962 = vmatpush.msra.mxu3 %v2402_v7 }
 0x3c6   : > { %v2399_v51 = vsel %vm2392_vm4, %v2361_v40, %v2363_v12  ;;  %2350 = vrot.lane.b32.xlu2 %v2303_v32, %s3757_s9  ;;  %s3769_s9 = smov 58  }
 0x3c7   : > { %2175 = vrot.lane.b32.xlu0 %v5030_v22, %s3755_s7  ;;  %2963 = vmatpush.msra.mxu3 %v2399_v51  ;;  %v2671_v51 = vld [vmem:[#allocation4 + $0x168] sm:$0xff]  ;;  %s3767_s7 = smov 88  }
 0x3c8   : > { %v5142_v63 = vpop.permute.xlu2 %2354 }
 0x3c9   : > { %v5144_v60 = vpop.permute.xlu0 %2002 }
 0x3ca   : > { %v2033_v48 = vsel %vm2022_vm15, %v4906_v28, %v5144_v60 }
 0x3cb   : > { %3017 = vmatpush.msrb.mxu1 %v2033_v48  ;;  %v3758_v48 = vmov 0  }
 0x3cc   : > { %3559 = vset.pattern.permute.xlu1 %v3758_v48  ;;  %3560 = vset.pattern.permute.xlu0 %v3758_v48  ;;  %v2740_v48 = vld [vmem:[#allocation4 + $0x390] sm:$0xff] }
 0x3cd   : > { %v2353_v14 = vpop.permute.xlu1 %2352  ;;  %3018 = vmatpush.msrb.mxu1 %v4902_v36 }
 0x3ce   : > { %v2396_v13 = vsel %vm2392_vm4, %v2353_v14, %v5142_v63 }
 0x3cf   : > { %3019 = vmatpush.msrb.mxu1 %v4912_v59  ;;  %2964 = vmatpush.msra.mxu3 %v2396_v13 }
 0x3d0   : > { %v2180_v22 = vpop.permute.xlu2 %2179 }
 0x3d1   : > { %v5153_v54 = vpop.permute.xlu0 %2511  ;;  %3020 = vmatpush.msrb.mxu1 %v2779_v56 }
 0x3d2   : > { %v2557_v6 = vsel %vm2555_vm1, %v5065_v47, %v5153_v54  ;;  %v2759_v47 = vld [vmem:[#allocation4 + $0x428] sm:$0xff] }
 0x3d3   : > { %3021 = vmatpush.msrb.mxu1 %v4852_v46  ;;  %3039 = vmatpush.msrb.mxu2 %v2557_v6  ;;  %v2663_v6 = vld [vmem:[#allocation4 + $0x128] sm:$0xff] }
 0x3d5   : > { %v2178_v28 = vpop.permute.xlu1 %2177  ;;  %3022 = vmatpush.msrb.mxu1 %v4838_v33  ;;  %v5170_v33 = vld [vmem:[#allocation8 + $0x8] sm:$0xff] }
 0x3d6   : > { %v2201_v36 = vsel %vm2185_vm0, %v2178_v28, %v2180_v22  ;;  %2927 = vmatmul.f32.vlgmr.msra.gmra.mxu1 %v5170_v33  ;;  %3007 = vmatmul.f32.vlgmr.msrb.gmra.mxu0 %v5170_v33  ;;  %v2659_v28 = vld [vmem:[#allocation4 + $0x108] sm:$0xff] }
 0x3d7   : > { %2248 = vst [vmem:[#allocation4 + $0x620] sm:$0xf] %v2201_v36  ;;  %3023 = vmatpush.msrb.mxu1 %v2767_v45  ;;  %v2688_v36 = vld [vmem:[#allocation4 + $0x1f0] sm:$0xff] }
 0x3d8   : > { %v5161_v59 = vpop.permute.xlu2 %2372 }
 0x3d9   : > { %v5163_v19 = vpop.permute.xlu0 %2388  ;;  %v2403_v29 = vsel %vm2392_vm4, %v2371_v61, %v5161_v59  ;;  %3024 = vmatpush.msrb.mxu1 %v4802_v34 }
 0x3da   : > { %v2409_v46 = vsel %vm2392_vm4, %v2387_v15, %v5163_v19  ;;  %v5206_v15 = vld [vmem:[#allocation8 + $0x18] sm:$0xff] }
 0x3db   : > { %3025 = vmatpush.msrb.mxu1 %v2759_v47  ;;  %3040 = vmatpush.msrb.mxu2 %v2409_v46  ;;  %v2684_v46 = vld [vmem:[#allocation4 + $0x1d0] sm:$0xff]  ;;  %v2651_v47 = vld [vmem:[#allocation4 + $0xc8] sm:$0xff] }
 0x3dd   : > { %v2347_v26 = vpop.permute.xlu1 %2346  ;;  %3026 = vmatpush.msrb.mxu1 %v2755_v58  ;;  %v2680_v58 = vld [vmem:[#allocation4 + $0x1b0] sm:$0xff] }
 0x3de   : > { %3027 = vmatmul.f32.vlgmr.msrb.gmra.mxu1 %v5192_v27 }
 0x3e0   : > { %v5173_v35 = vpop.permute.xlu2 %2364 }
 0x3e1   : > { %v5175_v9 = vpop.permute.xlu0 %2380  ;;  %v2400_v34 = vsel %vm2392_vm4, %v2363_v12, %v5173_v35 }
 0x3e2   : > { %v2406_v5 = vsel %vm2392_vm4, %v5123_v24, %v5175_v9 }
 0x3e3   : > { %3041 = vmatpush.msrb.mxu2 %v2406_v5 }
 0x3e5   : > { %v5185_v41 = vpop.permute.xlu1 %2171  ;;  %3042 = vmatpush.msrb.mxu2 %v2403_v29  ;;  %v2655_v29 = vld [vmem:[#allocation4 + $0xe8] sm:$0xff] }
 0x3e7   : > { %3043 = vmatpush.msrb.mxu2 %v2400_v34 }
 0x3e8   : > { %v5187_v62 = vpop.permute.xlu2 %2348 }
 0x3e9   : > { %v2345_v30 = vpop.permute.xlu0 %2344  ;;  %v2394_v17 = vsel %vm2392_vm4, %v2347_v26, %v5187_v62 }
 0x3ea   : > { %v2393_v18 = vsel %vm2392_vm4, %v2345_v30, %v2347_v26  ;;  %2436 = vst [vmem:[#allocation4 + $0x628] sm:$0xf0] %v2394_v17  ;;  %v2676_v30 = vld [vmem:[#allocation4 + $0x190] sm:$0xff] }
 0x3eb   : > { %2435 = vst [vmem:[#allocation4 + $0x620] sm:$0xf0] %v2393_v18  ;;  %v2672_v17 = vld [vmem:[#allocation4 + $0x170] sm:$0xff]  ;;  %v3567_v18 = vld [vmem:[#allocation4 + $0x88] sm:$0xff] }
 0x3ed   : > { %v5195_v38 = vpop.permute.xlu1 %2181 }
 0x3ee   : > { %v2202_v2 = vsel %vm2185_vm0, %v2180_v22, %v5195_v38 }
 0x3ef   : > { %2249 = vst [vmem:[#allocation4 + $0x628] sm:$0xf] %v2202_v2 }
 0x3f0   : > { %v2554_v1 = vpop.permute.xlu2 %2553 }
 0x3f1   : > { %v2170_v16 = vpop.permute.xlu0 %2169  ;;  %v2573_v24 = vsel %vm2555_vm1, %v5034_v49, %v2554_v1  ;;  %2621 = vst.msk [vmem:[#allocation4 + $0x798] sm:$0xf] %vm771_vm8, %v2554_v1  ;;  %v2683_v49 = vld [vmem:[#allocation4 + $0x1c8] sm:$0xff] }
 0x3f2   : > { %v2198_v4 = vsel %vm2185_vm0, %v2170_v16, %v5185_v41  ;;  %2620 = vst [vmem:[#allocation4 + $0x790] sm:$0xf] %v2573_v24  ;;  %v2822_v61 = vld [vmem:[#allocation4 + $0x620] sm:$0xff]  ;;  %v3568_v16 = vld [vmem:[#allocation4 + $0x68] sm:$0xff] }
 0x3f3   : > { %2965 = vmatpush.msra.mxu3 %v2822_v61 }
 0x3f5   : > { %v2168_v43 = vpop.permute.xlu1 %2167  ;;  %2966 = vmatpush.msra.mxu3 %v2198_v4  ;;  %v3569_v4 = vld [vmem:[#allocation4 + $0x48] sm:$0xff] }
 0x3f6   : > { %v2197_v32 = vsel %vm2185_vm0, %v4996_v37, %v2168_v43  ;;  %2243 = vst.msk [vmem:[#allocation4 + $0x5f8] sm:$0xff] %vm750_vm14, %v2168_v43  ;;  %3425 = vmatmul.msk.f32.vlgmr.msra.gmra.mxu3 %vm577_vm3, %v5206_v15  ;;  %v2679_v37 = vld [vmem:[#allocation4 + $0x1a8] sm:$0xff] }
 0x3f7   : > { %2971 = vmatpush.msrb.mxu3 %v2687_v52  ;;  %3091 = vmatpush.msra.mxu0 %v2197_v32  ;;  %v2823_v11 = vld [vmem:[#allocation4 + $0x628] sm:$0xff]  ;;  %v2660_v52 = vld [vmem:[#allocation4 + $0x110] sm:$0xff] }
 0x3f8   : > { %v2152_v44 = vpop.permute.xlu2 %2151  ;;  %v3570_v32 = vld [vmem:[#allocation4 + $0x28] sm:$0xff] }
 0x3f9   : > { %2972 = vmatpush.msrb.mxu3 %v2683_v49  ;;  %v5213_v0 = vpop.permute.xlu0 %2356  ;;  %v5217_v57 = vsel %vm2185_vm0, %v5023_v25, %v2152_v44  ;;  %2235 = vst.msk [vmem:[#allocation4 + $0x5b8] sm:$0xff] %vm750_vm14, %v2152_v44  ;;  %v2868_v7 = vld [vmem:[#allocation4 + $0x790] sm:$0xf]  ;;  %v2870_v25 = vld [vmem:[%s5383_s2] sm:$0xff]  ;;  %v3571_v44 = vld [vmem:[#allocation4 + $0x8] sm:$0xff] }
 0x3fa   : > { %v2397_v12 = vsel %vm2392_vm4, %v5142_v63, %v5213_v0  ;;  %3428 = vmatpush.msk.msra.mxu1 %vm245_vm2, %v2868_v7  ;;  %2873 = vperm.xlu1 %3559, %v2870_v25   ;;  %v2667_v63 = vld [vmem:[#allocation4 + $0x148] sm:$0xff]  ;;  %v2656_v49 = vld [vmem:[#allocation4 + $0xf0] sm:$0xff] }
 0x3fb   : > { %2973 = vmatpush.msrb.mxu3 %v2679_v37  ;;  %3044 = vmatpush.msrb.mxu2 %v2397_v12  ;;  %v2652_v7 = vld [vmem:[#allocation4 + $0xd0] sm:$0xff] }
 0x3fc   : > { %v2748_v37 = vld [vmem:[#allocation4 + $0x3d0] sm:$0xff] }
 0x3fd   : > { %2974 = vmatpush.msrb.mxu3 %v2675_v8  ;;  %v2546_v40 = vpop.permute.xlu1 %2545  ;;  %3045 = vmatpush.msrb.mxu2 %v2823_v11  ;;  %v2648_v12 = vld [vmem:[#allocation4 + $0xb0] sm:$0xff] }
 0x3fe   : > { %v2570_v14 = vsel %vm2555_vm1, %v5044_v50, %v2546_v40  ;;  %2617 = vst.msk [vmem:[#allocation4 + $0x778] sm:$0xff] %vm750_vm14, %v2546_v40  ;;  %v2744_v40 = vld [vmem:[#allocation4 + $0x3b0] sm:$0xff] }
 0x3ff   : > { %2975 = vmatpush.msrb.mxu3 %v2671_v51  ;;  %3115 = vmatpush.msra.mxu1 %v2570_v14  ;;  %v3572_v51 = vld [vmem:[#allocation4 + $0x90] sm:$0xff] }
 0x400   : > { %v2530_v13 = vpop.permute.xlu2 %2529  ;;  %v3573_v14 = vld [vmem:[#allocation4 + $0x70] sm:$0xff] }
 0x401   : > { %2976 = vmatpush.msrb.mxu3 %v2667_v63  ;;  %v5230_v22 = vpop.permute.xlu0 %2173  ;;  %v5234_v56 = vsel %vm2555_vm1, %v5105_v3, %v2530_v13  ;;  %2609 = vst.msk [vmem:[#allocation4 + $0x738] sm:$0xff] %vm750_vm14, %v2530_v13  ;;  %v2736_v13 = vld [vmem:[#allocation4 + $0x370] sm:$0xff] }
 0x402   : > { %v2199_v50 = vsel %vm2185_vm0, %v5185_v41, %v5230_v22  ;;  %v2647_v41 = vld [vmem:[#allocation4 + $0xa8] sm:$0xff] }
 0x403   : > { %2977 = vmatpush.msrb.mxu3 %v2663_v6  ;;  %3046 = vmatpush.msrb.mxu2 %v2199_v50  ;;  %v2788_v6 = vld [vmem:[#allocation4 + $0x510] sm:$0xff] }
 0x404   : > { %3427 = vmatmul.msk.f32.vlgmr.msrb.gmra.mxu2 %vm577_vm3, %v5206_v15 }
 0x405   : > { %2978 = vmatpush.msrb.mxu3 %v2659_v28  ;;  %3051 = vmatpush.msra.mxu2 %v2688_v36  ;;  %v2144_v45 = vpop.permute.xlu1 %2143 }
 0x406   : > { %v2188_v3 = vsel %vm2185_vm0, %v5095_v21, %v2144_v45  ;;  %2231 = vst.msk [vmem:[#allocation4 + $0x598] sm:$0xff] %vm750_vm14, %v2144_v45  ;;  %v2784_v45 = vld [vmem:[#allocation4 + $0x4f0] sm:$0xff] }
 0x407   : > { %2979 = vmatpush.msrb.mxu3 %v2655_v29  ;;  %3052 = vmatpush.msra.mxu2 %v2684_v46  ;;  %v2724_v29 = vld [vmem:[#allocation4 + $0x310] sm:$0xff] }
 0x408   : > { %v2013_v26 = vpop.permute.xlu2 %2012 }
 0x409   : > { %2980 = vmatpush.msrb.mxu3 %v2651_v47  ;;  %3053 = vmatpush.msra.mxu2 %v2680_v58  ;;  %v2160_v34 = vpop.permute.xlu0 %2159  ;;  %v5247_v5 = vsel %vm2022_vm15, %v5092_v10, %v2013_v26  ;;  %2084 = vst.msk [vmem:[#allocation4 + $0x558] sm:$0xff] %vm750_vm14, %v2013_v26  ;;  %v2668_v10 = vld [vmem:[#allocation4 + $0x150] sm:$0xff] }
 0x40a   : > { %v2194_v21 = vsel %vm2185_vm0, %v5013_v42, %v2160_v34  ;;  %2239 = vst.msk [vmem:[#allocation4 + $0x5d8] sm:$0xff] %vm750_vm14, %v2160_v34  ;;  %v2664_v42 = vld [vmem:[#allocation4 + $0x130] sm:$0xff]  ;;  %v2745_v34 = vld [vmem:[#allocation4 + $0x3b8] sm:$0xff] }
 0x40b   : > { %2981 = vmatpush.msrb.mxu3 %v2647_v41  ;;  %3054 = vmatpush.msra.mxu2 %v2676_v30  ;;  %v2776_v58 = vld [vmem:[#allocation4 + $0x4b0] sm:$0xff] }
 0x40c   : > { %3092 = vmatpush.msra.mxu0 %v2194_v21  ;;  %v2716_v26 = vld [vmem:[#allocation4 + $0x2d0] sm:$0xff]  ;;  %v2741_v21 = vld [vmem:[#allocation4 + $0x398] sm:$0xff] }
 0x40d   : > { %2982 = vmatpush.msrb.mxu3 %v3567_v18  ;;  %3055 = vmatpush.msra.mxu2 %v2672_v17  ;;  %v2522_v2 = vpop.permute.xlu1 %2521  ;;  %v2712_v30 = vld [vmem:[#allocation4 + $0x2b0] sm:$0xff] }
 0x40e   : > { %3093 = vmatpush.msra.mxu0 %v5217_v57  ;;  %v2561_v1 = vsel %vm2555_vm1, %v5113_v55, %v2522_v2  ;;  %2605 = vst.msk [vmem:[#allocation4 + $0x718] sm:$0xff] %vm750_vm14, %v2522_v2  ;;  %v2768_v17 = vld [vmem:[#allocation4 + $0x470] sm:$0xff]  ;;  %v2737_v2 = vld [vmem:[#allocation4 + $0x378] sm:$0xff] }
 0x40f   : > { %2983 = vmatpush.msrb.mxu3 %v3568_v16  ;;  %3056 = vmatpush.msra.mxu2 %v2668_v10  ;;  %v2708_v18 = vld [vmem:[#allocation4 + $0x290] sm:$0xff]  ;;  %v2733_v16 = vld [vmem:[#allocation4 + $0x358] sm:$0xff] }
 0x410   : > { %3094 = vmatpush.msra.mxu0 %v2188_v3  ;;  %v2391_v24 = vpop.permute.xlu2 %2390  ;;  %v2720_v3 = vld [vmem:[#allocation4 + $0x2f0] sm:$0xff] }
 0x411   : > { %2984 = vmatpush.msrb.mxu3 %v3569_v4  ;;  %3057 = vmatpush.msra.mxu2 %v2664_v42  ;;  %v2538_v61 = vpop.permute.xlu0 %2537  ;;  %v5259_v43 = vsel %vm2392_vm4, %v5163_v19, %v2391_v24  ;;  %2458 = vst.msk [vmem:[#allocation4 + $0x6d8] sm:$0xff] %vm750_vm14, %v2391_v24  ;;  %v2752_v19 = vld [vmem:[#allocation4 + $0x3f0] sm:$0xff]  ;;  %v2729_v24 = vld [vmem:[#allocation4 + $0x338] sm:$0xff] }
 0x412   : > { %v2567_v55 = vsel %vm2555_vm1, %v5115_v53, %v2538_v61  ;;  %2613 = vst.msk [vmem:[#allocation4 + $0x758] sm:$0xff] %vm750_vm14, %v2538_v61  ;;  %v2764_v10 = vld [vmem:[#allocation4 + $0x450] sm:$0xff] }
 0x413   : > { %2985 = vmatpush.msrb.mxu3 %v3570_v32  ;;  %3058 = vmatpush.msra.mxu2 %v2660_v52  ;;  %v2700_v42 = vld [vmem:[#allocation4 + $0x250] sm:$0xff]  ;;  %v2725_v52 = vld [vmem:[#allocation4 + $0x318] sm:$0xff] }
 0x414   : > { %3116 = vmatpush.msra.mxu1 %v2567_v55  ;;  %v2756_v4 = vld [vmem:[#allocation4 + $0x410] sm:$0xff]  ;;  %v2869_v32 = vld [vmem:[#allocation4 + $0x798] sm:$0xf] }
 0x415   : > { %2986 = vmatpush.msrb.mxu3 %v3571_v44  ;;  %3059 = vmatpush.msra.mxu2 %v2656_v49  ;;  %v2005_v57 = vpop.permute.xlu1 %2004  ;;  %v2692_v49 = vld [vmem:[#allocation4 + $0x210] sm:$0xff]  ;;  %v2721_v44 = vld [vmem:[#allocation4 + $0x2f8] sm:$0xff] }
 0x416   : > { %2987 = vmatmul.f32.vlgmr.msrb.gmra.mxu3 %v5182_v20  ;;  %3117 = vmatpush.msra.mxu1 %v5234_v56  ;;  %v2034_v53 = vsel %vm2022_vm15, %v5144_v60, %v2005_v57  ;;  %2080 = vst.msk [vmem:[#allocation4 + $0x538] sm:$0xff] %vm750_vm14, %v2005_v57  ;;  %v2865_v57 = vld [vmem:[#allocation4 + $0x778] sm:$0xff] }
 0x417   : > { %3071 = vmatpush.msra.mxu3 %v2752_v19  ;;  %3060 = vmatpush.msra.mxu2 %v2652_v7  ;;  %v2817_v19 = vld [vmem:[#allocation4 + $0x5f8] sm:$0xff] }
 0x418   : > { %3118 = vmatpush.msra.mxu1 %v2561_v1  ;;  %v2367_v8 = vpop.permute.xlu2 %2366  ;;  %v2704_v1 = vld [vmem:[#allocation4 + $0x270] sm:$0xff] }
 0x419   : > { %3072 = vmatpush.msra.mxu3 %v2748_v37  ;;  %3061 = vmatpush.msra.mxu2 %v2648_v12  ;;  %v2021_v11 = vpop.permute.xlu0 %2020  ;;  %v5272_v25 = vsel %vm2392_vm4, %v5173_v35, %v2367_v8  ;;  %2446 = vst.msk [vmem:[#allocation4 + $0x678] sm:$0xff] %vm750_vm14, %v2367_v8  ;;  %v2813_v37 = vld [vmem:[#allocation4 + $0x5d8] sm:$0xff] }
 0x41a   : > { %v2040_v60 = vsel %vm2022_vm15, %v5083_v31, %v2021_v11  ;;  %2088 = vst.msk [vmem:[#allocation4 + $0x578] sm:$0xff] %vm750_vm14, %v2021_v11  ;;  %v2732_v31 = vld [vmem:[#allocation4 + $0x350] sm:$0xff]  ;;  %v2713_v12 = vld [vmem:[#allocation4 + $0x2b8] sm:$0xff] }
 0x41b   : > { %3073 = vmatpush.msra.mxu3 %v2744_v40  ;;  %3062 = vmatpush.msra.mxu2 %v3572_v51  ;;  %v2857_v8 = vld [vmem:[#allocation4 + $0x738] sm:$0xff] }
 0x41c   : > { %3095 = vmatpush.msra.mxu0 %v2040_v60  ;;  %v2709_v60 = vld [vmem:[#allocation4 + $0x298] sm:$0xff] }
 0x41d   : > { %3074 = vmatpush.msra.mxu3 %v2740_v48  ;;  %3063 = vmatpush.msra.mxu2 %v3573_v14  ;;  %v2375_v63 = vpop.permute.xlu1 %2374  ;;  %v2853_v51 = vld [vmem:[#allocation4 + $0x718] sm:$0xff] }
 0x41e   : > { %3096 = vmatpush.msra.mxu0 %v5247_v5  ;;  %v5281_v35 = vsel %vm2392_vm4, %v5161_v59, %v2375_v63  ;;  %2450 = vst.msk [vmem:[#allocation4 + $0x698] sm:$0xff] %vm750_vm14, %v2375_v63  ;;  %v2728_v59 = vld [vmem:[#allocation4 + $0x330] sm:$0xff]  ;;  %v2805_v48 = vld [vmem:[#allocation4 + $0x598] sm:$0xff] }
 0x41f   : > { %3075 = vmatpush.msra.mxu3 %v2736_v13  ;;  %3064 = vmatpush.msra.mxu2 %v4993_v39  ;;  %v3574_v39 = vld [vmem:[#allocation4 + $0x10] sm:$0xff]  ;;  %v2705_v14 = vld [vmem:[#allocation4 + $0x278] sm:$0xff] }
 0x420   : > { %3097 = vmatpush.msra.mxu0 %v2034_v53  ;;  %v2351_v56 = vpop.permute.xlu2 %2350  ;;  %v2772_v5 = vld [vmem:[#allocation4 + $0x490] sm:$0xff]  ;;  %v2861_v53 = vld [vmem:[#allocation4 + $0x758] sm:$0xff] }
 0x421   : > { %3076 = vmatpush.msra.mxu3 %v2732_v31  ;;  %3065 = vmatpush.msra.mxu2 %v5008_v23  ;;  %v2514_v50 = vpop.permute.xlu0 %2513  ;;  %v2395_v28 = vsel %vm2392_vm4, %v5187_v62, %v2351_v56  ;;  %2438 = vst.msk [vmem:[#allocation4 + $0x638] sm:$0xf0] %vm959_vm11, %v2351_v56  ;;  %v2753_v23 = vld [vmem:[#allocation4 + $0x3f8] sm:$0xff]  ;;  %v2780_v62 = vld [vmem:[#allocation4 + $0x4d0] sm:$0xff] }
 0x422   : > { %3098 = vmatpush.msra.mxu0 %v2788_v6  ;;  %v2558_v36 = vsel %vm2555_vm1, %v5153_v54, %v2514_v50  ;;  %2601 = vst.msk [vmem:[#allocation4 + $0x6f8] sm:$0xff] %vm750_vm14, %v2514_v50  ;;  %v2749_v54 = vld [vmem:[#allocation4 + $0x3d8] sm:$0xff] }
 0x423   : > { %3077 = vmatpush.msra.mxu3 %v2728_v59  ;;  %3066 = vmatpush.msra.mxu2 %v3574_v39  ;;  %2437 = vst [vmem:[#allocation4 + $0x630] sm:$0xf0] %v2395_v28  ;;  %v2801_v63 = vld [vmem:[#allocation4 + $0x578] sm:$0xff] }
 0x424   : > { %3099 = vmatpush.msra.mxu0 %v2784_v45  ;;  %3119 = vmatpush.msra.mxu1 %v2558_v36  ;;  %v2689_v13 = vld [vmem:[#allocation4 + $0x1f8] sm:$0xff] }
 0x425   : > { %3078 = vmatpush.msra.mxu3 %v2724_v29  ;;  %3151 = vmatpush.msrb.mxu2 %v2753_v23  ;;  %v2184_v46 = vpop.permute.xlu1 %2183  ;;  %v2797_v31 = vld [vmem:[#allocation4 + $0x558] sm:$0xff] }
 0x426   : > { %3100 = vmatpush.msra.mxu0 %v2780_v62  ;;  %3120 = vmatpush.msra.mxu1 %v5259_v43  ;;  %v2203_v47 = vsel %vm2185_vm0, %v5195_v38, %v2184_v46  ;;  %2251 = vst.msk [vmem:[#allocation4 + $0x638] sm:$0xf] %vm771_vm8, %v2184_v46  ;;  %v2696_v43 = vld [vmem:[#allocation4 + $0x230] sm:$0xff]  ;;  %v2685_v56 = vld [vmem:[#allocation4 + $0x1d8] sm:$0xff]  ;;  %vm3243_vm8 = vcmask 917248  }
 0x427   : > { %3079 = vmatpush.msra.mxu3 %v2720_v3  ;;  %3152 = vmatpush.msrb.mxu2 %v2749_v54  ;;  %2250 = vst [vmem:[#allocation4 + $0x630] sm:$0xf] %v2203_v47  ;;  %v2845_v6 = vld [vmem:[#allocation4 + $0x6d8] sm:$0xff] }
 0x428   : > { %3101 = vmatpush.msra.mxu0 %v2776_v58  ;;  %3067 = vmatmul.f32.vlgmr.msra.gmra.mxu2 %v5182_v20  ;;  %v2697_v50 = vld [vmem:[#allocation4 + $0x238] sm:$0xff] }
 0x429   : > { %3080 = vmatpush.msra.mxu3 %v2716_v26  ;;  %3153 = vmatpush.msrb.mxu2 %v2745_v34  ;;  %v2383_v41 = vpop.permute.xlu0 %2382  ;;  %v2793_v28 = vld [vmem:[#allocation4 + $0x538] sm:$0xff] }
 0x42a   : > { %3102 = vmatpush.msra.mxu0 %v2772_v5  ;;  %v2407_v38 = vsel %vm2392_vm4, %v5175_v9, %v2383_v41  ;;  %2454 = vst.msk [vmem:[#allocation4 + $0x6b8] sm:$0xff] %vm750_vm14, %v2383_v41  ;;  %v2760_v9 = vld [vmem:[#allocation4 + $0x430] sm:$0xff]  ;;  %v2681_v59 = vld [vmem:[#allocation4 + $0x1b8] sm:$0xff] }
 0x42b   : > { %3081 = vmatpush.msra.mxu3 %v2712_v30  ;;  %3154 = vmatpush.msrb.mxu2 %v2741_v21  ;;  %v2693_v39 = vld [vmem:[#allocation4 + $0x218] sm:$0xff] }
 0x42c   : > { %3103 = vmatpush.msra.mxu0 %v2768_v17  ;;  %3121 = vmatpush.msra.mxu1 %v2407_v38  ;;  %v2789_v45 = vld [vmem:[#allocation4 + $0x518] sm:$0xff] }
 0x42d   : > { %3082 = vmatpush.msra.mxu3 %v2708_v18  ;;  %3155 = vmatpush.msrb.mxu2 %v2737_v2  ;;  %v2677_v29 = vld [vmem:[#allocation4 + $0x198] sm:$0xff] }
 0x42e   : > { %3104 = vmatpush.msra.mxu0 %v2764_v10  ;;  %3122 = vmatpush.msra.mxu1 %v5281_v35  ;;  %v2824_v7 = vld [vmem:[#allocation4 + $0x630] sm:$0xff]  ;;  %v2701_v35 = vld [vmem:[#allocation4 + $0x258] sm:$0xff] }
 0x42f   : > { %3083 = vmatpush.msra.mxu3 %v2704_v1  ;;  %3156 = vmatpush.msrb.mxu2 %v2733_v16  ;;  %v2837_v23 = vld [vmem:[#allocation4 + $0x698] sm:$0xff] }
 0x430   : > { %3105 = vmatpush.msra.mxu0 %v2760_v9  ;;  %3123 = vmatpush.msra.mxu1 %v5272_v25  ;;  %v2809_v25 = vld [vmem:[#allocation4 + $0x5b8] sm:$0xff] }
 0x431   : > { %3084 = vmatpush.msra.mxu3 %v2700_v42  ;;  %3157 = vmatpush.msrb.mxu2 %v2729_v24  ;;  %v2359_v61 = vpop.permute.xlu0 %2358  ;;  %v2841_v36 = vld [vmem:[#allocation4 + $0x6b8] sm:$0xff] }
 0x432   : > { %3106 = vmatpush.msra.mxu0 %v2756_v4  ;;  %v2398_v55 = vsel %vm2392_vm4, %v5213_v0, %v2359_v61  ;;  %2442 = vst.msk [vmem:[#allocation4 + $0x658] sm:$0xff] %vm750_vm14, %v2359_v61  ;;  %v2717_v0 = vld [vmem:[#allocation4 + $0x2d8] sm:$0xff]  ;;  %v2908_v4 = vpop.f32.mrf.mxu0 }
 0x433   : > { %3085 = vmatpush.msra.mxu3 %v2696_v43  ;;  %3158 = vmatpush.msrb.mxu2 %v2725_v52  ;;  %v2785_v62 = vld [vmem:[#allocation4 + $0x4f8] sm:$0xff] }
 0x434   : > { %3430 = vmatpush.msk.msrb.mxu0 %vm245_vm2, %v2869_v32  ;;  %3124 = vmatpush.msra.mxu1 %v2398_v55  ;;  %v2673_v46 = vld [vmem:[#allocation4 + $0x178] sm:$0xff]  ;;  %v2948_v32 = vpop.f32.mrf.mxu2  ;;  %vm3211_vm2 = vcmask 130048  }
 0x435   : > { %3086 = vmatpush.msra.mxu3 %v2692_v49  ;;  %3159 = vmatpush.msrb.mxu2 %v2721_v44  ;;  %v2833_v3 = vld [vmem:[#allocation4 + $0x678] sm:$0xff] }
 0x436   : > { %3087 = vmatmul.f32.vlgmr.msra.gmra.mxu3 %v5170_v33  ;;  %3195 = vmatpush.msrb.mxu0 %v2865_v57  ;;  %v2781_v54 = vld [vmem:[#allocation4 + $0x4d8] sm:$0xff] }
 0x437   : > { %3171 = vmatpush.msrb.mxu3 %v2817_v19  ;;  %3125 = vmatpush.msra.mxu1 %v2824_v7  ;;  %v2669_v47 = vld [vmem:[#allocation4 + $0x158] sm:$0xff] }
 0x438   : > { %3160 = vmatpush.msrb.mxu2 %v2717_v0  ;;  %3196 = vmatpush.msrb.mxu0 %v2861_v53  ;;  %v2777_v26 = vld [vmem:[#allocation4 + $0x4b8] sm:$0xff] }
 0x439   : > { %3172 = vmatpush.msrb.mxu3 %v2813_v37  ;;  %3107 = vmatmul.f32.vlgmr.msra.gmra.mxu0 %v5192_v27  ;;  %v2176_v11 = vpop.permute.xlu0 %2175  ;;  %v2829_v58 = vld [vmem:[#allocation4 + $0x658] sm:$0xff] }
 0x43a   : > { %3161 = vmatpush.msrb.mxu2 %v2713_v12  ;;  %3197 = vmatpush.msrb.mxu0 %v2857_v8  ;;  %v2200_v40 = vsel %vm2185_vm0, %v5230_v22, %v2176_v11  ;;  %2247 = vst.msk [vmem:[#allocation4 + $0x618] sm:$0xff] %vm750_vm14, %v2176_v11  ;;  %v2849_v22 = vld [vmem:[#allocation4 + $0x6f8] sm:$0xff]  ;;  %vm3217_vm14 = vcmask 261248  }
 0x43b   : > { %3173 = vmatpush.msrb.mxu3 %v2809_v25  ;;  %3126 = vmatpush.msra.mxu1 %v2200_v40  ;;  %v2665_v34 = vld [vmem:[#allocation4 + $0x138] sm:$0xff] }
 0x43c   : > { %3162 = vmatpush.msrb.mxu2 %v2709_v60  ;;  %3198 = vmatpush.msrb.mxu0 %v2853_v51  ;;  %v2825_v5 = vld [vmem:[#allocation4 + $0x638] sm:$0xff] }
 0x43d   : > { %3174 = vmatpush.msrb.mxu3 %v2805_v48  ;;  %3429 = vmatmul.msk.f32.vlgmr.msra.gmra.mxu1 %vm577_vm3, %v5206_v15  ;;  %v2773_v41 = vld [vmem:[#allocation4 + $0x498] sm:$0xff] }
 0x43e   : > { %3163 = vmatpush.msrb.mxu2 %v2705_v14  ;;  %3131 = vmatpush.msrb.mxu1 %v2689_v13  ;;  %v2661_v30 = vld [vmem:[#allocation4 + $0x118] sm:$0xff] }
 0x43f   : > { %3175 = vmatpush.msrb.mxu3 %v2801_v63  ;;  %3199 = vmatpush.msrb.mxu0 %v2849_v22  ;;  %v2769_v21 = vld [vmem:[#allocation4 + $0x478] sm:$0xff] }
 0x440   : > { %3164 = vmatpush.msrb.mxu2 %v2701_v35  ;;  %3132 = vmatpush.msrb.mxu1 %v2685_v56  ;;  %v2657_v38 = vld [vmem:[#allocation4 + $0xf8] sm:$0xff] }
 0x441   : > { %3176 = vmatpush.msrb.mxu3 %v2797_v31  ;;  %3200 = vmatpush.msrb.mxu0 %v2845_v6  ;;  %v2765_v17 = vld [vmem:[#allocation4 + $0x458] sm:$0xff] }
 0x442   : > { %3165 = vmatpush.msrb.mxu2 %v2697_v50  ;;  %3133 = vmatpush.msrb.mxu1 %v2681_v59  ;;  %v2653_v18 = vld [vmem:[#allocation4 + $0xd8] sm:$0xff] }
 0x443   : > { %3177 = vmatpush.msrb.mxu3 %v2793_v28  ;;  %3201 = vmatpush.msrb.mxu0 %v2841_v36  ;;  %v2761_v2 = vld [vmem:[#allocation4 + $0x438] sm:$0xff] }
 0x444   : > { %3166 = vmatpush.msrb.mxu2 %v2693_v39  ;;  %3134 = vmatpush.msrb.mxu1 %v2677_v29  ;;  %v2649_v10 = vld [vmem:[#allocation4 + $0xb8] sm:$0xff] }
 0x445   : > { %3178 = vmatpush.msrb.mxu3 %v2789_v45  ;;  %3202 = vmatpush.msrb.mxu0 %v2837_v23  ;;  %v2757_v1 = vld [vmem:[#allocation4 + $0x418] sm:$0xff] }
 0x446   : > { %3167 = vmatmul.f32.vlgmr.msrb.gmra.mxu2 %v5170_v33  ;;  %3135 = vmatpush.msrb.mxu1 %v2673_v46  ;;  %v2821_v33 = vld [vmem:[#allocation4 + $0x618] sm:$0xff] }
 0x447   : > { %3179 = vmatpush.msrb.mxu3 %v2785_v62  ;;  %3203 = vmatpush.msrb.mxu0 %v2833_v3  ;;  %v2645_v16 = vld [vmem:[#allocation4 + $0x98] sm:$0xff] }
 0x448   : > { %3136 = vmatpush.msrb.mxu1 %v2669_v47  ;;  %v2641_v9 = vld [vmem:[#allocation4 + $0x78] sm:$0xff] }
 0x449   : > { %3180 = vmatpush.msrb.mxu3 %v2781_v54  ;;  %3204 = vmatpush.msrb.mxu0 %v2829_v58  ;;  %v2637_v42 = vld [vmem:[#allocation4 + $0x58] sm:$0xff] }
 0x44a   : > { %3137 = vmatpush.msrb.mxu1 %v2665_v34  ;;  %v2633_v24 = vld [vmem:[#allocation4 + $0x38] sm:$0xff] }
 0x44b   : > { %3181 = vmatpush.msrb.mxu3 %v2777_v26  ;;  %3205 = vmatpush.msrb.mxu0 %v2825_v5 }
 0x44c   : > { %3138 = vmatpush.msrb.mxu1 %v2661_v30 }
 0x44d   : > { %3182 = vmatpush.msrb.mxu3 %v2773_v41  ;;  %3206 = vmatpush.msrb.mxu0 %v2821_v33 }
 0x44e   : > { %3139 = vmatpush.msrb.mxu1 %v2657_v38  ;;  %3431 = vmatmul.msk.f32.vlgmr.msrb.gmra.mxu0 %vm577_vm3, %v5206_v15  ;;  %v2629_v15 = vld [vmem:[#allocation4 + $0x18] sm:$0xff]  ;;  %vm3222_vm3 = vcmask 392448  }
 0x44f   : > { %3183 = vmatpush.msrb.mxu3 %v2769_v21 }
 0x450   : > { %3140 = vmatpush.msrb.mxu1 %v2653_v18 }
 0x451   : > { %3184 = vmatpush.msrb.mxu3 %v2765_v17 }
 0x452   : > { %3141 = vmatpush.msrb.mxu1 %v2649_v10 }
 0x453   : > { %3185 = vmatpush.msrb.mxu3 %v2761_v2  ;;  %v2928_v43 = vpop.f32.mrf.mxu1 }
 0x454   : > { %3142 = vmatpush.msrb.mxu1 %v2645_v16 }
 0x455   : > { %3186 = vmatpush.msrb.mxu3 %v2757_v1 }
 0x456   : > { %3187 = vmatmul.f32.vlgmr.msrb.gmra.mxu3 %v5192_v27  ;;  %3143 = vmatpush.msrb.mxu1 %v2641_v9 }
 0x458   : > { %3144 = vmatpush.msrb.mxu1 %v2637_v42 }
 0x45a   : > { %3145 = vmatpush.msrb.mxu1 %v2633_v24 }
 0x45b   : > { %v3028_v7 = vpop.f32.mrf.mxu1 }
 0x45c   : > { %3146 = vmatpush.msrb.mxu1 %v2629_v15 }
 0x45d   : > { %3147 = vmatmul.f32.vlgmr.msrb.gmra.mxu1 %v5182_v20  ;;  %v3008_v20 = vpop.f32.mrf.mxu0 }
 0x46c   : > { %v2874_v61 = vpop.permute.xlu1 %2873 }
 0x46d   : > { %v2909_v52 = vadd.f32 %v2908_v4, %v2874_v61 }
 0x46f   : > { %v2929_v55 = vadd.f32 %v2928_v43, %v2909_v52 }
 0x471   : > { %v2949_v49 = vadd.f32 %v2948_v32, %v2929_v55 }
 0x479   : > { %v2968_v44 = vpop.f32.mrf.mxu3 }
 0x47a   : > { %v2969_v57 = vadd.f32 %v2968_v44, %v2949_v49 }
 0x47c   : > { %3214 = vrot.lane.b32.xlu0 %v2969_v57, %s3756_s27  ;;  %3212 = vst.msk [vmem:[%s5320_s8] sm:$0xff] %vm3211_vm2, %v2969_v57  ;;  %s3768_s27 = smov 116  }
 0x487   : > { %v3048_v53 = vpop.f32.mrf.mxu2 }
 0x499   : > { %v2988_v27 = vpop.f32.mrf.mxu3 }
 0x49a   : > { %v2989_v19 = vadd.f32 %v2988_v27, %v2874_v61 }
 0x49c   : > { %v3009_v0 = vadd.f32 %v3008_v20, %v2989_v19 }
 0x49e   : > { %v3029_v37 = vadd.f32 %v3028_v7, %v3009_v0 }
 0x4a0   : > { %v3049_v12 = vadd.f32 %v3048_v53, %v3029_v37 }
 0x4a2   : > { %3254 = vrot.lane.b32.xlu1 %v3049_v12, %s3759_s18  ;;  %3250 = vrot.lane.b32.xlu2 %v3049_v12, %s3749_s24  ;;  %s3766_s24 = smov 78  }
 0x4aa   : > { %3224 = vrot.lane.b32.xlu1 %v2969_v57, %s3760_s19  ;;  %3219 = vrot.lane.b32.xlu2 %v2969_v57, %s3761_s25  ;;  %s3300_s19 = sshll.u32 %s5320_s8, 4  ;;  %s3301_s19 = int_to_ptr.vmem [resolvable:$true] %s3300_s19 }
 0x4ab   : > { %v3068_v8 = vpop.f32.mrf.mxu2 }
 0x4ac   : > { %v3069_v11 = vadd.f32 %v3068_v8, %v2874_v61 }
 0x4b6   : > { %v3108_v40 = vpop.f32.mrf.mxu0 }
 0x4b9   : > { %v3088_v25 = vpop.f32.mrf.mxu3 }
 0x4ba   : > { %v3089_v60 = vadd.f32 %v3088_v25, %v3069_v11  ;;  %v3128_v51 = vpop.f32.mrf.mxu1 }
 0x4bc   : > { %v3109_v48 = vadd.f32 %v3108_v40, %v3089_v60 }
 0x4be   : > { %v3129_v14 = vadd.f32 %v3128_v51, %v3109_v48 }
 0x4c0   : > { %3267 = vrot.lane.b32.xlu1 %v3129_v14, %s3762_s26  ;;  %3263 = vrot.lane.b32.xlu2 %v3129_v14, %s3763_s21  ;;  %s3285_s26 = scalar_lea.sflag [#allocation7], %s3890_s29 }
 0x4c1   : > { %3259 = vrot.lane.b32.xlu0 %v3129_v14, %s3764_s28 }
 0x4c8   : > { %3240 = vrot.lane.b32.xlu1 %v3049_v12, %s3765_s4  ;;  %3235 = vrot.lane.b32.xlu2 %v3049_v12, %s3766_s24  ;;  %s3655_s24 = scalar_lea.hbm %s5384_s3, 32 }
 0x4c9   : > { %3229 = vrot.lane.b32.xlu0 %v2969_v57, %s3767_s7  ;;  %v3168_v13 = vpop.f32.mrf.mxu2 }
 0x4cb   : > { %v3208_v56 = vpop.f32.mrf.mxu0 }
 0x4d0   : > { %3275 = vrot.lane.b32.xlu2 %v3129_v14, %s3768_s27 }
 0x4d1   : > { %3271 = vrot.lane.b32.xlu0 %v3129_v14, %s3746_s11  ;;  %s3438_s11 = sshll.u32 %s3713_s15, 4 }
 0x4d2   : > { %s3298_s18 = scalar_lea.hbm %s5384_s3, %s3438_s11 }
 0x4d3   : > { %s3302_s25 = sshll.u32 %s3298_s18, 4  ;;  %s3303_s25 = int_to_ptr.hbm [resolvable:$true] %s3302_s25 }
 0x4d4   : > { %s3649_s21 = sshra.s32 %s3303_s25, 4  ;;  %s3650_s21 = int_to_ptr.hbm [resolvable:$true] %s3649_s21 }
 0x4d5   : > { %s3651_s28 = scalar_lea.hbm %s3650_s21, 16  ;;  %p3656_p11 = scmp.lt.s32.totalorder %s3650_s21, %s5384_s3 }
 0x4d6   : > { %p3652_p1 = scmp.ne.s32.totalorder %s3650_s21, %s3651_s28  ;;  %p3657_p12 = scmp.lt.s32.totalorder %s3655_s24, %s3651_s28 }
 0x4d8   : > { %p3653_p4 = pnand %p3652_p1, %p3870_p5  ;;  %p3658_p13 = por %p3657_p12, %p3656_p11 }
 0x4d9   : > { %3245 = vrot.lane.b32.xlu0 %v3049_v12, %s3769_s9  ;;  %v3188_v35 = vpop.f32.mrf.mxu3 }
 0x4da   : > { %v3148_v63 = vpop.f32.mrf.mxu1  ;;  %p3654_p8 = pneg %p3653_p4 }
 0x4db   : > { %v3149_v22 = vadd.f32 %v3148_v63, %v2874_v61 }
 0x4dc   : > { %p3659_p0 = pnand %p3658_p13, %p3654_p8 }
 0x4dd   : > { %v3169_v31 = vadd.f32 %v3168_v13, %v3149_v22 }
 0x4df   : > { %v3189_v6 = vadd.f32 %v3188_v35, %v3169_v31 }
 0x4e1   : > { %v3209_v50 = vadd.f32 %v3208_v56, %v3189_v6 }
 0x4e3   : > { %3280 = vrot.lane.b32.xlu1 %v3209_v50, %s3770_s22 }
 0x4ee   : > { %v3215_v28 = vpop.permute.xlu0 %3214 }
 0x4ef   : > { %3218 = vst.msk [vmem:[%s5320_s8] sm:$0xff] %vm3217_vm14, %v3215_v28 }
 0x4fc   : > { %v3251_v59 = vpop.permute.xlu2 %3250 }
 0x4fd   : > { %3253 = vst.msk [vmem:[%s5320_s8 + $0x8] sm:$0xff] %vm3211_vm2, %v3251_v59 }
 0x504   : > { %v3220_v36 = vpop.permute.xlu2 %3219 }
 0x505   : > { %3223 = vst.msk [vmem:[%s5320_s8] sm:$0xff] %vm3222_vm3, %v3220_v36 }
 0x514   : > { %v3255_v39 = vpop.permute.xlu1 %3254 }
 0x515   : > { %3257 = vst.msk [vmem:[%s5320_s8 + $0x8] sm:$0xff] %vm3217_vm14, %v3255_v39 }
 0x51a   : > { %v3264_v29 = vpop.permute.xlu2 %3263 }
 0x51c   : > { %v3225_v45 = vpop.permute.xlu1 %3224 }
 0x51d   : > { %3228 = vst.msk [vmem:[%s5320_s8] sm:$0xff] %vm3227_vm5, %v3225_v45 }
 0x522   : > { %v3236_v46 = vpop.permute.xlu2 %3235 }
 0x52a   : > { %v3276_v58 = vpop.permute.xlu2 %3275 }
 0x532   : > { %v3268_v23 = vpop.permute.xlu1 %3267 }
 0x533   : > { %v3260_v62 = vpop.permute.xlu0 %3259 }
 0x534   : > { %3262 = vst.msk [vmem:[%s5320_s8 + $0x8] sm:$0xff] %vm3222_vm3, %v3260_v62 }
 0x535   : > { %3266 = vst.msk [vmem:[%s5320_s8 + $0x8] sm:$0xff] %vm3227_vm5, %v3264_v29 }
 0x536   : > { %3270 = vst.msk [vmem:[%s5320_s8 + $0x8] sm:$0xff] %vm3232_vm6, %v3268_v23 }
 0x53a   : > { %v3241_v54 = vpop.permute.xlu1 %3240 }
 0x53b   : > { %v3230_v3 = vpop.permute.xlu0 %3229 }
 0x53c   : > { %3233 = vst.msk [vmem:[%s5320_s8] sm:$0xff] %vm3232_vm6, %v3230_v3 }
 0x53d   : > { %3239 = vst.msk [vmem:[%s5320_s8] sm:$0xff] %vm3238_vm7, %v3236_v46 }
 0x53e   : > { %3244 = vst.msk [vmem:[%s5320_s8] sm:$0xff] %vm3243_vm8, %v3241_v54 }
 0x543   : > { %v3272_v47 = vpop.permute.xlu0 %3271 }
 0x544   : > { %3274 = vst.msk [vmem:[%s5320_s8 + $0x8] sm:$0xff] %vm3238_vm7, %v3272_v47 }
 0x545   : > { %3278 = vst.msk [vmem:[%s5320_s8 + $0x8] sm:$0xff] %vm3243_vm8, %v3276_v58 }
 0x54b   : > { %v3246_v26 = vpop.permute.xlu0 %3245 }
 0x54c   : > { %3249 = vst.msk [vmem:[%s5320_s8] sm:$0xff] %vm3248_vm9, %v3246_v26 }
 0x555   : > { %v3281_v34 = vpop.permute.xlu1 %3280 }
 0x556   : > { %3283 = vst.msk [vmem:[%s5320_s8 + $0x8] sm:$0xff] %vm3248_vm9, %v3281_v34 }
 0x557   : > { %3662 = shalt.err (!%p3659_p0)
}
 0x558   : > { %3445 = dma.vmem_to_hbm [thread:$0]  (%p3870_p5), %s3301_s19, 256, %s3303_s25, %s3285_s26  }
 0x559 PF: > { %s3314_s29 = sand.u32 1, %s3701_s12   ;;  %p3456_p3 = pnand %p3416_p9, %p3840_p6 }
 0x55a   : > { %s3315_s8 = scalar_lea.sflag [#allocation7], %s3314_s29 }
 0x55b   : > { %p3457_p7 = pneg %p3456_p3 }
 0x55d   : > { %3696 = dma.done.wait (%p3457_p7), %s3315_s8, 256  }
 0x55e   : > { %3698 = vsyncadd (%p3457_p7), %s3315_s8, 4294967040  ;;  %s20_s17 = sadd.s32 1, %s3721_s17   ;;  %s5392_s12 = smov %s3705_s13 }
 0x55f   : > { %p17_p10 = scmp.ge.s32.totalorder %s20_s17, 4   ;;  %s5393_s13 = smov %s3709_s14 }
 0x560   : > { %s5394_s14 = smov %s3879_s10  ;;  %s5395_s15 = smov %s3717_s16 }
 0x561   : > { %s5396_s16 = smov %s5398_s30  ;;  %19 = sbr.rel (!%p17_p10) target bundleno = 7 (0x7), region = 103 }
 0x566   :  { %3321 = vsyncpa [#allocation6], 1 }
 0x567   :  { %3323 = vsyncpa [#allocation6 + $0x1], 1 }
 0x568   :  { %3324 = vsyncpa [#allocation9], 1 }
 0x569   :  { %3325 = vsyncpa [#allocation7], 1 }
 0x56a   :  { %3327 = vsyncpa [#allocation7 + $0x1], 1 }

</bundles_post_ra>
